<compile_context>
chip_gen: v5e
topology: v5e:2x2
jax: 0.10.0
libtpu: 0.0.40
codegen_flags: <defaults>
</compile_context>

<pallas_src>
import jax
import jax.numpy as jnp
import numpy as np
from jax import lax
from jax.experimental import pallas as pl
from jax.experimental.pallas import tpu as pltpu

_BN_EPS = 1e-5
_TAPS = tuple((ky, kx) for ky in range(3) for kx in range(3))
_LANES = 128


def _round_up(v, m):
    return ((v + m - 1) // m) * m


# ----------------------------- Pallas kernel ------------------------------ #

def _make_up_kernel(W, S, Cin, K1p, Cmid_p):
    """Fused (conv3x3 -> BN -> ReLU) x2 for one (batch, H-strip) grid point."""
    Se = S + 2            # conv1 rows per strip (1-row recompute overlap each side)
    HWe = Se * W
    HWs = S * W
    K1 = 9 * Cin

    def kernel(x_ref, w1_ref, b1_ref, w2_ref, b2_ref, o_ref, pad2_ref, col2_ref):
        # x_ref:    (H+4, W+2, Cin)    input with 2-row / 1-col zero halo
        # w1_ref:   (K1p, Cmid_p)      conv1 weights, BN1 scale folded, K/Cmid padded
        # b1_ref:   (1, Cmid_p)        BN1 shift (zero in padded channels)
        # w2_ref:   (9*Cmid_p, Cout_p) conv2 weights, BN2 scale folded, padded
        # b2_ref:   (1, Cout_p)        BN2 shift (zero in padded channels)
        # o_ref:    (S*W, Cout_p)      lane-dense output block for this strip
        # pad2_ref: (S+2, W+2, Cmid_p) h1 staging with explicit zero halo ring
        # col2_ref: (S*W, 9*Cmid_p)    conv2 im2col operand (lane-dense strips)
        s = pl.program_id(1)
        r0 = pl.multiple_of(s * S, S)      # first haloed-input row of this strip
        mdt = w1_ref.dtype                  # matmul operand dtype (f32 or bf16)
        sdt = pad2_ref.dtype                # staging dtype (== mdt)

        # ---- conv1 + BN1 + ReLU over the extended strip (S+2 rows), single
        # im2col MXU matmul.  Operand assembled in registers (no scratch
        # store/reload), zero-padded to K1p lanes for an aligned contraction.
        pieces = []
        for (ky, kx) in _TAPS:
            patch = x_ref[pl.ds(r0 + ky, Se), kx:kx + W, :]
            pieces.append(patch.reshape(HWe, Cin).astype(mdt))
        if K1p > K1:
            pieces.append(jnp.zeros((HWe, K1p - K1), mdt))
        col1 = jnp.concatenate(pieces, axis=-1)                  # (HWe, K1p)
        h1 = jnp.dot(col1, w1_ref[...], preferred_element_type=jnp.float32)
        h1 = jnp.maximum(h1 + b1_ref[...], 0.0)                  # (HWe, Cmid_p) f32

        # ---- stage h1 with an explicit zero halo ring (all stores lane-dense,
        # no masking, no uninitialized reads).  Halo *rows* hold the recomputed
        # neighbour-strip h1 rows; they are zeroed only on image-edge strips
        # (that is conv2's zero padding).
        pad2_ref[:, 1:W + 1, :] = h1.astype(sdt).reshape(Se, W, Cmid_p)
        zcol = jnp.zeros((Se, 1, Cmid_p), sdt)
        pad2_ref[:, 0:1, :] = zcol
        pad2_ref[:, W + 1:W + 2, :] = zcol
        zrow = jnp.zeros((1, W + 2, Cmid_p), sdt)

        @pl.when(s == 0)
        def _():
            pad2_ref[0:1, :, :] = zrow

        @pl.when(s == pl.num_programs(1) - 1)
        def _():
            pad2_ref[Se - 1:Se, :, :] = zrow

        # ---- conv2 + BN2 + ReLU: 128-wide (unmasked) tap strips into the
        # im2col scratch, one MXU matmul, lane-dense output store.
        for t, (ky, kx) in enumerate(_TAPS):
            col2_ref[:, t * Cmid_p:(t + 1) * Cmid_p] = (
                pad2_ref[ky:ky + S, kx:kx + W, :].reshape(HWs, Cmid_p))
        out = jnp.dot(col2_ref[...], w2_ref[...],
                      preferred_element_type=jnp.float32)
        out = jnp.maximum(out + b2_ref[...], 0.0)
        o_ref[...] = out.astype(o_ref.dtype)

    return kernel


def pallas_double_conv(x_pad, w1, b1, w2, b2, out_dtype, rows_per_strip):
    """x_pad: (N, H+4, W+2, Cin); returns (N, H*W, Cout_p) lane-dense output."""
    N, Hp4, Wp2, Cin = x_pad.shape
    H, W = Hp4 - 4, Wp2 - 2
    K1p, Cmid_p = w1.shape
    K2, Cout_p = w2.shape
    S = rows_per_strip
    assert H % S == 0, (H, S)
    assert K2 == 9 * Cmid_p and Cmid_p % _LANES == 0 and Cout_p % _LANES == 0
    n_strips = H // S
    HWs = S * W

    kernel = _make_up_kernel(W, S, Cin, K1p, Cmid_p)

    # Explicit VMEM budget: double-buffered I/O blocks + weights + scratch,
    # ~30% headroom, floored at the 32 MiB default, capped for v7x (64 MiB).
    mm_item = w1.dtype.itemsize
    io_bytes = (Hp4 * Wp2 * Cin * x_pad.dtype.itemsize            # input block
                + (K1p * Cmid_p + K2 * Cout_p) * mm_item          # weights
                + (Cmid_p + Cout_p) * 4                           # shifts
                + HWs * Cout_p * np.dtype(out_dtype).itemsize)    # output block
    scratch_bytes = ((S + 2) * Wp2 * Cmid_p + HWs * K2) * mm_item
    raw = 2 * io_bytes + scratch_bytes
    vmem_limit = int(min(max(raw * 13 // 10, 32 << 20), 64 << 20))

    flops = 2 * N * H * W * (K1p * Cmid_p + K2 * Cout_p)
    bytes_accessed = int(x_pad.size * x_pad.dtype.itemsize
                         + (w1.size + w2.size) * mm_item
                         + (b1.size + b2.size) * 4
                         + N * H * W * Cout_p * np.dtype(out_dtype).itemsize)

    grid_spec = pltpu.PrefetchScalarGridSpec(
        num_scalar_prefetch=0,
        grid=(N, n_strips),
        in_specs=[
            # Whole haloed image per batch element; block index is constant
            # across strips -> DMA'd once per batch element.
            pl.BlockSpec((None, Hp4, Wp2, Cin), lambda b, s: (b, 0, 0, 0)),
            pl.BlockSpec((K1p, Cmid_p), lambda b, s: (0, 0)),
            pl.BlockSpec((1, Cmid_p), lambda b, s: (0, 0)),
            pl.BlockSpec((K2, Cout_p), lambda b, s: (0, 0)),
            pl.BlockSpec((1, Cout_p), lambda b, s: (0, 0)),
        ],
        out_specs=pl.BlockSpec((None, HWs, Cout_p), lambda b, s: (b, s, 0)),
        scratch_shapes=[
            pltpu.VMEM((S + 2, Wp2, Cmid_p), w1.dtype),   # haloed h1 staging
            pltpu.VMEM((HWs, K2), w1.dtype),              # conv2 im2col operand
        ],
    )
    return pl.pallas_call(
        kernel,
        out_shape=jax.ShapeDtypeStruct((N, H * W, Cout_p), out_dtype),
        grid_spec=grid_spec,
        compiler_params=pltpu.CompilerParams(
            dimension_semantics=("parallel", "parallel"),
            vmem_limit_bytes=vmem_limit),
        cost_estimate=pl.CostEstimate(
            flops=flops, transcendentals=0, bytes_accessed=bytes_accessed),
    )(x_pad, w1, b1, w2, b2)


# --------------------------- JAX glue (resize etc.) ------------------------ #

def upsample_bilinear_align_corners(x, scale_factor):
    """Matches nn.Upsample(scale_factor, mode='bilinear', align_corners=True). NCHW."""
    N, C, H, W = x.shape
    out_h, out_w = H * scale_factor, W * scale_factor

    def coords(out_size, in_size):
        if out_size == 1:
            src = jnp.zeros((1,), jnp.float32)
        else:
            src = jnp.arange(out_size, dtype=jnp.float32) * (
                (in_size - 1) / (out_size - 1))
        lo = jnp.clip(jnp.floor(src).astype(jnp.int32), 0, in_size - 1)
        hi = jnp.clip(lo + 1, 0, in_size - 1)
        frac = src - lo.astype(jnp.float32)
        return lo, hi, frac

    y0, y1, fy = coords(out_h, H)
    x0, x1, fx = coords(out_w, W)
    r0 = x[:, :, y0, :]
    r1 = x[:, :, y1, :]
    c00, c01 = r0[:, :, :, x0], r0[:, :, :, x1]
    c10, c11 = r1[:, :, :, x0], r1[:, :, :, x1]
    fy = fy[None, None, :, None]
    fx = fx[None, None, None, :]
    top = (1.0 - fx) * c00 + fx * c01
    bot = (1.0 - fx) * c10 + fx * c11
    return (1.0 - fy) * top + fy * bot


def resize_nearest(x, out_h, out_w):
    """Matches F.interpolate(mode='nearest'). NCHW."""
    N, C, H, W = x.shape
    ys = jnp.clip(jnp.floor(jnp.arange(out_h) * (H / out_h)).astype(jnp.int32),
                  0, H - 1)
    xs = jnp.clip(jnp.floor(jnp.arange(out_w) * (W / out_w)).astype(jnp.int32),
                  0, W - 1)
    return x[:, :, ys, :][:, :, :, xs]


def _fold_conv_bn(w_oihw, gamma, beta, mean, var, cin_pad, cout_pad, k_pad,
                  mm_dtype):
    """Fold BN scale into conv weights; pad cin / cout / K for lane density.

    Returns (K_pad, cout_pad) weights in im2col (tap-major, channel-minor)
    order and a (1, cout_pad) f32 shift.
    """
    scale = gamma / jnp.sqrt(var + _BN_EPS)
    shift = beta - mean * scale
    w = jnp.transpose(w_oihw, (2, 3, 1, 0)) * scale[None, None, None, :]  # HWIO
    kh, kw, cin, cout = w.shape
    w = jnp.pad(w, ((0, 0), (0, 0), (0, cin_pad - cin), (0, cout_pad - cout)))
    shift = jnp.pad(shift, (0, cout_pad - cout))
    w2d = w.reshape(kh * kw * cin_pad, cout_pad)
    w2d = jnp.pad(w2d, ((0, k_pad - kh * kw * cin_pad), (0, 0)))
    return w2d.astype(mm_dtype), shift[None, :].astype(jnp.float32)


def up_forward(x1, x2, params, scale_factor=2, matmul_dtype=jnp.float32,
               rows_per_strip=None):
    """Up.forward(x1, x2).  x1/x2 are NCHW; output is NCHW."""
    xu = upsample_bilinear_align_corners(x1, scale_factor)
    if xu.shape[-1] != x2.shape[-1]:   # width-only check mirrors the torch module
        xu = resize_nearest(xu, x2.shape[2], x2.shape[3])
    x = jnp.concatenate([x2, xu], axis=1)                # NCHW channel concat
    x_nhwc = jnp.transpose(x, (0, 2, 3, 1))
    N, H, W, Cin = x_nhwc.shape
    out_dtype = x_nhwc.dtype
    # 2-row top/bottom halo (per-strip conv1 recompute) + 1-col zero halo.
    # bf16 matmul operands also go bf16 here -> half the input DMA bytes.
    x_pad = jnp.pad(x_nhwc, ((0, 0), (2, 2), (1, 1), (0, 0))).astype(matmul_dtype)

    cmid = params["w1"].shape[0]
    cout = params["w2"].shape[0]
    cmid_p = _round_up(cmid, _LANES)      # lane-dense h1 staging / conv2 K strips
    cout_p = _round_up(cout, _LANES)      # lane-dense output channels
    k1_p = _round_up(9 * Cin, _LANES)     # aligned conv1 contraction dim
    w1, b1 = _fold_conv_bn(params["w1"], params["g1"], params["beta1"],
                           params["m1"], params["v1"],
                           cin_pad=Cin, cout_pad=cmid_p, k_pad=k1_p,
                           mm_dtype=matmul_dtype)
    w2, b2 = _fold_conv_bn(params["w2"], params["g2"], params["beta2"],
                           params["m2"], params["v2"],
                           cin_pad=cmid_p, cout_pad=cout_p, k_pad=9 * cmid_p,
                           mm_dtype=matmul_dtype)

    if rows_per_strip is None:
        rows_per_strip = 8 if (H % 8 == 0 and H > 8) else H

    out_flat = pallas_double_conv(x_pad, w1, b1, w2, b2, out_dtype,
                                  rows_per_strip)
    out = out_flat.reshape(N, H, W, cout_p)[..., :cout]
    return jnp.transpose(out, (0, 3, 1, 2))              # back to NCHW


# ------------------------------ reference ---------------------------------- #

def ref_forward(x1, x2, params, scale_factor=2):
    xu = upsample_bilinear_align_corners(x1, scale_factor)
    if xu.shape[-1] != x2.shape[-1]:
        xu = resize_nearest(xu, x2.shape[2], x2.shape[3])
    x = jnp.concatenate([x2, xu], axis=1)

    def conv_bn_relu(h, w, g, beta, m, v):
        y = lax.conv_general_dilated(
            h, w, window_strides=(1, 1), padding=((1, 1), (1, 1)),
            dimension_numbers=("NCHW", "OIHW", "NCHW"))
        s = g / jnp.sqrt(v + _BN_EPS)
        y = y * s[None, :, None, None] + (beta - m * s)[None, :, None, None]
        return jnp.maximum(y, 0.0)

    h = conv_bn_relu(x, params["w1"], params["g1"], params["beta1"],
                     params["m1"], params["v1"])
    return conv_bn_relu(h, params["w2"], params["g2"], params["beta2"],
                        params["m2"], params["v2"])


# ------------------------------ params init -------------------------------- #

def init_params(key, in_channels, out_channels):
    ks = jax.random.split(key, 10)
    f32 = jnp.float32
    return {
        "w1": 0.1 * jax.random.normal(ks[0], (out_channels, in_channels, 3, 3), f32),
        "g1": 1.0 + 0.1 * jax.random.normal(ks[1], (out_channels,), f32),
        "beta1": 0.1 * jax.random.normal(ks[2], (out_channels,), f32),
        "m1": 0.05 * jax.random.normal(ks[3], (out_channels,), f32),
        "v1": jnp.abs(1.0 + 0.1 * jax.random.normal(ks[4], (out_channels,), f32)),
        "w2": 0.1 * jax.random.normal(ks[5], (out_channels, out_channels, 3, 3), f32),
        "g2": 1.0 + 0.1 * jax.random.normal(ks[6], (out_channels,), f32),
        "beta2": 0.1 * jax.random.normal(ks[7], (out_channels,), f32),
        "m2": 0.05 * jax.random.normal(ks[8], (out_channels,), f32),
        "v2": jnp.abs(1.0 + 0.1 * jax.random.normal(ks[9], (out_channels,), f32)),
    }


# --------------------------------- main ------------------------------------ #

if __name__ == "__main__":
    key = jax.random.PRNGKey(0)
    k1, k2, kp = jax.random.split(key, 3)

    # small shapes consistent with the module: x1 is the lower-res feature map
    N, C1, H1, W1 = 2, 4, 8, 8
    C2, H2, W2 = 4, 16, 16
    x1 = jax.random.normal(k1, (N, C1, H1, W1), jnp.float32)
    x2 = jax.random.normal(k2, (N, C2, H2, W2), jnp.float32)

    in_channels = C1 + C2     # channels after concat([x2, upsampled x1])
    out_channels = 8
    params = init_params(kp, in_channels, out_channels)

    ref = jax.block_until_ready(ref_forward(x1, x2, params))

    # f32 matmul operands, 2 H-strips of 8 rows (exercises the strip/halo
    # logic including edge-row zeroing): tight check.
    out = jax.block_until_ready(up_forward(x1, x2, params))
    assert out.shape == (N, out_channels, H2, W2), out.shape
    np.testing.assert_allclose(np.asarray(out), np.asarray(ref),
                               rtol=1e-4, atol=1e-4)

    # bf16 matmul operands + bf16 staging, f32 accumulate, single full-H strip
    # (recommended operand dtype on all generations): loose check.
    out_bf16 = jax.block_until_ready(
        up_forward(x1, x2, params, matmul_dtype=jnp.bfloat16, rows_per_strip=16))
    np.testing.assert_allclose(np.asarray(out_bf16), np.asarray(ref),
                               rtol=5e-2, atol=1e-1)

    print("KERNEL_OK")
</pallas_src>

<mosaic_0001>
module attributes {stable_mosaic.version = 11 : i64} {
  func.func @kernel(%arg0: i32, %arg1: i32, %arg2: memref<1x20x18x8xf32, #tpu.memory_space<vmem>>, %arg3: memref<128x128xf32, #tpu.memory_space<vmem>>, %arg4: memref<1x128xf32, #tpu.memory_space<vmem>>, %arg5: memref<1152x128xf32, #tpu.memory_space<vmem>>, %arg6: memref<1x128xf32, #tpu.memory_space<vmem>>, %arg7: memref<1x128x128xf32, #tpu.memory_space<vmem>>, %arg8: memref<10x18x128xf32, #tpu.memory_space<vmem>>, %arg9: memref<128x1152xf32, #tpu.memory_space<vmem>>) attributes {dimension_semantics = [#tpu.dimension_semantics<parallel>, #tpu.dimension_semantics<parallel>], iteration_bounds = array<i64: 2, 2>, scalar_prefetch = 0 : i64, scratch_operands = 2 : i64, tpu.core_type = #tpu.core_type<tc>, window_params = [{transform_indices = @transform_0, window_bounds = array<i64: 1, 20, 18, 8>}, {pipeline_mode = #tpu.pipeline_mode<synchronous>, transform_indices = @transform_1, window_bounds = array<i64: 128, 128>}, {pipeline_mode = #tpu.pipeline_mode<synchronous>, transform_indices = @transform_2, window_bounds = array<i64: 1, 128>}, {pipeline_mode = #tpu.pipeline_mode<synchronous>, transform_indices = @transform_3, window_bounds = array<i64: 1152, 128>}, {pipeline_mode = #tpu.pipeline_mode<synchronous>, transform_indices = @transform_4, window_bounds = array<i64: 1, 128>}, {transform_indices = @transform_5, window_bounds = array<i64: 1, 128, 128>}]} {
    %c8_i32 = arith.constant 8 : i32
    %0 = arith.muli %arg1, %c8_i32 : i32
    %1 = tpu.assume_multiple %0, 8 : i32
    %c0_i32 = arith.constant 0 : i32
    %2 = arith.addi %1, %c0_i32 : i32
    %c0 = arith.constant 0 : index
    %3 = arith.index_cast %2 : i32 to index
    %c0_0 = arith.constant 0 : index
    %c0_1 = arith.constant 0 : index
    %4 = vector.load %arg2[%c0, %3, %c0_0, %c0_1] : memref<1x20x18x8xf32, #tpu.memory_space<vmem>>, vector<1x10x16x8xf32>
    %5 = vector.shape_cast %4 : vector<1x10x16x8xf32> to vector<10x16x8xf32>
    %6 = vector.shape_cast %5 : vector<10x16x8xf32> to vector<160x8xf32>
    %c0_i32_2 = arith.constant 0 : i32
    %7 = arith.addi %1, %c0_i32_2 : i32
    %c0_3 = arith.constant 0 : index
    %8 = arith.index_cast %7 : i32 to index
    %c1 = arith.constant 1 : index
    %c0_4 = arith.constant 0 : index
    %9 = vector.load %arg2[%c0_3, %8, %c1, %c0_4] : memref<1x20x18x8xf32, #tpu.memory_space<vmem>>, vector<1x10x16x8xf32>
    %10 = vector.shape_cast %9 : vector<1x10x16x8xf32> to vector<10x16x8xf32>
    %11 = vector.shape_cast %10 : vector<10x16x8xf32> to vector<160x8xf32>
    %c0_i32_5 = arith.constant 0 : i32
    %12 = arith.addi %1, %c0_i32_5 : i32
    %c0_6 = arith.constant 0 : index
    %13 = arith.index_cast %12 : i32 to index
    %c2 = arith.constant 2 : index
    %c0_7 = arith.constant 0 : index
    %14 = vector.load %arg2[%c0_6, %13, %c2, %c0_7] : memref<1x20x18x8xf32, #tpu.memory_space<vmem>>, vector<1x10x16x8xf32>
    %15 = vector.shape_cast %14 : vector<1x10x16x8xf32> to vector<10x16x8xf32>
    %16 = vector.shape_cast %15 : vector<10x16x8xf32> to vector<160x8xf32>
    %c1_i32 = arith.constant 1 : i32
    %17 = arith.addi %1, %c1_i32 : i32
    %c0_8 = arith.constant 0 : index
    %18 = arith.index_cast %17 : i32 to index
    %c0_9 = arith.constant 0 : index
    %c0_10 = arith.constant 0 : index
    %19 = vector.load %arg2[%c0_8, %18, %c0_9, %c0_10] : memref<1x20x18x8xf32, #tpu.memory_space<vmem>>, vector<1x10x16x8xf32>
    %20 = vector.shape_cast %19 : vector<1x10x16x8xf32> to vector<10x16x8xf32>
    %21 = vector.shape_cast %20 : vector<10x16x8xf32> to vector<160x8xf32>
    %c1_i32_11 = arith.constant 1 : i32
    %22 = arith.addi %1, %c1_i32_11 : i32
    %c0_12 = arith.constant 0 : index
    %23 = arith.index_cast %22 : i32 to index
    %c1_13 = arith.constant 1 : index
    %c0_14 = arith.constant 0 : index
    %24 = vector.load %arg2[%c0_12, %23, %c1_13, %c0_14] : memref<1x20x18x8xf32, #tpu.memory_space<vmem>>, vector<1x10x16x8xf32>
    %25 = vector.shape_cast %24 : vector<1x10x16x8xf32> to vector<10x16x8xf32>
    %26 = vector.shape_cast %25 : vector<10x16x8xf32> to vector<160x8xf32>
    %c1_i32_15 = arith.constant 1 : i32
    %27 = arith.addi %1, %c1_i32_15 : i32
    %c0_16 = arith.constant 0 : index
    %28 = arith.index_cast %27 : i32 to index
    %c2_17 = arith.constant 2 : index
    %c0_18 = arith.constant 0 : index
    %29 = vector.load %arg2[%c0_16, %28, %c2_17, %c0_18] : memref<1x20x18x8xf32, #tpu.memory_space<vmem>>, vector<1x10x16x8xf32>
    %30 = vector.shape_cast %29 : vector<1x10x16x8xf32> to vector<10x16x8xf32>
    %31 = vector.shape_cast %30 : vector<10x16x8xf32> to vector<160x8xf32>
    %c2_i32 = arith.constant 2 : i32
    %32 = arith.addi %1, %c2_i32 : i32
    %c0_19 = arith.constant 0 : index
    %33 = arith.index_cast %32 : i32 to index
    %c0_20 = arith.constant 0 : index
    %c0_21 = arith.constant 0 : index
    %34 = vector.load %arg2[%c0_19, %33, %c0_20, %c0_21] : memref<1x20x18x8xf32, #tpu.memory_space<vmem>>, vector<1x10x16x8xf32>
    %35 = vector.shape_cast %34 : vector<1x10x16x8xf32> to vector<10x16x8xf32>
    %36 = vector.shape_cast %35 : vector<10x16x8xf32> to vector<160x8xf32>
    %c2_i32_22 = arith.constant 2 : i32
    %37 = arith.addi %1, %c2_i32_22 : i32
    %c0_23 = arith.constant 0 : index
    %38 = arith.index_cast %37 : i32 to index
    %c1_24 = arith.constant 1 : index
    %c0_25 = arith.constant 0 : index
    %39 = vector.load %arg2[%c0_23, %38, %c1_24, %c0_25] : memref<1x20x18x8xf32, #tpu.memory_space<vmem>>, vector<1x10x16x8xf32>
    %40 = vector.shape_cast %39 : vector<1x10x16x8xf32> to vector<10x16x8xf32>
    %41 = vector.shape_cast %40 : vector<10x16x8xf32> to vector<160x8xf32>
    %c2_i32_26 = arith.constant 2 : i32
    %42 = arith.addi %1, %c2_i32_26 : i32
    %c0_27 = arith.constant 0 : index
    %43 = arith.index_cast %42 : i32 to index
    %c2_28 = arith.constant 2 : index
    %c0_29 = arith.constant 0 : index
    %44 = vector.load %arg2[%c0_27, %43, %c2_28, %c0_29] : memref<1x20x18x8xf32, #tpu.memory_space<vmem>>, vector<1x10x16x8xf32>
    %45 = vector.shape_cast %44 : vector<1x10x16x8xf32> to vector<10x16x8xf32>
    %46 = vector.shape_cast %45 : vector<10x16x8xf32> to vector<160x8xf32>
    %cst = arith.constant 0.000000e+00 : f32
    %47 = vector.broadcast %cst : f32 to vector<160x56xf32>
    %48 = tpu.concatenate %6, %11, %16, %21, %26, %31, %36, %41, %46, %47 in 1 : vector<160x8xf32>, vector<160x8xf32>, vector<160x8xf32>, vector<160x8xf32>, vector<160x8xf32>, vector<160x8xf32>, vector<160x8xf32>, vector<160x8xf32>, vector<160x8xf32>, vector<160x56xf32> -> vector<160x128xf32>
    %c0_30 = arith.constant 0 : index
    %c0_31 = arith.constant 0 : index
    %49 = vector.load %arg3[%c0_30, %c0_31] : memref<128x128xf32, #tpu.memory_space<vmem>>, vector<128x128xf32>
    %cst_32 = arith.constant dense<0.000000e+00> : vector<160x128xf32>
    %50 = tpu.matmul %48, %49, %cst_32 {dimension_numbers = #tpu.dot_dimension_numbers<[1], [0], [0], [1], [0, 0, 1, 1], [], []>} : vector<160x128xf32>, vector<128x128xf32>, vector<160x128xf32> -> vector<160x128xf32>
    %c0_33 = arith.constant 0 : index
    %c0_34 = arith.constant 0 : index
    %51 = vector.load %arg4[%c0_33, %c0_34] : memref<1x128xf32, #tpu.memory_space<vmem>>, vector<1x128xf32>
    %52 = vector.broadcast %51 : vector<1x128xf32> to vector<160x128xf32>
    %53 = arith.addf %50, %52 : vector<160x128xf32>
    %cst_35 = arith.constant 0.000000e+00 : f32
    %54 = vector.broadcast %cst_35 : f32 to vector<160x128xf32>
    %55 = arith.maximumf %53, %54 : vector<160x128xf32>
    %56 = vector.shape_cast %55 : vector<160x128xf32> to vector<10x16x128xf32>
    %c0_36 = arith.constant 0 : index
    %c1_37 = arith.constant 1 : index
    %c0_38 = arith.constant 0 : index
    %57 = vector.load %arg8[%c0_36, %c1_37, %c0_38] : memref<10x18x128xf32, #tpu.memory_space<vmem>>, vector<10x16x128xf32>
    tpu.vector_store %arg8[%c0_36, %c1_37, %c0_38], %56 {strides = array<i32>} : memref<10x18x128xf32, #tpu.memory_space<vmem>>, vector<10x16x128xf32>,
    %cst_39 = arith.constant 0.000000e+00 : f32
    %58 = vector.broadcast %cst_39 : f32 to vector<10x1x128xf32>
    %c0_40 = arith.constant 0 : index
    %c0_41 = arith.constant 0 : index
    %c0_42 = arith.constant 0 : index
    %59 = vector.load %arg8[%c0_40, %c0_41, %c0_42] : memref<10x18x128xf32, #tpu.memory_space<vmem>>, vector<10x1x128xf32>
    tpu.vector_store %arg8[%c0_40, %c0_41, %c0_42], %58 {strides = array<i32>} : memref<10x18x128xf32, #tpu.memory_space<vmem>>, vector<10x1x128xf32>,
    %c0_43 = arith.constant 0 : index
    %c17 = arith.constant 17 : index
    %c0_44 = arith.constant 0 : index
    %60 = vector.load %arg8[%c0_43, %c17, %c0_44] : memref<10x18x128xf32, #tpu.memory_space<vmem>>, vector<10x1x128xf32>
    tpu.vector_store %arg8[%c0_43, %c17, %c0_44], %58 {strides = array<i32>} : memref<10x18x128xf32, #tpu.memory_space<vmem>>, vector<10x1x128xf32>,
    %cst_45 = arith.constant 0.000000e+00 : f32
    %61 = vector.broadcast %cst_45 : f32 to vector<1x18x128xf32>
    %c0_i32_46 = arith.constant 0 : i32
    %62 = arith.cmpi eq, %arg1, %c0_i32_46 : i32
    %63 = arith.extui %62 : i1 to i32
    %c0_i32_47 = arith.constant 0 : i32
    %64 = arith.cmpi ne, %63, %c0_i32_47 : i32
    scf.if %64 {
      %c0_98 = arith.constant 0 : index
      %c0_99 = arith.constant 0 : index
      %c0_100 = arith.constant 0 : index
      %106 = vector.load %arg8[%c0_98, %c0_99, %c0_100] : memref<10x18x128xf32, #tpu.memory_space<vmem>>, vector<1x18x128xf32>
      tpu.vector_store %arg8[%c0_98, %c0_99, %c0_100], %61 {strides = array<i32>} : memref<10x18x128xf32, #tpu.memory_space<vmem>>, vector<1x18x128xf32>,
    } else {
    }
    %c1_i32_48 = arith.constant 1 : i32
    %65 = arith.cmpi eq, %arg1, %c1_i32_48 : i32
    %66 = arith.extui %65 : i1 to i32
    %c0_i32_49 = arith.constant 0 : i32
    %67 = arith.cmpi ne, %66, %c0_i32_49 : i32
    scf.if %67 {
      %c9 = arith.constant 9 : index
      %c0_98 = arith.constant 0 : index
      %c0_99 = arith.constant 0 : index
      %106 = vector.load %arg8[%c9, %c0_98, %c0_99] : memref<10x18x128xf32, #tpu.memory_space<vmem>>, vector<1x18x128xf32>
      tpu.vector_store %arg8[%c9, %c0_98, %c0_99], %61 {strides = array<i32>} : memref<10x18x128xf32, #tpu.memory_space<vmem>>, vector<1x18x128xf32>,
    } else {
    }
    %c0_50 = arith.constant 0 : index
    %c0_51 = arith.constant 0 : index
    %c0_52 = arith.constant 0 : index
    %68 = vector.load %arg8[%c0_50, %c0_51, %c0_52] : memref<10x18x128xf32, #tpu.memory_space<vmem>>, vector<8x16x128xf32>
    %69 = vector.shape_cast %68 : vector<8x16x128xf32> to vector<128x128xf32>
    %c0_53 = arith.constant 0 : index
    %c0_54 = arith.constant 0 : index
    %70 = vector.load %arg9[%c0_53, %c0_54] : memref<128x1152xf32, #tpu.memory_space<vmem>>, vector<128x128xf32>
    tpu.vector_store %arg9[%c0_53, %c0_54], %69 {strides = array<i32>} : memref<128x1152xf32, #tpu.memory_space<vmem>>, vector<128x128xf32>,
    %c0_55 = arith.constant 0 : index
    %c1_56 = arith.constant 1 : index
    %c0_57 = arith.constant 0 : index
    %71 = vector.load %arg8[%c0_55, %c1_56, %c0_57] : memref<10x18x128xf32, #tpu.memory_space<vmem>>, vector<8x16x128xf32>
    %72 = vector.shape_cast %71 : vector<8x16x128xf32> to vector<128x128xf32>
    %c0_58 = arith.constant 0 : index
    %c128 = arith.constant 128 : index
    %73 = vector.load %arg9[%c0_58, %c128] : memref<128x1152xf32, #tpu.memory_space<vmem>>, vector<128x128xf32>
    tpu.vector_store %arg9[%c0_58, %c128], %72 {strides = array<i32>} : memref<128x1152xf32, #tpu.memory_space<vmem>>, vector<128x128xf32>,
    %c0_59 = arith.constant 0 : index
    %c2_60 = arith.constant 2 : index
    %c0_61 = arith.constant 0 : index
    %74 = vector.load %arg8[%c0_59, %c2_60, %c0_61] : memref<10x18x128xf32, #tpu.memory_space<vmem>>, vector<8x16x128xf32>
    %75 = vector.shape_cast %74 : vector<8x16x128xf32> to vector<128x128xf32>
    %c0_62 = arith.constant 0 : index
    %c256 = arith.constant 256 : index
    %76 = vector.load %arg9[%c0_62, %c256] : memref<128x1152xf32, #tpu.memory_space<vmem>>, vector<128x128xf32>
    tpu.vector_store %arg9[%c0_62, %c256], %75 {strides = array<i32>} : memref<128x1152xf32, #tpu.memory_space<vmem>>, vector<128x128xf32>,
    %c1_63 = arith.constant 1 : index
    %c0_64 = arith.constant 0 : index
    %c0_65 = arith.constant 0 : index
    %77 = vector.load %arg8[%c1_63, %c0_64, %c0_65] : memref<10x18x128xf32, #tpu.memory_space<vmem>>, vector<8x16x128xf32>
    %78 = vector.shape_cast %77 : vector<8x16x128xf32> to vector<128x128xf32>
    %c0_66 = arith.constant 0 : index
    %c384 = arith.constant 384 : index
    %79 = vector.load %arg9[%c0_66, %c384] : memref<128x1152xf32, #tpu.memory_space<vmem>>, vector<128x128xf32>
    tpu.vector_store %arg9[%c0_66, %c384], %78 {strides = array<i32>} : memref<128x1152xf32, #tpu.memory_space<vmem>>, vector<128x128xf32>,
    %c1_67 = arith.constant 1 : index
    %c1_68 = arith.constant 1 : index
    %c0_69 = arith.constant 0 : index
    %80 = vector.load %arg8[%c1_67, %c1_68, %c0_69] : memref<10x18x128xf32, #tpu.memory_space<vmem>>, vector<8x16x128xf32>
    %81 = vector.shape_cast %80 : vector<8x16x128xf32> to vector<128x128xf32>
    %c0_70 = arith.constant 0 : index
    %c512 = arith.constant 512 : index
    %82 = vector.load %arg9[%c0_70, %c512] : memref<128x1152xf32, #tpu.memory_space<vmem>>, vector<128x128xf32>
    tpu.vector_store %arg9[%c0_70, %c512], %81 {strides = array<i32>} : memref<128x1152xf32, #tpu.memory_space<vmem>>, vector<128x128xf32>,
    %c1_71 = arith.constant 1 : index
    %c2_72 = arith.constant 2 : index
    %c0_73 = arith.constant 0 : index
    %83 = vector.load %arg8[%c1_71, %c2_72, %c0_73] : memref<10x18x128xf32, #tpu.memory_space<vmem>>, vector<8x16x128xf32>
    %84 = vector.shape_cast %83 : vector<8x16x128xf32> to vector<128x128xf32>
    %c0_74 = arith.constant 0 : index
    %c640 = arith.constant 640 : index
    %85 = vector.load %arg9[%c0_74, %c640] : memref<128x1152xf32, #tpu.memory_space<vmem>>, vector<128x128xf32>
    tpu.vector_store %arg9[%c0_74, %c640], %84 {strides = array<i32>} : memref<128x1152xf32, #tpu.memory_space<vmem>>, vector<128x128xf32>,
    %c2_75 = arith.constant 2 : index
    %c0_76 = arith.constant 0 : index
    %c0_77 = arith.constant 0 : index
    %86 = vector.load %arg8[%c2_75, %c0_76, %c0_77] : memref<10x18x128xf32, #tpu.memory_space<vmem>>, vector<8x16x128xf32>
    %87 = vector.shape_cast %86 : vector<8x16x128xf32> to vector<128x128xf32>
    %c0_78 = arith.constant 0 : index
    %c768 = arith.constant 768 : index
    %88 = vector.load %arg9[%c0_78, %c768] : memref<128x1152xf32, #tpu.memory_space<vmem>>, vector<128x128xf32>
    tpu.vector_store %arg9[%c0_78, %c768], %87 {strides = array<i32>} : memref<128x1152xf32, #tpu.memory_space<vmem>>, vector<128x128xf32>,
    %c2_79 = arith.constant 2 : index
    %c1_80 = arith.constant 1 : index
    %c0_81 = arith.constant 0 : index
    %89 = vector.load %arg8[%c2_79, %c1_80, %c0_81] : memref<10x18x128xf32, #tpu.memory_space<vmem>>, vector<8x16x128xf32>
    %90 = vector.shape_cast %89 : vector<8x16x128xf32> to vector<128x128xf32>
    %c0_82 = arith.constant 0 : index
    %c896 = arith.constant 896 : index
    %91 = vector.load %arg9[%c0_82, %c896] : memref<128x1152xf32, #tpu.memory_space<vmem>>, vector<128x128xf32>
    tpu.vector_store %arg9[%c0_82, %c896], %90 {strides = array<i32>} : memref<128x1152xf32, #tpu.memory_space<vmem>>, vector<128x128xf32>,
    %c2_83 = arith.constant 2 : index
    %c2_84 = arith.constant 2 : index
    %c0_85 = arith.constant 0 : index
    %92 = vector.load %arg8[%c2_83, %c2_84, %c0_85] : memref<10x18x128xf32, #tpu.memory_space<vmem>>, vector<8x16x128xf32>
    %93 = vector.shape_cast %92 : vector<8x16x128xf32> to vector<128x128xf32>
    %c0_86 = arith.constant 0 : index
    %c1024 = arith.constant 1024 : index
    %94 = vector.load %arg9[%c0_86, %c1024] : memref<128x1152xf32, #tpu.memory_space<vmem>>, vector<128x128xf32>
    tpu.vector_store %arg9[%c0_86, %c1024], %93 {strides = array<i32>} : memref<128x1152xf32, #tpu.memory_space<vmem>>, vector<128x128xf32>,
    %c0_87 = arith.constant 0 : index
    %c0_88 = arith.constant 0 : index
    %95 = vector.load %arg9[%c0_87, %c0_88] : memref<128x1152xf32, #tpu.memory_space<vmem>>, vector<128x1152xf32>
    %c0_89 = arith.constant 0 : index
    %c0_90 = arith.constant 0 : index
    %96 = vector.load %arg5[%c0_89, %c0_90] : memref<1152x128xf32, #tpu.memory_space<vmem>>, vector<1152x128xf32>
    %cst_91 = arith.constant dense<0.000000e+00> : vector<128x128xf32>
    %97 = tpu.matmul %95, %96, %cst_91 {dimension_numbers = #tpu.dot_dimension_numbers<[1], [0], [0], [1], [0, 0, 1, 1], [], []>} : vector<128x1152xf32>, vector<1152x128xf32>, vector<128x128xf32> -> vector<128x128xf32>
    %c0_92 = arith.constant 0 : index
    %c0_93 = arith.constant 0 : index
    %98 = vector.load %arg6[%c0_92, %c0_93] : memref<1x128xf32, #tpu.memory_space<vmem>>, vector<1x128xf32>
    %99 = vector.broadcast %98 : vector<1x128xf32> to vector<128x128xf32>
    %100 = arith.addf %97, %99 : vector<128x128xf32>
    %cst_94 = arith.constant 0.000000e+00 : f32
    %101 = vector.broadcast %cst_94 : f32 to vector<128x128xf32>
    %102 = arith.maximumf %100, %101 : vector<128x128xf32>
    %c0_95 = arith.constant 0 : index
    %c0_96 = arith.constant 0 : index
    %c0_97 = arith.constant 0 : index
    %103 = vector.load %arg7[%c0_95, %c0_96, %c0_97] : memref<1x128x128xf32, #tpu.memory_space<vmem>>, vector<1x128x128xf32>
    %104 = vector.shape_cast %103 : vector<1x128x128xf32> to vector<128x128xf32>
    %105 = vector.shape_cast %102 : vector<128x128xf32> to vector<1x128x128xf32>
    tpu.vector_store %arg7[%c0_95, %c0_96, %c0_97], %105 {strides = array<i32>} : memref<1x128x128xf32, #tpu.memory_space<vmem>>, vector<1x128x128xf32>,
    return
  }
  func.func @transform_0(%arg0: i32, %arg1: i32) -> (i32, i32, i32, i32) {
    %c0_i32 = arith.constant 0 : i32
    %c0_i32_0 = arith.constant 0 : i32
    %c0_i32_1 = arith.constant 0 : i32
    %c0_i32_2 = arith.constant 0 : i32
    return %arg0, %c0_i32, %c0_i32_0, %c0_i32_1 : i32, i32, i32, i32
  }
  func.func @transform_1(%arg0: i32, %arg1: i32) -> (i32, i32) {
    %c0_i32 = arith.constant 0 : i32
    %c0_i32_0 = arith.constant 0 : i32
    %c0_i32_1 = arith.constant 0 : i32
    return %c0_i32, %c0_i32_0 : i32, i32
  }
  func.func @transform_2(%arg0: i32, %arg1: i32) -> (i32, i32) {
    %c0_i32 = arith.constant 0 : i32
    %c0_i32_0 = arith.constant 0 : i32
    %c0_i32_1 = arith.constant 0 : i32
    return %c0_i32, %c0_i32_0 : i32, i32
  }
  func.func @transform_3(%arg0: i32, %arg1: i32) -> (i32, i32) {
    %c0_i32 = arith.constant 0 : i32
    %c0_i32_0 = arith.constant 0 : i32
    %c0_i32_1 = arith.constant 0 : i32
    return %c0_i32, %c0_i32_0 : i32, i32
  }
  func.func @transform_4(%arg0: i32, %arg1: i32) -> (i32, i32) {
    %c0_i32 = arith.constant 0 : i32
    %c0_i32_0 = arith.constant 0 : i32
    %c0_i32_1 = arith.constant 0 : i32
    return %c0_i32, %c0_i32_0 : i32, i32
  }
  func.func @transform_5(%arg0: i32, %arg1: i32) -> (i32, i32, i32) {
    %c0_i32 = arith.constant 0 : i32
    %c0_i32_0 = arith.constant 0 : i32
    return %arg0, %arg1, %c0_i32 : i32, i32, i32
  }
}

</mosaic_0001>

<bundles_post_ra>
// kernel: tpu_custom_call.1
= control target key start
LH: loop header
LB: loop body
LE: loop exit
PB: predicated region body
PF: predicated region fallthrough
CT: control target
= control target key end

     0   :  { %10 = vsyncpa [#allocation5], 0  ;;  %s5017_s0 = inlined_call_operand.vmem [shape: f32[2,20,18,8], index: 0, kind: input, shape index: {}]   ;;  %s5018_s1 = inlined_call_operand.hbm [shape: f32[128,128], index: 1, kind: input, shape index: {}]   ;;  %s5019_s2 = inlined_call_operand.vmem [shape: f32[1,128], index: 2, kind: input, shape index: {}]   ;;  %s5020_s3 = inlined_call_operand.vmem [shape: f32[1152,128], index: 3, kind: input, shape index: {}]   ;;  %s5021_s4 = inlined_call_operand.vmem [shape: f32[1,128], index: 4, kind: input, shape index: {}]   ;;  %s5022_s5 = inlined_call_operand.hbm [shape: f32[2,256,128], index: 5, kind: output, shape index: {}]  }
   0x1   :  { %11 = vsyncpa [#allocation6], 0 }
   0x2   :  { %13 = vsyncpa [#allocation6 + $0x1], 0  ;;  %s3245_s18 = smov 0   ;;  %s3247_s19 = smov 0  }
   0x3   :  { %s3249_s20 = smov 0   ;;  %s3251_s21 = smov 0  }
   0x4   :  { %s3253_s22 = smov 0   ;;  %s3255_s23 = smov 0  }
   0x5   :  { %s3257_s24 = smov 0   ;;  %s3259_s25 = smov 0  }
   0x6 LB: > { %s2760_s26 = sadd.s32 4294967295, %s3198_s25   ;;  %s2761_s27 = sadd.s32 4294967294, %s3198_s25   ;;  %s3198_s25 = sphi %s3259_s25, %s19_s25   ;;  %s3194_s24 = sphi %s3257_s24, %s5063_s24   ;;  %s3190_s23 = sphi %s3255_s23, %s5062_s23   ;;  %s3186_s22 = sphi %s3253_s22, %s5061_s22   ;;  %s3182_s21 = sphi %s3251_s21, %s5060_s21   ;;  %s3178_s20 = sphi %s3249_s20, %s5059_s20   ;;  %s3174_s19 = sphi %s3247_s19, %s5058_s19   ;;  %s3170_s18 = sphi %s3245_s18, %s5057_s18  }
   0x7   : > { %s28_s28 = sadd.s32 1, %s3190_s23  ;;  %s31_s29 = sadd.s32 1, %s3194_s24 }
   0x8   : > { %p29_p0 = scmp.ge.s32.totalorder %s28_s28, 2  ;;  %s150_s30 = sadd.s32 1, %s3178_s20 }
   0x9   : > { %p160_p1 = scmp.ne.s32.totalorder %s3178_s20, %s3174_s19  ;;  %p161_p2 = scmp.eq.s32.totalorder %s2760_s26, 3 }
   0xa   : > { %s5065_s28 = smov (%p29_p0, %s28_s28), 0  ;;  %s5067_s29 = smov (!%p29_p0, %s31_s29), %s3194_s24 }
   0xb   : > { %s146_s6 = ssub.s32 %s3190_s23, %s5065_s28  ;;  %p3297_p3 = por %p161_p2, %p160_p1 }
   0xc   : > { %p33_p4 = scmp.ge.s32.totalorder %s5067_s29, 2  ;;  %p166_p5 = scmp.ne.s32.totalorder %s3174_s19, %s3170_s18 }
   0xd   : > { %p167_p6 = scmp.eq.s32.totalorder %s2761_s27, 3  ;;  %p2762_p7 = scmp.ge.s32.totalorder %s3198_s25, 1 }
   0xe   : > { %s5069_s29 = smov (%p33_p4, %s5067_s29), 0  ;;  %p174_p9 = scmp.lt.s32.totalorder %s3198_s25, 5 }
   0xf   : > { %p3306_p8 = por %p167_p6, %p166_p5  ;;  %s145_s9 = ssub.s32 %s3194_s24, %s5069_s29 }
  0x10   : > { %s147_s10 = sor.u32 %s146_s6, %s145_s9  ;;  %p3313_p10 = pnand %p2762_p7, %p174_p9 }
  0x11   : > { %p148_p11 = scmp.eq.s32.totalorder %s147_s10, 0  ;;  %p3317_p12 = scmp.eq.s32.totalorder %s2760_s26, 0 }
  0x12   : > { %p2978_p13 = pneg %p3313_p10  ;;  %s185_s15 = sshll.u32 %s5018_s1, 4  ;;  %s186_s15 = int_to_ptr.hbm [resolvable:$true] %s185_s15 }
  0x13   : > { %s3327_s16 = scalar_select %p148_p11, %s3178_s20, %s150_s30  }
  0x14   : > { %s3200_s17 = smov [#allocation4]   ;;  %p2979_p0 = pnand %p3317_p12, %p2978_p13 }
  0x15   : > { %s187_s27 = sshll.u32 %s3200_s17, 4  ;;  %s3201_s6 = smov 128   ;;  %s188_s27 = int_to_ptr.vmem [resolvable:$true] %s187_s27 }
  0x16   : > { %s3202_s26 = smov 8   ;;  %220 = sbr.rel (%p3313_p10) target bundleno = 1221 (0x4c5), region = 40 }
  0x17   : > { %2981 = dma.hbm_to_vmem [thread:$0]  (!%p2979_p0), %s186_s15, 2048, %s188_s27, [#allocation5], %s3201_s6, %s3201_s6, %s3202_s26  }
  0x1b   : > { %3161 = dma.done.wait (%p3317_p12), [#allocation5], 2048  }
  0x1c   : > { %3163 = vsyncadd (%p3317_p12), [#allocation5], 4294965248  ;;  %p249_p1 = scmp.lt.s32.totalorder %s3186_s22, 1  ;;  %v3203_v0 = vmov 0.0   ;;  %s2770_s9 = smul.u32 192, %s3182_s21  ;;  %vm1084_vm0 = vcmask 64512  }
  0x1d   : > { %1410 = vst [vmem:[#allocation2] sm:$0x1] %v3203_v0  ;;  %s5031_s15 = smov 8   ;;  %s3205_s17 = smov 16   ;;  %vm1105_vm1 = vcmask 130048   ;;  %vm1126_vm2 = vcmask 195584  }
  0x1e   : > { %1411 = vst [vmem:[#allocation2 + $0x18] sm:$0x1] %v3203_v0  ;;  %s250_s30 = scalar_select %p249_p1, %s3186_s22, 1  ;;  %vm1147_vm3 = vcmask 261120   ;;  %vm1168_vm4 = vcmask 326656   ;;  %vm1189_vm5 = vcmask 392192  }
  0x1f   : > { %1412 = vst [vmem:[#allocation2 + $0x30] sm:$0x1] %v3203_v0  ;;  %s246_s27 = sand.u32 1, %s3174_s19   ;;  %s3206_s26 = smov 24   ;;  %vm1210_vm6 = vcmask 457728   ;;  %vm1231_vm7 = vcmask 523264  }
  0x20   : > { %1413 = vst [vmem:[#allocation2 + $0x48] sm:$0x1] %v3203_v0  ;;  %s2971_s10 = smul.u32 480, %s250_s30  ;;  %s3536_s6 = sshll.u32 %s246_s27, 7  ;;  %vm1252_vm8 = vcmask 588800  }
  0x21   : > { %1414 = vst [vmem:[#allocation2 + $0x60] sm:$0x1] %v3203_v0  ;;  %s3207_s30 = smov 40   ;;  %s3210_s11 = smov 56  }
  0x22   : > { %1415 = vst [vmem:[#allocation2 + $0x78] sm:$0x1] %v3203_v0  ;;  %s253_s14 = scalar_lea.vmem %s5017_s0, %s2971_s10  ;;  %s3209_s10 = smov 64  }
  0x23   : > { %1416 = vst [vmem:[#allocation2 + $0x90] sm:$0x1] %v3203_v0  ;;  %s3343_s12 = scalar_lea.vmem %s253_s14, %s2770_s9  ;;  %s3208_s9 = smov 32  }
  0x24   : > { %1417 = vst [vmem:[#allocation2 + $0xa8] sm:$0x1] %v3203_v0  ;;  %v3346_v1 = vld [vmem:[%s3343_s12 + $0x31] sm:$0xff]  ;;  %v3349_v2 = vld [vmem:[%s3343_s12 + $0x19] sm:$0xff]  ;;  %v278_v3 = vld [vmem:[%s3343_s12 + $0x1] sm:$0xff]  ;;  %s3211_s13 = smov 48  }
  0x25   : > { %1418 = vst [vmem:[#allocation2 + $0xc0] sm:$0x1] %v3203_v0  ;;  %472 = vrot.lane.b32.xlu2 %v3346_v1, %s5031_s15  ;;  %468 = vrot.lane.b32.xlu1 %v3349_v2, %s5031_s15  ;;  %v3358_v4 = vld [vmem:[%s3343_s12 + $0x39] sm:$0xff]  ;;  %v3361_v5 = vld [vmem:[%s3343_s12 + $0x21] sm:$0xff]  ;;  %p2915_p2 = scmp.ne.s32.totalorder %s3182_s21, 0 }
  0x26   : > { %1419 = vst [vmem:[#allocation2 + $0xd8] sm:$0x1] %v3203_v0  ;;  %464 = vrot.lane.b32.xlu0 %v278_v3, %s5031_s15  ;;  %v279_v6 = vld [vmem:[%s3343_s12 + $0x9] sm:$0xff]  ;;  %v3370_v7 = vld [vmem:[%s3343_s12 + $0x61] sm:$0xff]  ;;  %v3373_v8 = vld [vmem:[%s3343_s12 + $0x51] sm:$0xff] }
  0x27   : > { %1420 = vst [vmem:[#allocation2 + $0x11] sm:$0x1] %v3203_v0  ;;  %v3376_v9 = vld [vmem:[%s3343_s12 + $0x49] sm:$0xff]  ;;  %v3385_v10 = vld [vmem:[%s3343_s12 + $0x81] sm:$0xff]  ;;  %v3388_v11 = vld [vmem:[%s3343_s12 + $0x79] sm:$0xff] }
  0x28   : > { %1421 = vst [vmem:[#allocation2 + $0x29] sm:$0x1] %v3203_v0  ;;  %v3391_v12 = vld [vmem:[%s3343_s12 + $0x69] sm:$0xff]  ;;  %v3403_v14 = vld [vmem:[%s3343_s12 + $0x99] sm:$0xff]  ;;  %v3406_v15 = vld [vmem:[%s3343_s12 + $0x91] sm:$0xff] }
  0x29   : > { %1422 = vst [vmem:[#allocation2 + $0x41] sm:$0x1] %v3203_v0  ;;  %v3400_v13 = vld [vmem:[%s3343_s12 + $0xa9] sm:$0xff]  ;;  %v3418_v17 = vld [vmem:[%s3343_s12 + $0xc1] sm:$0xff]  ;;  %v3421_v18 = vld [vmem:[%s3343_s12 + $0xb1] sm:$0xff] }
  0x2a   : > { %1423 = vst [vmem:[#allocation2 + $0x59] sm:$0x1] %v3203_v0  ;;  %v3415_v16 = vld [vmem:[%s3343_s12 + $0xc9] sm:$0xff]  ;;  %v297_v20 = vld [vmem:[%s3343_s12 + $0xe1] sm:$0xff]  ;;  %v3432_v21 = vld [vmem:[%s3343_s12 + $0xd9] sm:$0xff] }
  0x2b   : > { %1424 = vst [vmem:[#allocation2 + $0x71] sm:$0x1] %v3203_v0  ;;  %v298_v19 = vld [vmem:[%s3343_s12 + $0x2] sm:$0xff]  ;;  %v3442_v23 = vld [vmem:[%s3343_s12 + $0x1a] sm:$0xff]  ;;  %v299_v24 = vld [vmem:[%s3343_s12 + $0xa] sm:$0xff] }
  0x2c   : > { %1425 = vst [vmem:[#allocation2 + $0x89] sm:$0x1] %v3203_v0  ;;  %v3439_v22 = vld [vmem:[%s3343_s12 + $0x22] sm:$0xff]  ;;  %v3451_v25 = vld [vmem:[%s3343_s12 + $0x4a] sm:$0xff]  ;;  %v3454_v26 = vld [vmem:[%s3343_s12 + $0x3a] sm:$0xff] }
  0x2d   : > { %1426 = vst [vmem:[#allocation2 + $0xa1] sm:$0x1] %v3203_v0  ;;  %474 = vrot.lane.b32.xlu2 %v3358_v4, %s5031_s15  ;;  %470 = vrot.lane.b32.xlu1 %v3361_v5, %s5031_s15  ;;  %v3457_v27 = vld [vmem:[%s3343_s12 + $0x32] sm:$0xff]  ;;  %v3466_v28 = vld [vmem:[%s3343_s12 + $0x6a] sm:$0xff] }
  0x2e   : > { %1427 = vst [vmem:[#allocation2 + $0xb9] sm:$0x1] %v3203_v0  ;;  %466 = vrot.lane.b32.xlu0 %v279_v6, %s5031_s15  ;;  %v3469_v29 = vld [vmem:[%s3343_s12 + $0x62] sm:$0xff]  ;;  %v3472_v30 = vld [vmem:[%s3343_s12 + $0x52] sm:$0xff]  ;;  %v3487_v33 = vld [vmem:[%s3343_s12 + $0x7a] sm:$0xff] }
  0x2f   : > { %1428 = vst [vmem:[#allocation2 + $0xd1] sm:$0x1] %v3203_v0  ;;  %v3481_v31 = vld [vmem:[%s3343_s12 + $0x92] sm:$0xff]  ;;  %v3484_v32 = vld [vmem:[%s3343_s12 + $0x82] sm:$0xff]  ;;  %v3499_v35 = vld [vmem:[%s3343_s12 + $0xaa] sm:$0xff] }
  0x30   : > { %1429 = vst [vmem:[#allocation2 + $0xe9] sm:$0x1] %v3203_v0  ;;  %v3496_v34 = vld [vmem:[%s3343_s12 + $0xb2] sm:$0xff]  ;;  %v3502_v36 = vld [vmem:[%s3343_s12 + $0x9a] sm:$0xff]  ;;  %v3516_v39 = vld [vmem:[%s3343_s12 + $0xca] sm:$0xff] }
  0x31   : > { %5036 = vst [vmem:[#allocation10_spill] sm:$0xff] %v3415_v16  ;;  %v3513_v38 = vld [vmem:[%s3343_s12 + $0xda] sm:$0xff]  ;;  %v3519_v40 = vld [vmem:[%s3343_s12 + $0xc2] sm:$0xff]  ;;  %v3553_v48 = vld [vmem:[%s3343_s12 + $0x30] sm:$0xff] }
  0x32   : > { %5037 = vst [vmem:[#allocation11_spill] sm:$0xff] %v3432_v21  ;;  %v2774_v42 = vld [vmem:[%s3343_s12 + $0x20] sm:$0xff]  ;;  %v3532_v43 = vld [vmem:[%s3343_s12 + $0x18] sm:$0xff]  ;;  %v2777_v47 = vld [vmem:[%s3343_s12 + $0x48] sm:$0xff] }
  0x33   : > { %5038 = vst [vmem:[#allocation12_spill] sm:$0xff] %v3513_v38  ;;  %v3539_v44 = vld [vmem:[%s3343_s12 + $0xe2] sm:$0xff]  ;;  %v3549_v46 = vld [vmem:[%s3343_s12 + $0x38] sm:$0xff]  ;;  %v3571_v54 = vld [vmem:[%s3343_s12 + $0x50] sm:$0xff] }
  0x34   : > { %5039 = vst [vmem:[#allocation13_spill] sm:$0xff] %v3516_v39  ;;  %v3565_v52 = vld [vmem:[%s3343_s12 + $0x60] sm:$0xff]  ;;  %v3568_v53 = vld [vmem:[%s3343_s12 + $0x68] sm:$0xff]  ;;  %v3587_v59 = vld [vmem:[%s3343_s12 + $0x90] sm:$0xff] }
  0x35   : > { %480 = vrot.lane.b32.xlu2 %v3370_v7, %s5031_s15  ;;  %478 = vrot.lane.b32.xlu1 %v3373_v8, %s5031_s15  ;;  %5040 = vst [vmem:[#allocation14_spill] sm:$0xff] %v3539_v44  ;;  %v3584_v58 = vld [vmem:[%s3343_s12 + $0x80] sm:$0xff]  ;;  %v3590_v60 = vld [vmem:[%s3343_s12 + $0x78] sm:$0xff] }
  0x36   : > { %476 = vrot.lane.b32.xlu0 %v3376_v9, %s5031_s15  ;;  %v3603_v0 = vld [vmem:[%s3343_s12 + $0x98] sm:$0xff] }
  0x3d   : > { %486 = vrot.lane.b32.xlu2 %v3385_v10, %s5031_s15  ;;  %484 = vrot.lane.b32.xlu1 %v3388_v11, %s5031_s15 }
  0x3e   : > { %482 = vrot.lane.b32.xlu0 %v3391_v12, %s5031_s15 }
  0x45   : > { %492 = vrot.lane.b32.xlu2 %v3400_v13, %s5031_s15  ;;  %490 = vrot.lane.b32.xlu1 %v3403_v14, %s5031_s15 }
  0x46   : > { %488 = vrot.lane.b32.xlu0 %v3406_v15, %s5031_s15 }
  0x4d   : > { %498 = vrot.lane.b32.xlu2 %v3415_v16, %s5031_s15  ;;  %496 = vrot.lane.b32.xlu1 %v3418_v17, %s5031_s15  ;;  %v3692_v16 = vld [vmem:[%s3343_s12 + $0xd8] sm:$0xff] }
  0x4e   : > { %494 = vrot.lane.b32.xlu0 %v3421_v18, %s5031_s15 }
  0x55   : > { %544 = vrot.lane.b32.xlu2 %v298_v19, %s3205_s17  ;;  %502 = vrot.lane.b32.xlu1 %v297_v20, %s5031_s15 }
  0x56   : > { %500 = vrot.lane.b32.xlu0 %v3432_v21, %s5031_s15 }
  0x5d   : > { %550 = vrot.lane.b32.xlu2 %v3439_v22, %s3205_s17  ;;  %548 = vrot.lane.b32.xlu1 %v3442_v23, %s3205_s17 }
  0x5e   : > { %546 = vrot.lane.b32.xlu0 %v299_v24, %s3205_s17 }
  0x65   : > { %556 = vrot.lane.b32.xlu2 %v3451_v25, %s3205_s17  ;;  %554 = vrot.lane.b32.xlu1 %v3454_v26, %s3205_s17 }
  0x66   : > { %552 = vrot.lane.b32.xlu0 %v3457_v27, %s3205_s17 }
  0x6d   : > { %562 = vrot.lane.b32.xlu2 %v3466_v28, %s3205_s17  ;;  %560 = vrot.lane.b32.xlu1 %v3469_v29, %s3205_s17 }
  0x6e   : > { %558 = vrot.lane.b32.xlu0 %v3472_v30, %s3205_s17 }
  0x75   : > { %568 = vrot.lane.b32.xlu2 %v3481_v31, %s3205_s17  ;;  %566 = vrot.lane.b32.xlu1 %v3484_v32, %s3205_s17 }
  0x76   : > { %564 = vrot.lane.b32.xlu0 %v3487_v33, %s3205_s17 }
  0x7d   : > { %574 = vrot.lane.b32.xlu2 %v3496_v34, %s3205_s17  ;;  %572 = vrot.lane.b32.xlu1 %v3499_v35, %s3205_s17 }
  0x7e   : > { %570 = vrot.lane.b32.xlu0 %v3502_v36, %s3205_s17 }
  0x7f   : > { %v3510_v37 = vpop.permute.xlu2 %472 }
  0x85   : > { %580 = vrot.lane.b32.xlu2 %v3513_v38, %s3205_s17  ;;  %578 = vrot.lane.b32.xlu1 %v3516_v39, %s3205_s17  ;;  %v3668_v39 = vld [vmem:[%s3343_s12 + $0xb0] sm:$0xff] }
  0x86   : > { %576 = vrot.lane.b32.xlu0 %v3519_v40, %s3205_s17 }
  0x87   : > { %v3527_v41 = vpop.permute.xlu2 %474 }
  0x8d   : > { %626 = vrot.lane.b32.xlu2 %v2774_v42, %s3206_s26  ;;  %624 = vrot.lane.b32.xlu1 %v3532_v43, %s3206_s26 }
  0x8e   : > { %582 = vrot.lane.b32.xlu0 %v3539_v44, %s3205_s17 }
  0x8f   : > { %v3546_v45 = vpop.permute.xlu2 %480 }
  0x95   : > { %632 = vrot.lane.b32.xlu2 %v2777_v47, %s3206_s26  ;;  %630 = vrot.lane.b32.xlu1 %v3549_v46, %s3206_s26 }
  0x96   : > { %628 = vrot.lane.b32.xlu0 %v3553_v48, %s3206_s26 }
  0x97   : > { %v3560_v49 = vpop.permute.xlu2 %486  ;;  %v469_v50 = vpop.permute.xlu1 %468 }
  0x98   : > { %v3562_v51 = vpop.permute.xlu0 %464 }
  0x9d   : > { %638 = vrot.lane.b32.xlu2 %v3568_v53, %s3206_s26  ;;  %636 = vrot.lane.b32.xlu1 %v3565_v52, %s3206_s26 }
  0x9e   : > { %634 = vrot.lane.b32.xlu0 %v3571_v54, %s3206_s26 }
  0x9f   : > { %v3579_v55 = vpop.permute.xlu2 %492  ;;  %v471_v56 = vpop.permute.xlu1 %470 }
  0xa0   : > { %v3581_v57 = vpop.permute.xlu0 %466 }
  0xa5   : > { %644 = vrot.lane.b32.xlu2 %v3587_v59, %s3206_s26  ;;  %642 = vrot.lane.b32.xlu1 %v3584_v58, %s3206_s26 }
  0xa6   : > { %640 = vrot.lane.b32.xlu0 %v3590_v60, %s3206_s26 }
  0xa7   : > { %v3598_v61 = vpop.permute.xlu2 %498  ;;  %v3600_v62 = vpop.permute.xlu1 %478 }
  0xa8   : > { %v477_v63 = vpop.permute.xlu0 %476 }
  0xad   : > { %784 = vrot.lane.b32.xlu2 %v3442_v23, %s3207_s30  ;;  %704 = vrot.lane.b32.xlu1 %v3349_v2, %s3208_s9  ;;  %v1088_v2 = vsel %vm1084_vm0, %v2774_v42, %v471_v56  ;;  %v1091_v42 = vsel %vm1084_vm0, %v2777_v47, %v477_v63 }
  0xae   : > { %646 = vrot.lane.b32.xlu0 %v3603_v0, %s3206_s26 }
  0xaf   : > { %v3611_v3 = vpop.permute.xlu2 %544  ;;  %v3613_v6 = vpop.permute.xlu1 %484 }
  0xb0   : > { %v3615_v19 = vpop.permute.xlu0 %482 }
  0xb5   : > { %1024 = vrot.lane.b32.xlu2 %v3457_v27, %s3209_s10  ;;  %944 = vrot.lane.b32.xlu1 %v3346_v1, %s3210_s11 }
  0xb6   : > { %864 = vrot.lane.b32.xlu0 %v3553_v48, %s3211_s13 }
  0xb7   : > { %v551_v20 = vpop.permute.xlu2 %550  ;;  %v3624_v23 = vpop.permute.xlu1 %490 }
  0xb8   : > { %v3627_v24 = vsel %vm1105_vm1, %v1088_v2, %v551_v20  ;;  %v3629_v44 = vpop.permute.xlu0 %488 }
  0xb9   : > { %5041 = vst [vmem:[#allocation15_spill] sm:$0xff] %v3629_v44 }
  0xbd   : > { %866 = vrot.lane.b32.xlu2 %v3549_v46, %s3211_s13  ;;  %786 = vrot.lane.b32.xlu1 %v3439_v22, %s3207_s30 }
  0xbe   : > { %706 = vrot.lane.b32.xlu0 %v3361_v5, %s3208_s9 }
  0xbf   : > { %v557_v56 = vpop.permute.xlu2 %556  ;;  %v3638_v38 = vpop.permute.xlu1 %496 }
  0xc0   : > { %v3641_v21 = vsel %vm1105_vm1, %v1091_v42, %v557_v56  ;;  %v495_v2 = vpop.permute.xlu0 %494 }
  0xc5   : > { %708 = vrot.lane.b32.xlu2 %v3346_v1, %s3208_s9  ;;  %1026 = vrot.lane.b32.xlu1 %v3454_v26, %s3209_s10  ;;  %v1087_v1 = vsel %vm1084_vm0, %v3532_v43, %v469_v50  ;;  %v1100_v43 = vsel %vm1084_vm0, %v3668_v39, %v495_v2 }
  0xc6   : > { %946 = vrot.lane.b32.xlu0 %v3358_v4, %s3210_s11 }
  0xc7   : > { %v3649_v5 = vpop.permute.xlu2 %562  ;;  %v3651_v22 = vpop.permute.xlu1 %502 }
  0xc8   : > { %v501_v63 = vpop.permute.xlu0 %500 }
  0xcd   : > { %948 = vrot.lane.b32.xlu2 %v3376_v9, %s3210_s11  ;;  %868 = vrot.lane.b32.xlu1 %v2777_v47, %s3211_s13 }
  0xce   : > { %788 = vrot.lane.b32.xlu0 %v3457_v27, %s3207_s30  ;;  %v1090_v27 = vsel %vm1084_vm0, %v3549_v46, %v3527_v41 }
  0xcf   : > { %v3660_v20 = vpop.permute.xlu2 %568  ;;  %v549_v42 = vpop.permute.xlu1 %548 }
  0xd0   : > { %5042 = vst [vmem:[#allocation16_spill] sm:$0xff] %v3660_v20  ;;  %v3663_v56 = vsel %vm1105_vm1, %v1087_v1, %v549_v42  ;;  %v3665_v44 = vpop.permute.xlu0 %546  ;;  %v1089_v1 = vsel %vm1084_vm0, %v3553_v48, %v3510_v37  ;;  %v1103_v37 = vsel %vm1084_vm0, %v3692_v16, %v501_v63  ;;  %v1092_v48 = vsel %vm1084_vm0, %v3571_v54, %v3600_v62  ;;  %v1288_v62 = vld [vmem:[#allocation4 + $0x78] sm:$0xff] }
  0xd1   : > { %1293 = vmatpush.msra.mxu0 %v1288_v62 }
  0xd5   : > { %790 = vrot.lane.b32.xlu2 %v3454_v26, %s3207_s30  ;;  %710 = vrot.lane.b32.xlu1 %v3358_v4, %s3208_s9 }
  0xd6   : > { %1028 = vrot.lane.b32.xlu0 %v3451_v25, %s3209_s10 }
  0xd7   : > { %v575_v47 = vpop.permute.xlu2 %574  ;;  %v555_v50 = vpop.permute.xlu1 %554 }
  0xd8   : > { %v3685_v26 = vsel %vm1105_vm1, %v1100_v43, %v575_v47  ;;  %v3688_v4 = vsel %vm1105_vm1, %v1090_v27, %v555_v50  ;;  %v553_v42 = vpop.permute.xlu0 %552  ;;  %v3722_v50 = vld [vmem:[%s3343_s12 + $0xa8] sm:$0xff] }
  0xd9   : > { %5043 = vst [vmem:[#allocation17_spill] sm:$0xff] %v3685_v26  ;;  %v1110_v20 = vsel %vm1105_vm1, %v1089_v1, %v553_v42  ;;  %v3749_v26 = vld [vmem:[%s3343_s12 + $0xc0] sm:$0xff] }
  0xdd   : > { %1030 = vrot.lane.b32.xlu2 %v3472_v30, %s3209_s10  ;;  %950 = vrot.lane.b32.xlu1 %v3373_v8, %s3210_s11 }
  0xde   : > { %870 = vrot.lane.b32.xlu0 %v3571_v54, %s3211_s13 }
  0xdf   : > { %v581_v41 = vpop.permute.xlu2 %580  ;;  %v3702_v46 = vpop.permute.xlu1 %560 }
  0xe0   : > { %v3708_v2 = vsel %vm1105_vm1, %v1103_v37, %v581_v41  ;;  %v559_v27 = vpop.permute.xlu0 %558 }
  0xe1   : > { %5044 = vst [vmem:[#allocation18_spill] sm:$0xff] %v3708_v2  ;;  %v1113_v43 = vsel %vm1105_vm1, %v1092_v48, %v559_v27  ;;  %v1286_v27 = vld [vmem:[#allocation4 + $0x68] sm:$0xff]  ;;  %v1284_v2 = vld [vmem:[#allocation4 + $0x58] sm:$0xff] }
  0xe5   : > { %872 = vrot.lane.b32.xlu2 %v3565_v52, %s3211_s13  ;;  %792 = vrot.lane.b32.xlu1 %v3451_v25, %s3207_s30  ;;  %v1287_v25 = vld [vmem:[#allocation4 + $0x70] sm:$0xff] }
  0xe6   : > { %712 = vrot.lane.b32.xlu0 %v3376_v9, %s3208_s9  ;;  %v1099_v9 = vsel %vm1084_vm0, %v3722_v50, %v3579_v55  ;;  %1294 = vmatpush.msra.mxu0 %v1287_v25  ;;  %v1285_v55 = vld [vmem:[#allocation4 + $0x60] sm:$0xff]  ;;  %v3746_v25 = vld [vmem:[%s3343_s12 + $0xc8] sm:$0xff] }
  0xe7   : > { %v3717_v63 = vpop.permute.xlu2 %626  ;;  %v3719_v47 = vpop.permute.xlu1 %566 }
  0xe8   : > { %v565_v54 = vpop.permute.xlu0 %564  ;;  %1295 = vmatpush.msra.mxu0 %v1286_v27 }
  0xea   : > { %1296 = vmatpush.msra.mxu0 %v1285_v55  ;;  %v1281_v55 = vld [vmem:[#allocation4 + $0x40] sm:$0xff] }
  0xec   : > { %1297 = vmatpush.msra.mxu0 %v1284_v2  ;;  %v1282_v2 = vld [vmem:[#allocation4 + $0x48] sm:$0xff] }
  0xed   : > { %714 = vrot.lane.b32.xlu2 %v3373_v8, %s3208_s9  ;;  %1032 = vrot.lane.b32.xlu1 %v3469_v29, %s3209_s10  ;;  %v1098_v8 = vsel %vm1084_vm0, %v3603_v0, %v3624_v23  ;;  %v1283_v23 = vld [vmem:[#allocation4 + $0x50] sm:$0xff] }
  0xee   : > { %952 = vrot.lane.b32.xlu0 %v3370_v7, %s3210_s11  ;;  %1298 = vmatpush.msra.mxu0 %v1283_v23 }
  0xef   : > { %v633_v1 = vpop.permute.xlu2 %632  ;;  %v573_v42 = vpop.permute.xlu1 %572 }
  0xf0   : > { %v3737_v37 = vsel %vm1126_vm2, %v1110_v20, %v633_v1  ;;  %v3740_v41 = vsel %vm1105_vm1, %v1099_v9, %v573_v42  ;;  %v571_v48 = vpop.permute.xlu0 %570  ;;  %v1102_v20 = vsel %vm1084_vm0, %v3746_v25, %v3598_v61  ;;  %v1101_v42 = vsel %vm1084_vm0, %v3749_v26, %v3638_v38  ;;  %1299 = vmatpush.msra.mxu0 %v1282_v2  ;;  %v1280_v61 = vld [vmem:[#allocation4 + $0x38] sm:$0xff] }
  0xf1   : > { %5045 = vst [vmem:[#allocation19_spill] sm:$0xff] %v3740_v41  ;;  %v3743_v62 = vsel %vm1105_vm1, %v1098_v8, %v571_v48  ;;  %v3773_v41 = vld [vmem:[%s3343_s12 + $0xe0] sm:$0xff]  ;;  %v1095_v38 = vsel %vm1084_vm0, %v3590_v60, %v3613_v6  ;;  %v1276_v2 = vld [vmem:[#allocation4 + $0x18] sm:$0xff] }
  0xf2   : > { %1300 = vmatpush.msra.mxu0 %v1281_v55  ;;  %v1116_v23 = vsel %vm1105_vm1, %v1095_v38, %v565_v54 }
  0xf4   : > { %1301 = vmatpush.msra.mxu0 %v1280_v61 }
  0xf5   : > { %954 = vrot.lane.b32.xlu2 %v3391_v12, %s3210_s11  ;;  %874 = vrot.lane.b32.xlu1 %v3568_v53, %s3211_s13 }
  0xf6   : > { %794 = vrot.lane.b32.xlu0 %v3472_v30, %s3207_s30 }
  0xf7   : > { %v639_v9 = vpop.permute.xlu2 %638  ;;  %v579_v1 = vpop.permute.xlu1 %578 }
  0xf8   : > { %v3764_v8 = vsel %vm1126_vm2, %v1113_v43, %v639_v9  ;;  %v3767_v48 = vsel %vm1105_vm1, %v1102_v20, %v579_v1  ;;  %v577_v30 = vpop.permute.xlu0 %576  ;;  %v1279_v43 = vld [vmem:[#allocation4 + $0x30] sm:$0xff] }
  0xf9   : > { %v3770_v27 = vsel %vm1105_vm1, %v1101_v42, %v577_v30  ;;  %1302 = vmatpush.msra.mxu0 %v1279_v43  ;;  %v1278_v42 = vld [vmem:[#allocation4 + $0x28] sm:$0xff]  ;;  %v1277_v30 = vld [vmem:[#allocation4 + $0x20] sm:$0xff] }
  0xfa   : > { %v1274_v43 = vld [vmem:[#allocation4 + $0x8] sm:$0xff] }
  0xfb   : > { %1303 = vmatpush.msra.mxu0 %v1278_v42 }
  0xfd   : > { %796 = vrot.lane.b32.xlu2 %v3469_v29, %s3207_s30  ;;  %716 = vrot.lane.b32.xlu1 %v3370_v7, %s3208_s9  ;;  %v1104_v29 = vsel %vm1084_vm0, %v3773_v41, %v3651_v22  ;;  %v1275_v22 = vld [vmem:[#allocation4 + $0x10] sm:$0xff] }
  0xfe   : > { %1034 = vrot.lane.b32.xlu0 %v3466_v28, %s3209_s10  ;;  %1304 = vmatpush.msra.mxu0 %v1277_v30 }
  0xff   : > { %v645_v20 = vpop.permute.xlu2 %644  ;;  %v625_v9 = vpop.permute.xlu1 %624 }
 0x100   : > { %v3789_v1 = vsel %vm1126_vm2, %v1116_v23, %v645_v20  ;;  %v583_v7 = vpop.permute.xlu0 %582  ;;  %1305 = vmatpush.msra.mxu0 %v1276_v2  ;;  %v1273_v23 = vld [vmem:[#allocation4] sm:$0xff] }
 0x101   : > { %v3792_v6 = vsel %vm1105_vm1, %v1104_v29, %v583_v7 }
 0x102   : > { %1306 = vmatpush.msra.mxu0 %v1275_v22 }
 0x104   : > { %1307 = vmatpush.msra.mxu0 %v1274_v43 }
 0x105   : > { %1036 = vrot.lane.b32.xlu2 %v3487_v33, %s3209_s10  ;;  %956 = vrot.lane.b32.xlu1 %v3388_v11, %s3210_s11 }
 0x106   : > { %876 = vrot.lane.b32.xlu0 %v3590_v60, %s3211_s13  ;;  %1308 = vmatpush.msra.mxu0 %v1273_v23 }
 0x107   : > { %v785_v54 = vpop.permute.xlu2 %784  ;;  %v631_v55 = vpop.permute.xlu1 %630 }
 0x108   : > { %v3802_v61 = vsel %vm1126_vm2, %v3627_v24, %v631_v55  ;;  %v3804_v38 = vpop.permute.xlu0 %628 }
 0x10d   : > { %878 = vrot.lane.b32.xlu2 %v3584_v58, %s3211_s13  ;;  %798 = vrot.lane.b32.xlu1 %v3466_v28, %s3207_s30 }
 0x10e   : > { %718 = vrot.lane.b32.xlu0 %v3391_v12, %s3208_s9  ;;  %v1094_v12 = vsel %vm1084_vm0, %v3568_v53, %v3615_v19 }
 0x10f   : > { %v1025_v60 = vpop.permute.xlu2 %1024  ;;  %v637_v20 = vpop.permute.xlu1 %636  ;;  %v1115_v28 = vsel %vm1105_vm1, %v1094_v12, %v3649_v5 }
 0x110   : > { %v3814_v24 = vsel %vm1126_vm2, %v3641_v21, %v637_v20  ;;  %v635_v29 = vpop.permute.xlu0 %634  ;;  %v1093_v21 = vsel %vm1084_vm0, %v3565_v52, %v3546_v45  ;;  %v1096_v45 = vsel %vm1084_vm0, %v3584_v58, %v3560_v49  ;;  %v258_v52 = vld [vmem:[%s3343_s12] sm:$0xff] }
 0x111   : > { %v3818_v7 = vsel %vm1126_vm2, %v3688_v4, %v635_v29  ;;  %v1114_v42 = vsel %vm1105_vm1, %v1093_v21, %v3702_v46  ;;  %v1117_v46 = vsel %vm1105_vm1, %v1096_v45, %v3719_v47  ;;  %v1085_v43 = vsel %vm1084_vm0, %v258_v52, %v3562_v51 }
 0x115   : > { %720 = vrot.lane.b32.xlu2 %v3388_v11, %s3208_s9  ;;  %1038 = vrot.lane.b32.xlu1 %v3484_v32, %s3209_s10 }
 0x116   : > { %958 = vrot.lane.b32.xlu0 %v3385_v10, %s3210_s11 }
 0x117   : > { %v867_v4 = vpop.permute.xlu2 %866  ;;  %v643_v11 = vpop.permute.xlu1 %642 }
 0x118   : > { %v3837_v30 = vsel %vm1126_vm2, %v1115_v28, %v643_v11  ;;  %v641_v2 = vpop.permute.xlu0 %640 }
 0x119   : > { %v3840_v53 = vsel %vm1126_vm2, %v1114_v42, %v641_v2 }
 0x11d   : > { %960 = vrot.lane.b32.xlu2 %v3406_v15, %s3210_s11  ;;  %880 = vrot.lane.b32.xlu1 %v3587_v59, %s3211_s13 }
 0x11e   : > { %800 = vrot.lane.b32.xlu0 %v3487_v33, %s3207_s30  ;;  %v1106_v33 = vsel %vm1105_vm1, %v1085_v43, %v3611_v3 }
 0x11f   : > { %v709_v19 = vpop.permute.xlu2 %708  ;;  %v705_v5 = vpop.permute.xlu1 %704  ;;  %v1127_v23 = vsel %vm1126_vm2, %v1106_v33, %v625_v9 }
 0x120   : > { %v647_v22 = vpop.permute.xlu0 %646  ;;  %v1148_v49 = vsel %vm1147_vm3, %v1127_v23, %v705_v5 }
 0x121   : > { %v3855_v55 = vsel %vm1126_vm2, %v1117_v46, %v647_v22  ;;  %v1169_v47 = vsel %vm1168_vm4, %v1148_v49, %v785_v54 }
 0x125   : > { %802 = vrot.lane.b32.xlu2 %v3484_v32, %s3207_s30  ;;  %722 = vrot.lane.b32.xlu1 %v3385_v10, %s3208_s9  ;;  %v259_v10 = vld [vmem:[%s3343_s12 + $0x8] sm:$0xff] }
 0x126   : > { %1040 = vrot.lane.b32.xlu0 %v3481_v31, %s3209_s10  ;;  %v1086_v54 = vsel %vm1084_vm0, %v259_v10, %v3581_v57 }
 0x127   : > { %v949_v51 = vpop.permute.xlu2 %948  ;;  %v945_v58 = vpop.permute.xlu1 %944 }
 0x128   : > { %v865_v3 = vpop.permute.xlu0 %864 }
 0x129   : > { %v1190_v9 = vsel %vm1189_vm5, %v1169_v47, %v865_v3 }
 0x12a   : > { %v1211_v32 = vsel %vm1210_vm6, %v1190_v9, %v945_v58 }
 0x12b   : > { %v1232_v20 = vsel %vm1231_vm7, %v1211_v32, %v1025_v60  ;;  %v1107_v60 = vsel %vm1105_vm1, %v1086_v54, %v3665_v44 }
 0x12c   : > { %2895 = vmatmul.msk.f32.vlgmr.msra.gmra.mxu0 %vm1252_vm8, %v1232_v20  ;;  %v1128_v28 = vsel %vm1126_vm2, %v1107_v60, %v3717_v63 }
 0x12d   : > { %1042 = vrot.lane.b32.xlu2 %v3502_v36, %s3209_s10  ;;  %962 = vrot.lane.b32.xlu1 %v3403_v14, %s3210_s11 }
 0x12e   : > { %882 = vrot.lane.b32.xlu0 %v3603_v0, %s3211_s13 }
 0x12f   : > { %v791_v29 = vpop.permute.xlu2 %790  ;;  %v787_v12 = vpop.permute.xlu1 %786 }
 0x130   : > { %v707_v21 = vpop.permute.xlu0 %706 }
 0x131   : > { %v1149_v11 = vsel %vm1147_vm3, %v1128_v28, %v707_v21 }
 0x132   : > { %v1170_v42 = vsel %vm1168_vm4, %v1149_v11, %v787_v12 }
 0x133   : > { %v1191_v2 = vsel %vm1189_vm5, %v1170_v42, %v867_v4  ;;  %v1129_v4 = vsel %vm1126_vm2, %v3663_v56, %v3804_v38  ;;  %v5047_v42 = vld [vmem:[#allocation13_spill] sm:$0xff] }
 0x134   : > { %v1150_v5 = vsel %vm1147_vm3, %v1129_v4, %v709_v19 }
 0x135   : > { %884 = vrot.lane.b32.xlu2 %v3722_v50, %s3211_s13  ;;  %804 = vrot.lane.b32.xlu1 %v3481_v31, %s3207_s30 }
 0x136   : > { %724 = vrot.lane.b32.xlu0 %v3406_v15, %s3208_s9 }
 0x137   : > { %v1031_v57 = vpop.permute.xlu2 %1030  ;;  %v1027_v0 = vpop.permute.xlu1 %1026 }
 0x138   : > { %v947_v44 = vpop.permute.xlu0 %946 }
 0x139   : > { %v1212_v63 = vsel %vm1210_vm6, %v1191_v2, %v947_v44 }
 0x13a   : > { %v1233_v45 = vsel %vm1231_vm7, %v1212_v63, %v1027_v0 }
 0x13b   : > { %2896 = vmatmul.msk.f32.gmra.mxu0 %vm1252_vm8, %v1233_v45 }
 0x13d   : > { %726 = vrot.lane.b32.xlu2 %v3403_v14, %s3208_s9  ;;  %1044 = vrot.lane.b32.xlu1 %v3499_v35, %s3209_s10 }
 0x13e   : > { %964 = vrot.lane.b32.xlu0 %v3400_v13, %s3210_s11 }
 0x13f   : > { %v873_v15 = vpop.permute.xlu2 %872  ;;  %v869_v31 = vpop.permute.xlu1 %868 }
 0x140   : > { %v789_v52 = vpop.permute.xlu0 %788 }
 0x141   : > { %v1171_v46 = vsel %vm1168_vm4, %v1150_v5, %v789_v52 }
 0x142   : > { %v1192_v22 = vsel %vm1189_vm5, %v1171_v46, %v869_v31 }
 0x143   : > { %v1213_v56 = vsel %vm1210_vm6, %v1192_v22, %v949_v51 }
 0x145   : > { %886 = vrot.lane.b32.xlu1 %v3668_v39, %s3211_s13  ;;  %966 = vrot.lane.b32.xlu2 %v3421_v18, %s3210_s11 }
 0x146   : > { %806 = vrot.lane.b32.xlu0 %v3502_v36, %s3207_s30 }
 0x147   : > { %v715_v14 = vpop.permute.xlu2 %714  ;;  %v711_v43 = vpop.permute.xlu1 %710 }
 0x148   : > { %v1029_v33 = vpop.permute.xlu0 %1028  ;;  %v1151_v19 = vsel %vm1147_vm3, %v3802_v61, %v711_v43  ;;  %v1153_v21 = vsel %vm1147_vm3, %v3818_v7, %v715_v14  ;;  %v2870_v43 = vld [vmem:[%s3343_s12 + $0xe1] sm:$0xff] }
 0x149   : > { %v1234_v38 = vsel %vm1231_vm7, %v1213_v56, %v1029_v33  ;;  %v1172_v51 = vsel %vm1168_vm4, %v1151_v19, %v791_v29 }
 0x14a   : > { %2897 = vmatmul.msk.f32.gmra.mxu0 %vm1252_vm8, %v1234_v38 }
 0x14d   : > { %648 = vrot.lane.b32.xlu1 %v3722_v50, %s3206_s26  ;;  %728 = vrot.lane.b32.xlu2 %v3400_v13, %s3208_s9 }
 0x14e   : > { %1046 = vrot.lane.b32.xlu0 %v3496_v34, %s3209_s10 }
 0x14f   : > { %v955_v36 = vpop.permute.xlu2 %954  ;;  %v951_v23 = vpop.permute.xlu1 %950 }
 0x150   : > { %v871_v49 = vpop.permute.xlu0 %870 }
 0x151   : > { %v1193_v58 = vsel %vm1189_vm5, %v1172_v51, %v871_v49  ;;  %v5050_v49 = vld [vmem:[#allocation14_spill] sm:$0xff] }
 0x152   : > { %v1214_v3 = vsel %vm1210_vm6, %v1193_v58, %v951_v23  ;;  %v2809_v23 = vld [vmem:[%s3343_s12 + $0xd9] sm:$0xff] }
 0x153   : > { %v1235_v61 = vsel %vm1231_vm7, %v1214_v3, %v1031_v57 }
 0x154   : > { %2898 = vmatmul.msk.f32.gmra.mxu0 %vm1252_vm8, %v1235_v61 }
 0x155   : > { %888 = vrot.lane.b32.xlu1 %v3749_v26, %s3211_s13  ;;  %968 = vrot.lane.b32.xlu2 %v3418_v17, %s3210_s11 }
 0x156   : > { %808 = vrot.lane.b32.xlu0 %v3499_v35, %s3207_s30 }
 0x157   : > { %v797_v13 = vpop.permute.xlu2 %796  ;;  %v793_v50 = vpop.permute.xlu1 %792 }
 0x158   : > { %v713_v47 = vpop.permute.xlu0 %712 }
 0x159   : > { %v1152_v9 = vsel %vm1147_vm3, %v3737_v37, %v713_v47  ;;  %v2871_v47 = vld [vmem:[%s3343_s12 + $0xf1] sm:$0xff] }
 0x15a   : > { %v1173_v32 = vsel %vm1168_vm4, %v1152_v9, %v793_v50  ;;  %v2851_v50 = vld [vmem:[%s3343_s12 + $0xf0] sm:$0xff] }
 0x15b   : > { %v1194_v54 = vsel %vm1189_vm5, %v1173_v32, %v873_v15 }
 0x15d   : > { %650 = vrot.lane.b32.xlu1 %v3668_v39, %s3206_s26  ;;  %730 = vrot.lane.b32.xlu2 %v3421_v18, %s3208_s9  ;;  %v5046_v39 = vld [vmem:[#allocation10_spill] sm:$0xff] }
 0x15e   : > { %1048 = vrot.lane.b32.xlu0 %v3519_v40, %s3209_s10 }
 0x15f   : > { %v1037_v20 = vpop.permute.xlu2 %1036  ;;  %v1033_v10 = vpop.permute.xlu1 %1032 }
 0x160   : > { %v953_v35 = vpop.permute.xlu0 %952 }
 0x161   : > { %v1215_v29 = vsel %vm1210_vm6, %v1194_v54, %v953_v35  ;;  %v2891_v35 = vld [vmem:[%s3343_s12 + $0xf2] sm:$0xff] }
 0x162   : > { %v1236_v37 = vsel %vm1231_vm7, %v1215_v29, %v1033_v10 }
 0x163   : > { %2899 = vmatmul.msk.f32.gmra.mxu0 %vm1252_vm8, %v1236_v37 }
 0x165   : > { %890 = vrot.lane.b32.xlu1 %v3746_v25, %s3211_s13  ;;  %970 = vrot.lane.b32.xlu2 %v5046_v39, %s3210_s11 }
 0x166   : > { %810 = vrot.lane.b32.xlu0 %v3496_v34, %s3207_s30 }
 0x167   : > { %v879_v18 = vpop.permute.xlu2 %878  ;;  %v875_v12 = vpop.permute.xlu1 %874 }
 0x168   : > { %v795_v60 = vpop.permute.xlu0 %794 }
 0x169   : > { %v1174_v28 = vsel %vm1168_vm4, %v1153_v21, %v795_v60  ;;  %v2852_v21 = vld [vmem:[%s3343_s12 + $0xf8] sm:$0xff] }
 0x16a   : > { %v1195_v11 = vsel %vm1189_vm5, %v1174_v28, %v875_v12  ;;  %v2872_v28 = vld [vmem:[%s3343_s12 + $0xf9] sm:$0xff] }
 0x16b   : > { %v1216_v44 = vsel %vm1210_vm6, %v1195_v11, %v955_v36 }
 0x16d   : > { %652 = vrot.lane.b32.xlu1 %v3749_v26, %s3206_s26  ;;  %732 = vrot.lane.b32.xlu2 %v3418_v17, %s3208_s9  ;;  %v5048_v17 = vld [vmem:[#allocation11_spill] sm:$0xff] }
 0x16e   : > { %1050 = vrot.lane.b32.xlu0 %v5047_v42, %s3209_s10 }
 0x16f   : > { %v721_v34 = vpop.permute.xlu2 %720  ;;  %v717_v57 = vpop.permute.xlu1 %716 }
 0x170   : > { %v1035_v0 = vpop.permute.xlu0 %1034  ;;  %v1154_v2 = vsel %vm1147_vm3, %v3814_v24, %v717_v57  ;;  %v2808_v24 = vld [vmem:[%s3343_s12 + $0xc9] sm:$0xff]  ;;  %v1156_v61 = vsel %vm1147_vm3, %v3840_v53, %v721_v34 }
 0x171   : > { %v1237_v7 = vsel %vm1231_vm7, %v1216_v44, %v1035_v0  ;;  %v1175_v15 = vsel %vm1168_vm4, %v1154_v2, %v797_v13 }
 0x172   : > { %2900 = vmatmul.msk.f32.gmra.mxu0 %vm1252_vm8, %v1237_v7  ;;  %v2892_v7 = vld [vmem:[%s3343_s12 + $0xfa] sm:$0xff] }
 0x175   : > { %892 = vrot.lane.b32.xlu1 %v3692_v16, %s3211_s13  ;;  %972 = vrot.lane.b32.xlu2 %v5048_v17, %s3210_s11 }
 0x176   : > { %812 = vrot.lane.b32.xlu0 %v3519_v40, %s3207_s30  ;;  %v5049_v40 = vld [vmem:[#allocation12_spill] sm:$0xff] }
 0x177   : > { %v961_v26 = vpop.permute.xlu2 %960  ;;  %v957_v63 = vpop.permute.xlu1 %956 }
 0x178   : > { %v877_v45 = vpop.permute.xlu0 %876 }
 0x179   : > { %v1196_v31 = vsel %vm1189_vm5, %v1175_v15, %v877_v45 }
 0x17a   : > { %v1217_v4 = vsel %vm1210_vm6, %v1196_v31, %v957_v63 }
 0x17b   : > { %v1238_v52 = vsel %vm1231_vm7, %v1217_v4, %v1037_v20  ;;  %v2853_v4 = vld [vmem:[%s3343_s12 + $0x108] sm:$0xff] }
 0x17c   : > { %2901 = vmatmul.msk.f32.gmra.mxu0 %vm1252_vm8, %v1238_v52 }
 0x17d   : > { %654 = vrot.lane.b32.xlu1 %v3746_v25, %s3206_s26  ;;  %734 = vrot.lane.b32.xlu2 %v2808_v24, %s3208_s9  ;;  %v2873_v24 = vld [vmem:[%s3343_s12 + $0x109] sm:$0xff] }
 0x17e   : > { %1052 = vrot.lane.b32.xlu0 %v5049_v40, %s3209_s10 }
 0x17f   : > { %v803_v5 = vpop.permute.xlu2 %802  ;;  %v799_v46 = vpop.permute.xlu1 %798 }
 0x180   : > { %v719_v22 = vpop.permute.xlu0 %718 }
 0x181   : > { %v1155_v14 = vsel %vm1147_vm3, %v3764_v8, %v719_v22 }
 0x182   : > { %v1176_v33 = vsel %vm1168_vm4, %v1155_v14, %v799_v46 }
 0x183   : > { %v1197_v19 = vsel %vm1189_vm5, %v1176_v33, %v879_v18  ;;  %v2893_v33 = vld [vmem:[%s3343_s12 + $0x10a] sm:$0xff] }
 0x185   : > { %894 = vrot.lane.b32.xlu1 %v3773_v41, %s3211_s13  ;;  %974 = vrot.lane.b32.xlu2 %v2870_v43, %s3210_s11 }
 0x186   : > { %814 = vrot.lane.b32.xlu0 %v5047_v42, %s3207_s30 }
 0x187   : > { %v1043_v25 = vpop.permute.xlu2 %1042  ;;  %v1039_v56 = vpop.permute.xlu1 %1038 }
 0x188   : > { %v959_v38 = vpop.permute.xlu0 %958 }
 0x189   : > { %v1218_v8 = vsel %vm1210_vm6, %v1197_v19, %v959_v38 }
 0x18a   : > { %v1239_v36 = vsel %vm1231_vm7, %v1218_v8, %v1039_v56 }
 0x18b   : > { %2902 = vmatmul.msk.f32.gmra.mxu0 %vm1252_vm8, %v1239_v36  ;;  %v2854_v36 = vld [vmem:[%s3343_s12 + $0x110] sm:$0xff] }
 0x18d   : > { %656 = vrot.lane.b32.xlu1 %v3692_v16, %s3206_s26  ;;  %736 = vrot.lane.b32.xlu2 %v2809_v23, %s3208_s9  ;;  %v2874_v23 = vld [vmem:[%s3343_s12 + $0x111] sm:$0xff] }
 0x18e   : > { %1054 = vrot.lane.b32.xlu0 %v5050_v49, %s3209_s10 }
 0x18f   : > { %v885_v51 = vpop.permute.xlu2 %884  ;;  %v881_v58 = vpop.permute.xlu1 %880 }
 0x190   : > { %v801_v3 = vpop.permute.xlu0 %800 }
 0x191   : > { %v1177_v13 = vsel %vm1168_vm4, %v1156_v61, %v801_v3 }
 0x192   : > { %v1198_v9 = vsel %vm1189_vm5, %v1177_v13, %v881_v58  ;;  %v5052_v58 = vld [vmem:[#allocation16_spill] sm:$0xff] }
 0x193   : > { %v1219_v53 = vsel %vm1210_vm6, %v1198_v9, %v961_v26 }
 0x195   : > { %896 = vrot.lane.b32.xlu1 %v2851_v50, %s3211_s13  ;;  %976 = vrot.lane.b32.xlu2 %v2871_v47, %s3210_s11 }
 0x196   : > { %816 = vrot.lane.b32.xlu0 %v5049_v40, %s3207_s30 }
 0x197   : > { %v727_v16 = vpop.permute.xlu2 %726  ;;  %v723_v32 = vpop.permute.xlu1 %722 }
 0x198   : > { %v1041_v20 = vpop.permute.xlu0 %1040  ;;  %v1157_v54 = vsel %vm1147_vm3, %v3837_v30, %v723_v32  ;;  %v1159_v46 = vsel %vm1147_vm3, %v3855_v55, %v727_v16 }
 0x199   : > { %v1240_v10 = vsel %vm1231_vm7, %v1219_v53, %v1041_v20  ;;  %v1178_v18 = vsel %vm1168_vm4, %v1157_v54, %v803_v5  ;;  %v2894_v53 = vld [vmem:[%s3343_s12 + $0x112] sm:$0xff]  ;;  %s4168_s12 = scalar_lea.vmem [#allocation7], %s3536_s6 }
 0x19a   : > { %2903 = vmatmul.msk.f32.gmra.mxu0 %vm1252_vm8, %v1240_v10 }
 0x19d   : > { %658 = vrot.lane.b32.xlu1 %v3773_v41, %s3206_s26  ;;  %738 = vrot.lane.b32.xlu2 %v2870_v43, %s3208_s9  ;;  %v4043_v41 = vld [vmem:[%s5019_s2] ss:$0 sm:$0xff] }
 0x19e   : > { %1056 = vrot.lane.b32.xlu0 %v2891_v35, %s3209_s10 }
 0x19f   : > { %v963_v29 = vpop.permute.xlu1 %962  ;;  %v967_v37 = vpop.permute.xlu2 %966 }
 0x1a0   : > { %v883_v39 = vpop.permute.xlu0 %882 }
 0x1a1   : > { %v1199_v12 = vsel %vm1189_vm5, %v1178_v18, %v883_v39 }
 0x1a2   : > { %v1220_v60 = vsel %vm1210_vm6, %v1199_v12, %v963_v29 }
 0x1a3   : > { %v1241_v30 = vsel %vm1231_vm7, %v1220_v60, %v1043_v25 }
 0x1a4   : > { %2904 = vmatmul.msk.f32.gmra.mxu0 %vm1252_vm8, %v1241_v30 }
 0x1a5   : > { %898 = vrot.lane.b32.xlu1 %v2852_v21, %s3211_s13  ;;  %978 = vrot.lane.b32.xlu2 %v2872_v28, %s3210_s11 }
 0x1a6   : > { %818 = vrot.lane.b32.xlu0 %v5050_v49, %s3207_s30  ;;  %v5051_v49 = vld [vmem:[#allocation15_spill] sm:$0xff] }
 0x1a7   : > { %v805_v11 = vpop.permute.xlu1 %804  ;;  %v729_v42 = vpop.permute.xlu2 %728 }
 0x1a8   : > { %v725_v34 = vpop.permute.xlu0 %724 }
 0x1a9   : > { %v1310_v57 = vpop.f32.mrf.mxu0  ;;  %v1158_v0 = vsel %vm1147_vm3, %v3789_v1, %v725_v34 }
 0x1aa   : > { %v1311_v44 = vadd.f32 %v4043_v41, %v1310_v57  ;;  %v1179_v17 = vsel %vm1168_vm4, %v1158_v0, %v805_v11 }
 0x1ab   : > { %v1200_v45 = vsel %vm1189_vm5, %v1179_v17, %v885_v51  ;;  %v1097_v51 = vsel %vm1084_vm0, %v3587_v59, %v5051_v49 }
 0x1ac   : > { %v1370_v2 = vmax.f32 %v1311_v44, 0.0  ;;  %v1118_v3 = vsel %vm1105_vm1, %v1097_v51, %v5052_v58 }
 0x1ad   : > { %660 = vrot.lane.b32.xlu1 %v2851_v50, %s3206_s26  ;;  %740 = vrot.lane.b32.xlu2 %v2871_v47, %s3208_s9 }
 0x1ae   : > { %1390 = vst [vmem:[#allocation2 + $0x1] sm:$0xff] %v1370_v2  ;;  %1058 = vrot.lane.b32.xlu0 %v2892_v7, %s3209_s10 }
 0x1af   : > { %v1045_v26 = vpop.permute.xlu1 %1044  ;;  %v969_v15 = vpop.permute.xlu2 %968 }
 0x1b0   : > { %v965_v63 = vpop.permute.xlu0 %964 }
 0x1b1   : > { %v1221_v1 = vsel %vm1210_vm6, %v1200_v45, %v965_v63  ;;  %v5053_v45 = vld [vmem:[#allocation19_spill] sm:$0xff] }
 0x1b2   : > { %v1242_v31 = vsel %vm1231_vm7, %v1221_v1, %v1045_v26 }
 0x1b3   : > { %2905 = vmatmul.msk.f32.gmra.mxu0 %vm1252_vm8, %v1242_v31 }
 0x1b5   : > { %900 = vrot.lane.b32.xlu1 %v2853_v4, %s3211_s13  ;;  %980 = vrot.lane.b32.xlu2 %v2873_v24, %s3210_s11 }
 0x1b6   : > { %820 = vrot.lane.b32.xlu0 %v2891_v35, %s3207_s30 }
 0x1b7   : > { %v887_v52 = vpop.permute.xlu1 %886  ;;  %v731_v25 = vpop.permute.xlu2 %730 }
 0x1b8   : > { %v807_v40 = vpop.permute.xlu0 %806  ;;  %v1313_v5 = vpop.f32.mrf.mxu0 }
 0x1b9   : > { %v1314_v22 = vadd.f32 %v4043_v41, %v1313_v5  ;;  %v1180_v14 = vsel %vm1168_vm4, %v1159_v46, %v807_v40 }
 0x1ba   : > { %v1201_v56 = vsel %vm1189_vm5, %v1180_v14, %v887_v52 }
 0x1bb   : > { %v1371_v43 = vmax.f32 %v1314_v22, 0.0  ;;  %v1222_v55 = vsel %vm1210_vm6, %v1201_v56, %v967_v37  ;;  %v5054_v56 = vld [vmem:[#allocation17_spill] sm:$0xff] }
 0x1bd   : > { %1391 = vst [vmem:[#allocation2 + $0x9] sm:$0xff] %v1371_v43  ;;  %662 = vrot.lane.b32.xlu1 %v2852_v21, %s3206_s26  ;;  %742 = vrot.lane.b32.xlu2 %v2872_v28, %s3208_s9 }
 0x1be   : > { %1060 = vrot.lane.b32.xlu0 %v2893_v33, %s3209_s10 }
 0x1bf   : > { %v649_v38 = vpop.permute.xlu1 %648  ;;  %v971_v61 = vpop.permute.xlu2 %970 }
 0x1c0   : > { %v1047_v19 = vpop.permute.xlu0 %1046  ;;  %v1139_v13 = vsel %vm1126_vm2, %v1118_v3, %v649_v38 }
 0x1c1   : > { %v1243_v8 = vsel %vm1231_vm7, %v1222_v55, %v1047_v19  ;;  %v1160_v32 = vsel %vm1147_vm3, %v1139_v13, %v729_v42 }
 0x1c2   : > { %2906 = vmatmul.msk.f32.gmra.mxu0 %vm1252_vm8, %v1243_v8 }
 0x1c5   : > { %902 = vrot.lane.b32.xlu1 %v2854_v36, %s3211_s13  ;;  %982 = vrot.lane.b32.xlu2 %v2874_v23, %s3210_s11 }
 0x1c6   : > { %822 = vrot.lane.b32.xlu0 %v2892_v7, %s3207_s30 }
 0x1c7   : > { %v1316_v50 = vpop.f32.mrf.mxu0  ;;  %v889_v47 = vpop.permute.xlu1 %888 }
 0x1c8   : > { %v1317_v9 = vadd.f32 %v4043_v41, %v1316_v50  ;;  %v809_v16 = vpop.permute.xlu0 %808  ;;  %v733_v54 = vpop.permute.xlu2 %732 }
 0x1c9   : > { %v1181_v20 = vsel %vm1168_vm4, %v1160_v32, %v809_v16 }
 0x1ca   : > { %v1372_v59 = vmax.f32 %v1317_v9, 0.0  ;;  %v1202_v10 = vsel %vm1189_vm5, %v1181_v20, %v889_v47 }
 0x1cb   : > { %v1223_v29 = vsel %vm1210_vm6, %v1202_v10, %v969_v15 }
 0x1cc   : > { %1392 = vst [vmem:[#allocation2 + $0x19] sm:$0xff] %v1372_v59 }
 0x1ce   : > { %1062 = vrot.lane.b32.xlu0 %v2894_v53, %s3209_s10 }
 0x1cf   : > { %v651_v35 = vpop.permute.xlu1 %650 }
 0x1d0   : > { %v1049_v37 = vpop.permute.xlu0 %1048  ;;  %v1140_v21 = vsel %vm1126_vm2, %v3743_v62, %v651_v35  ;;  %v973_v42 = vpop.permute.xlu2 %972 }
 0x1d1   : > { %v1319_v39 = vpop.f32.mrf.mxu0  ;;  %v1244_v18 = vsel %vm1231_vm7, %v1223_v29, %v1049_v37  ;;  %v1161_v11 = vsel %vm1147_vm3, %v1140_v21, %v731_v25 }
 0x1d2   : > { %v1320_v12 = vadd.f32 %v4043_v41, %v1319_v39  ;;  %2907 = vmatmul.msk.f32.gmra.mxu0 %vm1252_vm8, %v1244_v18 }
 0x1d4   : > { %v1373_v60 = vmax.f32 %v1320_v12, 0.0 }
 0x1d6   : > { %1393 = vst [vmem:[#allocation2 + $0x21] sm:$0xff] %v1373_v60 }
 0x1d7   : > { %v891_v28 = vpop.permute.xlu1 %890 }
 0x1d8   : > { %v811_v30 = vpop.permute.xlu0 %810  ;;  %v735_v63 = vpop.permute.xlu2 %734 }
 0x1d9   : > { %v1182_v34 = vsel %vm1168_vm4, %v1161_v11, %v811_v30 }
 0x1da   : > { %v1203_v57 = vsel %vm1189_vm5, %v1182_v34, %v891_v28 }
 0x1db   : > { %v1224_v44 = vsel %vm1210_vm6, %v1203_v57, %v971_v61 }
 0x1df   : > { %v653_v0 = vpop.permute.xlu1 %652 }
 0x1e0   : > { %v1051_v7 = vpop.permute.xlu0 %1050  ;;  %v1322_v2 = vpop.f32.mrf.mxu0  ;;  %v1141_v1 = vsel %vm1126_vm2, %v5053_v45, %v653_v0 }
 0x1e1   : > { %v1323_v17 = vadd.f32 %v4043_v41, %v1322_v2  ;;  %v1245_v26 = vsel %vm1231_vm7, %v1224_v44, %v1051_v7  ;;  %v1162_v4 = vsel %vm1147_vm3, %v1141_v1, %v733_v54  ;;  %v975_v40 = vpop.permute.xlu2 %974  ;;  %v5055_v1 = vld [vmem:[#allocation18_spill] sm:$0xff] }
 0x1e2   : > { %2908 = vmatmul.msk.f32.gmra.mxu0 %vm1252_vm8, %v1245_v26 }
 0x1e3   : > { %v1374_v62 = vmax.f32 %v1323_v17, 0.0 }
 0x1e5   : > { %1394 = vst [vmem:[#allocation2 + $0x31] sm:$0xff] %v1374_v62 }
 0x1e7   : > { %v893_v15 = vpop.permute.xlu1 %892 }
 0x1e8   : > { %v813_v31 = vpop.permute.xlu0 %812 }
 0x1e9   : > { %v1183_v24 = vsel %vm1168_vm4, %v1162_v4, %v813_v31  ;;  %v737_v19 = vpop.permute.xlu2 %736 }
 0x1ea   : > { %v1204_v52 = vsel %vm1189_vm5, %v1183_v24, %v893_v15 }
 0x1eb   : > { %v1225_v22 = vsel %vm1210_vm6, %v1204_v52, %v973_v42 }
 0x1ef   : > { %v1325_v5 = vpop.f32.mrf.mxu0  ;;  %v655_v46 = vpop.permute.xlu1 %654 }
 0x1f0   : > { %v1326_v14 = vadd.f32 %v4043_v41, %v1325_v5  ;;  %v1053_v43 = vpop.permute.xlu0 %1052  ;;  %v1142_v38 = vsel %vm1126_vm2, %v5054_v56, %v655_v46 }
 0x1f1   : > { %v1246_v33 = vsel %vm1231_vm7, %v1225_v22, %v1053_v43  ;;  %v1163_v36 = vsel %vm1147_vm3, %v1142_v38, %v735_v63  ;;  %v977_v9 = vpop.permute.xlu2 %976 }
 0x1f2   : > { %v1375_v25 = vmax.f32 %v1326_v14, 0.0  ;;  %2909 = vmatmul.msk.f32.gmra.mxu0 %vm1252_vm8, %v1246_v33 }
 0x1f4   : > { %1395 = vst [vmem:[#allocation2 + $0x39] sm:$0xff] %v1375_v25 }
 0x1f7   : > { %v895_v55 = vpop.permute.xlu1 %894 }
 0x1f8   : > { %v815_v8 = vpop.permute.xlu0 %814 }
 0x1f9   : > { %v1328_v23 = vpop.f32.mrf.mxu0  ;;  %v1184_v49 = vsel %vm1168_vm4, %v1163_v36, %v815_v8  ;;  %v739_v29 = vpop.permute.xlu2 %738 }
 0x1fa   : > { %v1329_v51 = vadd.f32 %v4043_v41, %v1328_v23  ;;  %v1205_v3 = vsel %vm1189_vm5, %v1184_v49, %v895_v55 }
 0x1fb   : > { %v1226_v13 = vsel %vm1210_vm6, %v1205_v3, %v975_v40 }
 0x1fc   : > { %v1376_v58 = vmax.f32 %v1329_v51, 0.0 }
 0x1fe   : > { %1396 = vst [vmem:[#allocation2 + $0x49] sm:$0xff] %v1376_v58 }
 0x1ff   : > { %v657_v61 = vpop.permute.xlu1 %656 }
 0x200   : > { %v1055_v50 = vpop.permute.xlu0 %1054  ;;  %v1143_v16 = vsel %vm1126_vm2, %v3770_v27, %v657_v61 }
 0x201   : > { %v1247_v47 = vsel %vm1231_vm7, %v1226_v13, %v1055_v50  ;;  %v1164_v53 = vsel %vm1147_vm3, %v1143_v16, %v737_v19  ;;  %v979_v60 = vpop.permute.xlu2 %978 }
 0x202   : > { %2910 = vmatmul.msk.f32.gmra.mxu0 %vm1252_vm8, %v1247_v47 }
 0x207   : > { %v897_v32 = vpop.permute.xlu1 %896 }
 0x208   : > { %v817_v59 = vpop.permute.xlu0 %816  ;;  %v1331_v20 = vpop.f32.mrf.mxu0 }
 0x209   : > { %v1332_v10 = vadd.f32 %v4043_v41, %v1331_v20  ;;  %v1185_v35 = vsel %vm1168_vm4, %v1164_v53, %v817_v59  ;;  %v741_v2 = vpop.permute.xlu2 %740 }
 0x20a   : > { %v1206_v37 = vsel %vm1189_vm5, %v1185_v35, %v897_v32 }
 0x20b   : > { %v1377_v54 = vmax.f32 %v1332_v10, 0.0  ;;  %v1227_v18 = vsel %vm1210_vm6, %v1206_v37, %v977_v9 }
 0x20d   : > { %1397 = vst [vmem:[#allocation2 + $0x51] sm:$0xff] %v1377_v54 }
 0x20f   : > { %v659_v39 = vpop.permute.xlu1 %658 }
 0x210   : > { %v1057_v12 = vpop.permute.xlu0 %1056  ;;  %v1144_v21 = vsel %vm1126_vm2, %v3767_v48, %v659_v39 }
 0x211   : > { %v1248_v27 = vsel %vm1231_vm7, %v1227_v18, %v1057_v12  ;;  %v1165_v34 = vsel %vm1147_vm3, %v1144_v21, %v739_v29  ;;  %v981_v52 = vpop.permute.xlu2 %980 }
 0x212   : > { %2911 = vmatmul.msk.f32.gmra.mxu0 %vm1252_vm8, %v1248_v27 }
 0x217   : > { %v1334_v28 = vpop.f32.mrf.mxu0  ;;  %v899_v30 = vpop.permute.xlu1 %898 }
 0x218   : > { %v1335_v11 = vadd.f32 %v4043_v41, %v1334_v28  ;;  %v819_v42 = vpop.permute.xlu0 %818 }
 0x219   : > { %v1186_v0 = vsel %vm1168_vm4, %v1165_v34, %v819_v42  ;;  %v743_v38 = vpop.permute.xlu2 %742 }
 0x21a   : > { %v1378_v57 = vmax.f32 %v1335_v11, 0.0  ;;  %v1207_v44 = vsel %vm1189_vm5, %v1186_v0, %v899_v30 }
 0x21b   : > { %v1228_v17 = vsel %vm1210_vm6, %v1207_v44, %v979_v60 }
 0x21c   : > { %1398 = vst [vmem:[#allocation2 + $0x61] sm:$0xff] %v1378_v57 }
 0x21f   : > { %v661_v7 = vpop.permute.xlu1 %660 }
 0x220   : > { %v1059_v26 = vpop.permute.xlu0 %1058  ;;  %v1145_v15 = vsel %vm1126_vm2, %v5055_v1, %v661_v7 }
 0x221   : > { %v1337_v62 = vpop.f32.mrf.mxu0  ;;  %v1249_v48 = vsel %vm1231_vm7, %v1228_v17, %v1059_v26  ;;  %v1166_v24 = vsel %vm1147_vm3, %v1145_v15, %v741_v2  ;;  %v983_v51 = vpop.permute.xlu2 %982 }
 0x222   : > { %v1338_v63 = vadd.f32 %v4043_v41, %v1337_v62  ;;  %2912 = vmatmul.msk.f32.gmra.mxu0 %vm1252_vm8, %v1249_v48 }
 0x224   : > { %v1379_v45 = vmax.f32 %v1338_v63, 0.0 }
 0x226   : > { %1399 = vst [vmem:[#allocation2 + $0x69] sm:$0xff] %v1379_v45 }
 0x227   : > { %v901_v31 = vpop.permute.xlu1 %900 }
 0x228   : > { %v821_v4 = vpop.permute.xlu0 %820 }
 0x229   : > { %v1187_v40 = vsel %vm1168_vm4, %v1166_v24, %v821_v4 }
 0x22a   : > { %v1208_v5 = vsel %vm1189_vm5, %v1187_v40, %v901_v31 }
 0x22b   : > { %v1229_v22 = vsel %vm1210_vm6, %v1208_v5, %v981_v52 }
 0x22f   : > { %v663_v46 = vpop.permute.xlu1 %662 }
 0x230   : > { %v1061_v14 = vpop.permute.xlu0 %1060  ;;  %v1340_v43 = vpop.f32.mrf.mxu0  ;;  %v1146_v55 = vsel %vm1126_vm2, %v3792_v6, %v663_v46 }
 0x231   : > { %v1341_v33 = vadd.f32 %v4043_v41, %v1340_v43  ;;  %v1250_v25 = vsel %vm1231_vm7, %v1229_v22, %v1061_v14  ;;  %v1167_v8 = vsel %vm1147_vm3, %v1146_v55, %v743_v38 }
 0x232   : > { %2913 = vmatmul.msk.f32.gmra.mxu0 %vm1252_vm8, %v1250_v25 }
 0x233   : > { %v1380_v56 = vmax.f32 %v1341_v33, 0.0 }
 0x235   : > { %1400 = vst [vmem:[#allocation2 + $0x79] sm:$0xff] %v1380_v56 }
 0x237   : > { %v903_v23 = vpop.permute.xlu1 %902 }
 0x238   : > { %v823_v19 = vpop.permute.xlu0 %822 }
 0x239   : > { %v1188_v36 = vsel %vm1168_vm4, %v1167_v8, %v823_v19 }
 0x23a   : > { %v1209_v49 = vsel %vm1189_vm5, %v1188_v36, %v903_v23 }
 0x23b   : > { %v1230_v3 = vsel %vm1210_vm6, %v1209_v49, %v983_v51 }
 0x23f   : > { %v1343_v58 = vpop.f32.mrf.mxu0 }
 0x240   : > { %v1344_v61 = vadd.f32 %v4043_v41, %v1343_v58  ;;  %v1063_v13 = vpop.permute.xlu0 %1062 }
 0x241   : > { %v1251_v50 = vsel %vm1231_vm7, %v1230_v3, %v1063_v13 }
 0x242   : > { %v1381_v47 = vmax.f32 %v1344_v61, 0.0  ;;  %2914 = vmatmul.msk.f32.gmra.mxu0 %vm1252_vm8, %v1251_v50 }
 0x244   : > { %1401 = vst [vmem:[#allocation2 + $0x81] sm:$0xff] %v1381_v47 }
 0x24f   : > { %v1346_v6 = vpop.f32.mrf.mxu0 }
 0x250   : > { %v1347_v9 = vadd.f32 %v4043_v41, %v1346_v6 }
 0x252   : > { %v1382_v16 = vmax.f32 %v1347_v9, 0.0 }
 0x254   : > { %1402 = vst [vmem:[#allocation2 + $0x91] sm:$0xff] %v1382_v16 }
 0x25f   : > { %v1349_v32 = vpop.f32.mrf.mxu0 }
 0x260   : > { %v1350_v59 = vadd.f32 %v4043_v41, %v1349_v32 }
 0x262   : > { %v1383_v20 = vmax.f32 %v1350_v59, 0.0 }
 0x264   : > { %1403 = vst [vmem:[#allocation2 + $0x99] sm:$0xff] %v1383_v20 }
 0x26f   : > { %v1352_v53 = vpop.f32.mrf.mxu0 }
 0x270   : > { %v1353_v10 = vadd.f32 %v4043_v41, %v1352_v53 }
 0x272   : > { %v1384_v35 = vmax.f32 %v1353_v10, 0.0 }
 0x274   : > { %1404 = vst [vmem:[#allocation2 + $0xa9] sm:$0xff] %v1384_v35 }
 0x27f   : > { %v1355_v54 = vpop.f32.mrf.mxu0 }
 0x280   : > { %v1356_v29 = vadd.f32 %v4043_v41, %v1355_v54 }
 0x282   : > { %v1385_v37 = vmax.f32 %v1356_v29, 0.0 }
 0x284   : > { %1405 = vst [vmem:[#allocation2 + $0xb1] sm:$0xff] %v1385_v37 }
 0x28f   : > { %v1358_v39 = vpop.f32.mrf.mxu0 }
 0x290   : > { %v1359_v18 = vadd.f32 %v4043_v41, %v1358_v39 }
 0x292   : > { %v1386_v12 = vmax.f32 %v1359_v18, 0.0 }
 0x294   : > { %1406 = vst [vmem:[#allocation2 + $0xc1] sm:$0xff] %v1386_v12 }
 0x29f   : > { %v1361_v27 = vpop.f32.mrf.mxu0 }
 0x2a0   : > { %v1362_v60 = vadd.f32 %v4043_v41, %v1361_v27 }
 0x2a2   : > { %v1387_v21 = vmax.f32 %v1362_v60, 0.0 }
 0x2a4   : > { %1407 = vst [vmem:[#allocation2 + $0xc9] sm:$0xff] %v1387_v21 }
 0x2af   : > { %v1364_v28 = vpop.f32.mrf.mxu0 }
 0x2b0   : > { %v1365_v30 = vadd.f32 %v4043_v41, %v1364_v28 }
 0x2b2   : > { %v1388_v11 = vmax.f32 %v1365_v30, 0.0 }
 0x2b4   : > { %1408 = vst [vmem:[#allocation2 + $0xd9] sm:$0xff] %v1388_v11 }
 0x2bf   : > { %v1367_v42 = vpop.f32.mrf.mxu0 }
 0x2c0   : > { %v1368_v34 = vadd.f32 %v4043_v41, %v1367_v42  ;;  %1433 = sbr.rel (%p2915_p2) target bundleno = 713 (0x2c9), region = 48 }
 0x2c2   : > { %v1389_v57 = vmax.f32 %v1368_v34, 0.0 }
 0x2c4   : > { %1409 = vst [vmem:[#allocation2 + $0xe1] sm:$0xff] %v1389_v57 }
 0x2c5   : > { %v3212_v0 = vmov 0.0  }
 0x2c6   : > { %1434 = vst [vmem:[#allocation2] sm:$0xff] %v3212_v0 }
 0x2c7   : > { %1435 = vst [vmem:[#allocation2 + $0x8] sm:$0xff] %v3212_v0 }
 0x2c8   : > { %1436 = vst [vmem:[#allocation2 + $0x10] sm:$0x3] %v3212_v0 }
 0x2c9 PF: > { %p2916_p4 = scmp.ne.s32.totalorder %s3182_s21, 1 }
 0x2cb   : > { %1440 = sbr.rel (%p2916_p4) target bundleno = 724 (0x2d4), region = 52 }
 0x2d0   : > { %v3213_v44 = vmov 0.0  }
 0x2d1   : > { %1442 = vst [vmem:[#allocation2 + $0xd8] sm:$0xff] %v3213_v44 }
 0x2d2   : > { %1443 = vst [vmem:[#allocation2 + $0xe0] sm:$0xff] %v3213_v44 }
 0x2d3   : > { %1444 = vst [vmem:[#allocation2 + $0xe8] sm:$0x3] %v3213_v44 }
 0x2d4 PF: > { %v1894_v41 = vld [vmem:[%s5020_s3 + $0x78] sm:$0xff]  ;;  %v1893_v2 = vld [vmem:[%s5020_s3 + $0x70] sm:$0xff]  ;;  %v1892_v26 = vld [vmem:[%s5020_s3 + $0x68] sm:$0xff]  ;;  %s2918_s26 = sshll.u32 %s3182_s21, 4  ;;  %s2919_s30 = sshll.u32 %s3186_s22, 5 }
 0x2d5   : > { %v1910_v7 = vld [vmem:[%s5020_s3 + $0xf8] sm:$0xff]  ;;  %2027 = vmatpush.msra.mxu1 %v1894_v41  ;;  %2923 = vmatpush.msra.mxu3 %v1894_v41  ;;  %v1909_v17 = vld [vmem:[%s5020_s3 + $0xf0] sm:$0xff]  ;;  %v1908_v62 = vld [vmem:[%s5020_s3 + $0xe8] sm:$0xff]  ;;  %s2656_s6 = sadd.s32 %s2919_s30, %s2918_s26  ;;  %s2659_s22 = sshll.u32 %s4168_s12, 4  ;;  %s2660_s22 = int_to_ptr.vmem [resolvable:$true] %s2659_s22 }
 0x2d6   : > { %2939 = vmatpush.msra.mxu2 %v1910_v7  ;;  %2092 = vmatpush.msrb.mxu0 %v1910_v7  ;;  %v1891_v48 = vld [vmem:[%s5020_s3 + $0x60] sm:$0xff]  ;;  %v1890_v45 = vld [vmem:[%s5020_s3 + $0x58] sm:$0xff]  ;;  %v1889_v15 = vld [vmem:[%s5020_s3 + $0x50] sm:$0xff]  ;;  %s2920_s9 = sshll.u32 %s2656_s6, 3  ;;  %s2645_s13 = scalar_lea.sflag [#allocation6], %s246_s27 }
 0x2d7   : > { %2028 = vmatpush.msra.mxu1 %v1893_v2  ;;  %2924 = vmatpush.msra.mxu3 %v1893_v2  ;;  %v1907_v63 = vld [vmem:[%s5020_s3 + $0xe0] sm:$0xff]  ;;  %v1906_v1 = vld [vmem:[%s5020_s3 + $0xd8] sm:$0xff]  ;;  %v1905_v31 = vld [vmem:[%s5020_s3 + $0xd0] sm:$0xff]  ;;  %s2658_s21 = scalar_lea.hbm %s5022_s5, %s2920_s9  ;;  %s3120_s6 = scalar_lea.hbm %s5022_s5, 512 }
 0x2d8   : > { %2940 = vmatpush.msra.mxu2 %v1909_v17  ;;  %2093 = vmatpush.msrb.mxu0 %v1909_v17  ;;  %v1888_v4 = vld [vmem:[%s5020_s3 + $0x48] sm:$0xff]  ;;  %v1887_v52 = vld [vmem:[%s5020_s3 + $0x40] sm:$0xff]  ;;  %v1886_v5 = vld [vmem:[%s5020_s3 + $0x38] sm:$0xff]  ;;  %s2661_s15 = sshll.u32 %s2658_s21, 4  ;;  %s2662_s15 = int_to_ptr.hbm [resolvable:$true] %s2661_s15 }
 0x2d9   : > { %2029 = vmatpush.msra.mxu1 %v1892_v26  ;;  %2925 = vmatpush.msra.mxu3 %v1892_v26  ;;  %v1904_v24 = vld [vmem:[%s5020_s3 + $0xc8] sm:$0xff]  ;;  %v1903_v40 = vld [vmem:[%s5020_s3 + $0xc0] sm:$0xff]  ;;  %v1902_v46 = vld [vmem:[%s5020_s3 + $0xb8] sm:$0xff]  ;;  %s3114_s14 = sshra.s32 %s2662_s15, 4  ;;  %s3115_s14 = int_to_ptr.hbm [resolvable:$true] %s3114_s14 }
 0x2da   : > { %2941 = vmatpush.msra.mxu2 %v1908_v62  ;;  %2094 = vmatpush.msrb.mxu0 %v1908_v62  ;;  %v1885_v22 = vld [vmem:[%s5020_s3 + $0x30] sm:$0xff]  ;;  %v1884_v43 = vld [vmem:[%s5020_s3 + $0x28] sm:$0xff]  ;;  %v1883_v25 = vld [vmem:[%s5020_s3 + $0x20] sm:$0xff]  ;;  %s3116_s17 = scalar_lea.hbm %s3115_s14, 128  ;;  %p3121_p9 = scmp.lt.s32.totalorder %s3115_s14, %s5022_s5 }
 0x2db   : > { %2030 = vmatpush.msra.mxu1 %v1891_v48  ;;  %2926 = vmatpush.msra.mxu3 %v1891_v48  ;;  %v1901_v14 = vld [vmem:[%s5020_s3 + $0xb0] sm:$0xff]  ;;  %v1900_v33 = vld [vmem:[%s5020_s3 + $0xa8] sm:$0xff]  ;;  %v1899_v56 = vld [vmem:[%s5020_s3 + $0xa0] sm:$0xff]  ;;  %p3117_p5 = scmp.ne.s32.totalorder %s3115_s14, %s3116_s17  ;;  %p3122_p10 = scmp.lt.s32.totalorder %s3120_s6, %s3116_s17 }
 0x2dc   : > { %2942 = vmatpush.msra.mxu2 %v1907_v63  ;;  %2095 = vmatpush.msrb.mxu0 %v1907_v63  ;;  %v1882_v38 = vld [vmem:[%s5020_s3 + $0x18] sm:$0xff]  ;;  %v1881_v19 = vld [vmem:[%s5020_s3 + $0x10] sm:$0xff]  ;;  %v1880_v36 = vld [vmem:[%s5020_s3 + $0x8] sm:$0xff] }
 0x2dd   : > { %2031 = vmatpush.msra.mxu1 %v1890_v45  ;;  %2927 = vmatpush.msra.mxu3 %v1890_v45  ;;  %v1898_v55 = vld [vmem:[%s5020_s3 + $0x98] sm:$0xff]  ;;  %v1897_v8 = vld [vmem:[%s5020_s3 + $0x90] sm:$0xff]  ;;  %v1896_v23 = vld [vmem:[%s5020_s3 + $0x88] sm:$0xff]  ;;  %p3118_p6 = pnand %p3117_p5, %p3297_p3  ;;  %p3123_p11 = por %p3122_p10, %p3121_p9 }
 0x2de   : > { %2943 = vmatpush.msra.mxu2 %v1906_v1  ;;  %2096 = vmatpush.msrb.mxu0 %v1906_v1  ;;  %v1879_v49 = vld [vmem:[%s5020_s3] sm:$0xff]  ;;  %v4268_v3 = vld [vmem:[#allocation2 + $0x68] sm:$0xff]  ;;  %v4270_v61 = vld [vmem:[#allocation2 + $0x51] sm:$0xff] }
 0x2df   : > { %2032 = vmatpush.msra.mxu1 %v1889_v15  ;;  %2928 = vmatpush.msra.mxu3 %v1889_v15  ;;  %v1895_v51 = vld [vmem:[%s5020_s3 + $0x80] sm:$0xff]  ;;  %v1926_v13 = vld [vmem:[%s5020_s3 + $0x178] sm:$0xff]  ;;  %v1925_v6 = vld [vmem:[%s5020_s3 + $0x170] sm:$0xff]  ;;  %p3119_p7 = pneg %p3118_p6 }
 0x2e0   : > { %2944 = vmatpush.msra.mxu2 %v1905_v31  ;;  %2097 = vmatpush.msrb.mxu0 %v1905_v31  ;;  %v1445_v58 = vld [vmem:[#allocation2] sm:$0xff]  ;;  %v1958_v50 = vld [vmem:[%s5020_s3 + $0x278] sm:$0xff]  ;;  %v1957_v9 = vld [vmem:[%s5020_s3 + $0x270] sm:$0xff] }
 0x2e1   : > { %2033 = vmatpush.msra.mxu1 %v1888_v4  ;;  %2929 = vmatpush.msra.mxu3 %v1888_v4  ;;  %v1942_v47 = vld [vmem:[%s5020_s3 + $0x1f8] sm:$0xff]  ;;  %v1477_v16 = vld [vmem:[#allocation2 + $0x1] sm:$0xff]  ;;  %v1941_v32 = vld [vmem:[%s5020_s3 + $0x1f0] sm:$0xff]  ;;  %p3124_p12 = pnand %p3123_p11, %p3119_p7 }
 0x2e2   : > { %2945 = vmatpush.msra.mxu2 %v1904_v24  ;;  %2098 = vmatpush.msrb.mxu0 %v1904_v24  ;;  %v1924_v59 = vld [vmem:[%s5020_s3 + $0x168] sm:$0xff]  ;;  %v1923_v35 = vld [vmem:[%s5020_s3 + $0x160] sm:$0xff]  ;;  %v4304_v54 = vld [vmem:[#allocation2 + $0x78] sm:$0xff] }
 0x2e3   : > { %2034 = vmatpush.msra.mxu1 %v1887_v52  ;;  %2930 = vmatpush.msra.mxu3 %v1887_v52  ;;  %v1956_v20 = vld [vmem:[%s5020_s3 + $0x268] sm:$0xff]  ;;  %v1922_v37 = vld [vmem:[%s5020_s3 + $0x158] sm:$0xff]  ;;  %v1955_v39 = vld [vmem:[%s5020_s3 + $0x260] sm:$0xff] }
 0x2e4   : > { %2946 = vmatpush.msra.mxu2 %v1903_v40  ;;  %2099 = vmatpush.msrb.mxu0 %v1903_v40  ;;  %v1940_v53 = vld [vmem:[%s5020_s3 + $0x1e8] sm:$0xff]  ;;  %v1939_v18 = vld [vmem:[%s5020_s3 + $0x1e0] sm:$0xff]  ;;  %v1921_v12 = vld [vmem:[%s5020_s3 + $0x150] sm:$0xff] }
 0x2e5   : > { %2035 = vmatpush.msra.mxu1 %v1886_v5  ;;  %2931 = vmatpush.msra.mxu3 %v1886_v5  ;;  %v1446_v10 = vld [vmem:[#allocation2 + $0x8] sm:$0xff]  ;;  %v1954_v27 = vld [vmem:[%s5020_s3 + $0x258] sm:$0xff]  ;;  %v1953_v30 = vld [vmem:[%s5020_s3 + $0x250] sm:$0xff] }
 0x2e6   : > { %2947 = vmatpush.msra.mxu2 %v1902_v46  ;;  %2100 = vmatpush.msrb.mxu0 %v1902_v46  ;;  %v4306_v29 = vld [vmem:[#allocation2 + $0x61] sm:$0xff]  ;;  %v1478_v60 = vld [vmem:[#allocation2 + $0x9] sm:$0xff]  ;;  %v1938_v21 = vld [vmem:[%s5020_s3 + $0x1d8] sm:$0xff] }
 0x2e7   : > { %2036 = vmatpush.msra.mxu1 %v1885_v22  ;;  %2932 = vmatpush.msra.mxu3 %v1885_v22  ;;  %v1920_v28 = vld [vmem:[%s5020_s3 + $0x148] sm:$0xff]  ;;  %v1937_v11 = vld [vmem:[%s5020_s3 + $0x1d0] sm:$0xff]  ;;  %v4337_v42 = vld [vmem:[#allocation2 + $0x18] sm:$0xff] }
 0x2e8   : > { %2948 = vmatpush.msra.mxu2 %v1901_v14  ;;  %2101 = vmatpush.msrb.mxu0 %v1901_v14  ;;  %v1919_v34 = vld [vmem:[%s5020_s3 + $0x140] sm:$0xff]  ;;  %v4344_v0 = vld [vmem:[#allocation2 + $0x69] sm:$0xff]  ;;  %v1918_v44 = vld [vmem:[%s5020_s3 + $0x138] sm:$0xff] }
 0x2e9   : > { %2037 = vmatpush.msra.mxu1 %v1884_v43  ;;  %2933 = vmatpush.msra.mxu3 %v1884_v43  ;;  %v4342_v57 = vld [vmem:[#allocation2 + $0x80] sm:$0xff]  ;;  %v1952_v41 = vld [vmem:[%s5020_s3 + $0x248] sm:$0xff]  ;;  %v1917_v2 = vld [vmem:[%s5020_s3 + $0x130] sm:$0xff] }
 0x2ea   : > { %2949 = vmatpush.msra.mxu2 %v1900_v33  ;;  %2102 = vmatpush.msrb.mxu0 %v1900_v33  ;;  %v1936_v7 = vld [vmem:[%s5020_s3 + $0x1c8] sm:$0xff]  ;;  %v1951_v17 = vld [vmem:[%s5020_s3 + $0x240] sm:$0xff]  ;;  %v1950_v63 = vld [vmem:[%s5020_s3 + $0x238] sm:$0xff] }
 0x2eb   : > { %2038 = vmatpush.msra.mxu1 %v1883_v25  ;;  %2934 = vmatpush.msra.mxu3 %v1883_v25  ;;  %v4364_v26 = vld [vmem:[#allocation2 + $0x19] sm:$0xff]  ;;  %v1916_v48 = vld [vmem:[%s5020_s3 + $0x128] sm:$0xff]  ;;  %v4384_v31 = vld [vmem:[#allocation2 + $0x90] sm:$0xff] }
 0x2ec   : > { %2950 = vmatpush.msra.mxu2 %v1899_v56  ;;  %2103 = vmatpush.msrb.mxu0 %v1899_v56  ;;  %v1935_v62 = vld [vmem:[%s5020_s3 + $0x1c0] sm:$0xff]  ;;  %v1934_v45 = vld [vmem:[%s5020_s3 + $0x1b8] sm:$0xff]  ;;  %v1949_v52 = vld [vmem:[%s5020_s3 + $0x230] sm:$0xff] }
 0x2ed   : > { %2039 = vmatpush.msra.mxu1 %v1882_v38  ;;  %2935 = vmatpush.msra.mxu3 %v1882_v38  ;;  %v4378_v1 = vld [vmem:[#allocation2 + $0x20] sm:$0xff]  ;;  %v1914_v24 = vld [vmem:[%s5020_s3 + $0x118] sm:$0xff]  ;;  %v1933_v40 = vld [vmem:[%s5020_s3 + $0x1b0] sm:$0xff] }
 0x2ee   : > { %2951 = vmatpush.msra.mxu2 %v1898_v55  ;;  %2104 = vmatpush.msrb.mxu0 %v1898_v55  ;;  %v1915_v15 = vld [vmem:[%s5020_s3 + $0x120] sm:$0xff]  ;;  %v1913_v5 = vld [vmem:[%s5020_s3 + $0x110] sm:$0xff]  ;;  %v1948_v46 = vld [vmem:[%s5020_s3 + $0x228] sm:$0xff] }
 0x2ef   : > { %2040 = vmatpush.msra.mxu1 %v1881_v19  ;;  %2936 = vmatpush.msra.mxu3 %v1881_v19  ;;  %v4386_v4 = vld [vmem:[#allocation2 + $0x79] sm:$0xff]  ;;  %v4406_v22 = vld [vmem:[#allocation2 + $0x21] sm:$0xff]  ;;  %v4420_v56 = vld [vmem:[#allocation2 + $0x30] sm:$0xff] }
 0x2f0   : > { %2952 = vmatpush.msra.mxu2 %v1897_v8  ;;  %2105 = vmatpush.msrb.mxu0 %v1897_v8  ;;  %v1932_v14 = vld [vmem:[%s5020_s3 + $0x1a8] sm:$0xff]  ;;  %v1947_v33 = vld [vmem:[%s5020_s3 + $0x220] sm:$0xff]  ;;  %v4426_v55 = vld [vmem:[#allocation2 + $0x98] sm:$0xff] }
 0x2f1   : > { %2041 = vmatpush.msra.mxu1 %v1880_v36  ;;  %2937 = vmatpush.msra.mxu3 %v1880_v36  ;;  %v1912_v43 = vld [vmem:[%s5020_s3 + $0x108] sm:$0xff]  ;;  %v1931_v25 = vld [vmem:[%s5020_s3 + $0x1a0] sm:$0xff]  ;;  %v1974_v8 = vld [vmem:[%s5020_s3 + $0x2f8] sm:$0xff] }
 0x2f2   : > { %2953 = vmatpush.msra.mxu2 %v1896_v23  ;;  %2106 = vmatpush.msrb.mxu0 %v1896_v23  ;;  %v1911_v38 = vld [vmem:[%s5020_s3 + $0x100] sm:$0xff]  ;;  %v1946_v36 = vld [vmem:[%s5020_s3 + $0x218] sm:$0xff] }
 0x2f3   : > { %2042 = vmatpush.msra.mxu1 %v1879_v49  ;;  %2938 = vmatpush.msra.mxu3 %v1879_v49  ;;  %v4428_v19 = vld [vmem:[#allocation2 + $0x81] sm:$0xff]  ;;  %v1930_v23 = vld [vmem:[%s5020_s3 + $0x198] sm:$0xff]  ;;  %v1945_v49 = vld [vmem:[%s5020_s3 + $0x210] sm:$0xff] }
 0x2f4   : > { %2954 = vmatpush.msra.mxu2 %v1895_v51  ;;  %2043 = vmatmul.f32.vlgmr.msra.gmra.mxu1 %v1445_v58  ;;  %v4448_v58 = vld [vmem:[#allocation2 + $0x31] sm:$0xff] }
 0x2f5   : > { %2070 = vmatmul.f32.vlgmr.msra.gmra.mxu3 %v4268_v3  ;;  %2129 = vmatmul.f32.vlgmr.msra.gmra.mxu2 %v4270_v61 }
 0x2f6   : > { %2157 = vmatpush.msrb.mxu3 %v1926_v13  ;;  %2287 = vmatpush.msrb.mxu2 %v1958_v50  ;;  %v1929_v13 = vld [vmem:[%s5020_s3 + $0x190] sm:$0xff]  ;;  %v1944_v50 = vld [vmem:[%s5020_s3 + $0x208] sm:$0xff] }
 0x2f7   : > { %2222 = vmatpush.msrb.mxu1 %v1942_v47  ;;  %2107 = vmatpush.msrb.mxu0 %v1895_v51  ;;  %v1973_v51 = vld [vmem:[%s5020_s3 + $0x2f0] sm:$0xff]  ;;  %v1928_v47 = vld [vmem:[%s5020_s3 + $0x188] sm:$0xff] }
 0x2f8   : > { %2158 = vmatpush.msrb.mxu3 %v1925_v6  ;;  %2288 = vmatpush.msrb.mxu2 %v1957_v9  ;;  %v4459_v6 = vld [vmem:[#allocation2 + $0x38] sm:$0xff]  ;;  %v1943_v9 = vld [vmem:[%s5020_s3 + $0x200] sm:$0xff] }
 0x2f9   : > { %2108 = vmatmul.f32.vlgmr.msrb.gmra.mxu0 %v1477_v16  ;;  %2223 = vmatpush.msrb.mxu1 %v1941_v32  ;;  %v4465_v16 = vld [vmem:[#allocation2 + $0xa8] sm:$0xff]  ;;  %v4467_v32 = vld [vmem:[#allocation2 + $0x91] sm:$0xff] }
 0x2fa   : > { %2159 = vmatpush.msrb.mxu3 %v1924_v59  ;;  %2289 = vmatpush.msrb.mxu2 %v1956_v20  ;;  %v1927_v59 = vld [vmem:[%s5020_s3 + $0x180] sm:$0xff]  ;;  %v1972_v20 = vld [vmem:[%s5020_s3 + $0x2e8] sm:$0xff] }
 0x2fb   : > { %2224 = vmatpush.msrb.mxu1 %v1940_v53  ;;  %v2022_v53 = vld [vmem:[%s5020_s3 + $0x478] sm:$0xff] }
 0x2fc   : > { %2046 = vmatmul.f32.gmra.mxu1 %v1446_v10  ;;  %2160 = vmatpush.msrb.mxu3 %v1923_v35  ;;  %v4481_v10 = vld [vmem:[#allocation2 + $0x39] sm:$0xff]  ;;  %v4483_v35 = vld [vmem:[#allocation2 + $0x48] sm:$0xff] }
 0x2fd   : > { %2073 = vmatmul.f32.gmra.mxu3 %v4304_v54  ;;  %2132 = vmatmul.f32.gmra.mxu2 %v4306_v29 }
 0x2fe   : > { %2161 = vmatpush.msrb.mxu3 %v1922_v37  ;;  %2290 = vmatpush.msrb.mxu2 %v1955_v39  ;;  %v4486_v37 = vld [vmem:[#allocation2 + $0xb0] sm:$0xff]  ;;  %v4488_v39 = vld [vmem:[#allocation2 + $0x99] sm:$0xff] }
 0x2ff   : > { %2225 = vmatpush.msrb.mxu1 %v1939_v18  ;;  %v1971_v18 = vld [vmem:[%s5020_s3 + $0x2e0] sm:$0xff] }
 0x300   : > { %2162 = vmatpush.msrb.mxu3 %v1921_v12  ;;  %2291 = vmatpush.msrb.mxu2 %v1954_v27  ;;  %v2006_v12 = vld [vmem:[%s5020_s3 + $0x3f8] sm:$0xff]  ;;  %v2021_v27 = vld [vmem:[%s5020_s3 + $0x470] sm:$0xff] }
 0x301   : > { %2111 = vmatmul.f32.gmra.mxu0 %v1478_v60  ;;  %2226 = vmatpush.msrb.mxu1 %v1938_v21  ;;  %v4502_v60 = vld [vmem:[#allocation2 + $0x49] sm:$0xff] }
 0x302   : > { %2163 = vmatpush.msrb.mxu3 %v1920_v28  ;;  %2292 = vmatpush.msrb.mxu2 %v1953_v30  ;;  %v4504_v21 = vld [vmem:[#allocation2 + $0x50] sm:$0xff]  ;;  %v1509_v30 = vld [vmem:[#allocation2 + $0x2] sm:$0xff] }
 0x303   : > { %2227 = vmatpush.msrb.mxu1 %v1937_v11  ;;  %v4507_v28 = vld [vmem:[#allocation2 + $0xa9] sm:$0xff]  ;;  %v1970_v11 = vld [vmem:[%s5020_s3 + $0x2d8] sm:$0xff] }
 0x304   : > { %2049 = vmatmul.f32.gmra.mxu1 %v4337_v42  ;;  %2164 = vmatpush.msrb.mxu3 %v1919_v34  ;;  %v2005_v34 = vld [vmem:[%s5020_s3 + $0x3f0] sm:$0xff] }
 0x305   : > { %2076 = vmatmul.f32.gmra.mxu3 %v4342_v57  ;;  %2135 = vmatmul.f32.gmra.mxu2 %v4344_v0 }
 0x306   : > { %2165 = vmatpush.msrb.mxu3 %v1918_v44  ;;  %2293 = vmatpush.msrb.mxu2 %v1952_v41  ;;  %v2020_v44 = vld [vmem:[%s5020_s3 + $0x468] sm:$0xff]  ;;  %v4520_v41 = vld [vmem:[#allocation2 + $0x60] sm:$0xff] }
 0x307   : > { %2228 = vmatpush.msrb.mxu1 %v1936_v7  ;;  %v4522_v7 = vld [vmem:[#allocation2 + $0xb1] sm:$0xff] }
 0x308   : > { %2166 = vmatpush.msrb.mxu3 %v1917_v2  ;;  %2294 = vmatpush.msrb.mxu2 %v1951_v17  ;;  %v1510_v2 = vld [vmem:[#allocation2 + $0xa] sm:$0xff] }
 0x309   : > { %2114 = vmatmul.f32.gmra.mxu0 %v4364_v26  ;;  %2229 = vmatpush.msrb.mxu1 %v1935_v62  ;;  %v1969_v17 = vld [vmem:[%s5020_s3 + $0x2d0] sm:$0xff]  ;;  %v2004_v62 = vld [vmem:[%s5020_s3 + $0x3e8] sm:$0xff] }
 0x30a   : > { %2167 = vmatpush.msrb.mxu3 %v1916_v48  ;;  %2295 = vmatpush.msrb.mxu2 %v1950_v63  ;;  %v2019_v48 = vld [vmem:[%s5020_s3 + $0x460] sm:$0xff] }
 0x30b   : > { %2230 = vmatpush.msrb.mxu1 %v1934_v45  ;;  %v4535_v63 = vld [vmem:[#allocation2 + $0x1a] sm:$0xff]  ;;  %v1968_v45 = vld [vmem:[%s5020_s3 + $0x2c8] sm:$0xff] }
 0x30c   : > { %2052 = vmatmul.f32.gmra.mxu1 %v4378_v1  ;;  %2168 = vmatpush.msrb.mxu3 %v1915_v15  ;;  %v2003_v15 = vld [vmem:[%s5020_s3 + $0x3e0] sm:$0xff] }
 0x30d   : > { %2079 = vmatmul.f32.gmra.mxu3 %v4384_v31  ;;  %2138 = vmatmul.f32.gmra.mxu2 %v4386_v4 }
 0x30e   : > { %2169 = vmatpush.msrb.mxu3 %v1914_v24  ;;  %2296 = vmatpush.msrb.mxu2 %v1949_v52  ;;  %v2018_v24 = vld [vmem:[%s5020_s3 + $0x458] sm:$0xff] }
 0x30f   : > { %2231 = vmatpush.msrb.mxu1 %v1933_v40  ;;  %v2002_v52 = vld [vmem:[%s5020_s3 + $0x3d8] sm:$0xff]  ;;  %v2017_v40 = vld [vmem:[%s5020_s3 + $0x450] sm:$0xff] }
 0x310   : > { %2170 = vmatpush.msrb.mxu3 %v1913_v5  ;;  %2297 = vmatpush.msrb.mxu2 %v1948_v46  ;;  %v1966_v5 = vld [vmem:[%s5020_s3 + $0x2b8] sm:$0xff]  ;;  %v2001_v46 = vld [vmem:[%s5020_s3 + $0x3d0] sm:$0xff] }
 0x311   : > { %2117 = vmatmul.f32.gmra.mxu0 %v4406_v22  ;;  %2232 = vmatpush.msrb.mxu1 %v1932_v14  ;;  %v4577_v14 = vld [vmem:[#allocation2 + $0x3a] sm:$0xff] }
 0x312   : > { %2171 = vmatpush.msrb.mxu3 %v1912_v43  ;;  %2298 = vmatpush.msrb.mxu2 %v1947_v33  ;;  %v1965_v43 = vld [vmem:[%s5020_s3 + $0x2b0] sm:$0xff]  ;;  %v2000_v33 = vld [vmem:[%s5020_s3 + $0x3c8] sm:$0xff] }
 0x313   : > { %2233 = vmatpush.msrb.mxu1 %v1931_v25  ;;  %v2015_v25 = vld [vmem:[%s5020_s3 + $0x440] sm:$0xff] }
 0x314   : > { %2055 = vmatmul.f32.gmra.mxu1 %v4420_v56  ;;  %2172 = vmatpush.msrb.mxu3 %v1911_v38  ;;  %v4591_v38 = vld [vmem:[#allocation2 + $0x4a] sm:$0xff] }
 0x315   : > { %2082 = vmatmul.f32.gmra.mxu3 %v4426_v55  ;;  %2141 = vmatmul.f32.gmra.mxu2 %v4428_v19 }
 0x316   : > { %2352 = vmatpush.msra.mxu3 %v1974_v8  ;;  %2299 = vmatpush.msrb.mxu2 %v1946_v36  ;;  %v1964_v8 = vld [vmem:[%s5020_s3 + $0x2a8] sm:$0xff]  ;;  %v1999_v36 = vld [vmem:[%s5020_s3 + $0x3c0] sm:$0xff] }
 0x317   : > { %2234 = vmatpush.msrb.mxu1 %v1930_v23  ;;  %v2014_v23 = vld [vmem:[%s5020_s3 + $0x438] sm:$0xff] }
 0x318   : > { %2300 = vmatpush.msrb.mxu2 %v1945_v49  ;;  %2353 = vmatpush.msra.mxu3 %v1973_v51  ;;  %v4605_v49 = vld [vmem:[#allocation2 + $0x52] sm:$0xff]  ;;  %v1963_v51 = vld [vmem:[%s5020_s3 + $0x2a0] sm:$0xff] }
 0x319   : > { %2120 = vmatmul.f32.gmra.mxu0 %v4448_v58  ;;  %2235 = vmatpush.msrb.mxu1 %v1929_v13  ;;  %v1998_v13 = vld [vmem:[%s5020_s3 + $0x3b8] sm:$0xff] }
 0x31a   : > { %2301 = vmatpush.msrb.mxu2 %v1944_v50  ;;  %2354 = vmatpush.msra.mxu3 %v1972_v20  ;;  %v2013_v50 = vld [vmem:[%s5020_s3 + $0x430] sm:$0xff]  ;;  %v2012_v20 = vld [vmem:[%s5020_s3 + $0x428] sm:$0xff] }
 0x31b   : > { %2236 = vmatpush.msrb.mxu1 %v1928_v47  ;;  %v4619_v47 = vld [vmem:[#allocation2 + $0x62] sm:$0xff] }
 0x31c   : > { %2058 = vmatmul.f32.gmra.mxu1 %v4459_v6  ;;  %2302 = vmatpush.msrb.mxu2 %v1943_v9  ;;  %v1997_v9 = vld [vmem:[%s5020_s3 + $0x3b0] sm:$0xff] }
 0x31d   : > { %2085 = vmatmul.f32.gmra.mxu3 %v4465_v16  ;;  %2144 = vmatmul.f32.gmra.mxu2 %v4467_v32 }
 0x31e   : > { %2237 = vmatpush.msrb.mxu1 %v1927_v59  ;;  %2547 = vmatpush.msra.mxu2 %v2022_v53  ;;  %v4635_v53 = vld [vmem:[#allocation2 + $0x6a] sm:$0xff] }
 0x31f   : > { %2355 = vmatpush.msra.mxu3 %v1971_v18  ;;  %v4640_v18 = vld [vmem:[%s5021_s4] ss:$0 sm:$0xff] }
 0x320   : > { %2482 = vmatpush.msra.mxu1 %v2006_v12  ;;  %2548 = vmatpush.msra.mxu2 %v2021_v27  ;;  %v1961_v12 = vld [vmem:[%s5020_s3 + $0x290] sm:$0xff]  ;;  %v1996_v27 = vld [vmem:[%s5020_s3 + $0x3a8] sm:$0xff] }
 0x321   : > { %2123 = vmatmul.f32.gmra.mxu0 %v4481_v10  ;;  %2356 = vmatpush.msra.mxu3 %v1970_v11 }
 0x322   : > { %2483 = vmatpush.msra.mxu1 %v2005_v34  ;;  %2549 = vmatpush.msra.mxu2 %v2020_v44 }
 0x323   : > { %2357 = vmatpush.msra.mxu3 %v1969_v17  ;;  %v2011_v17 = vld [vmem:[%s5020_s3 + $0x420] sm:$0xff] }
 0x324   : > { %2061 = vmatmul.f32.gmra.mxu1 %v4483_v35  ;;  %2550 = vmatpush.msra.mxu2 %v2019_v48  ;;  %v4668_v48 = vld [vmem:[#allocation2 + $0x7a] sm:$0xff] }
 0x325   : > { %2088 = vmatmul.f32.gmra.mxu3 %v4486_v37  ;;  %2147 = vmatmul.f32.gmra.mxu2 %v4488_v39 }
 0x326   : > { %2484 = vmatpush.msra.mxu1 %v2004_v62  ;;  %2358 = vmatpush.msra.mxu3 %v1968_v45  ;;  %v1988_v62 = vld [vmem:[%s5020_s3 + $0x368] sm:$0xff]  ;;  %v1987_v45 = vld [vmem:[%s5020_s3 + $0x360] sm:$0xff] }
 0x327   : > { %2551 = vmatpush.msra.mxu2 %v2018_v24  ;;  %v1995_v24 = vld [vmem:[%s5020_s3 + $0x3a0] sm:$0xff] }
 0x328   : > { %2485 = vmatpush.msra.mxu1 %v2003_v15  ;;  %v1960_v15 = vld [vmem:[%s5020_s3 + $0x288] sm:$0xff] }
 0x329   : > { %2126 = vmatmul.f32.gmra.mxu0 %v4502_v60  ;;  %2552 = vmatpush.msra.mxu2 %v2017_v40 }
 0x32a   : > { %2486 = vmatpush.msra.mxu1 %v2002_v52 }
 0x32c   : > { %2064 = vmatmul.f32.gmra.mxu1 %v4504_v21 }
 0x32d   : > { %2150 = vmatmul.f32.gmra.mxu2 %v4507_v28  ;;  %2173 = vmatmul.f32.vlgmr.msrb.gmra.mxu3 %v1509_v30  ;;  %v1990_v30 = vld [vmem:[%s5020_s3 + $0x378] sm:$0xff] }
 0x32e   : > { %2487 = vmatpush.msra.mxu1 %v2001_v46  ;;  %2417 = vmatpush.msra.mxu0 %v1990_v30 }
 0x330   : > { %2488 = vmatpush.msra.mxu1 %v2000_v33  ;;  %v4699_v33 = vld [vmem:[#allocation2 + $0x82] sm:$0xff] }
 0x332   : > { %2489 = vmatpush.msra.mxu1 %v1999_v36  ;;  %v1994_v36 = vld [vmem:[%s5020_s3 + $0x398] sm:$0xff] }
 0x334   : > { %2067 = vmatmul.f32.gmra.mxu1 %v4520_v41 }
 0x335   : > { %2153 = vmatmul.f32.gmra.mxu2 %v4522_v7  ;;  %2176 = vmatmul.f32.gmra.mxu3 %v1510_v2 }
 0x336   : > { %2490 = vmatpush.msra.mxu1 %v1998_v13 }
 0x338   : > { %2491 = vmatpush.msra.mxu1 %v1997_v9 }
 0x33a   : > { %2492 = vmatpush.msra.mxu1 %v1996_v27  ;;  %v4738_v27 = vld [vmem:[#allocation2 + $0x92] sm:$0xff] }
 0x33c   : > { %2238 = vmatmul.f32.vlgmr.msrb.gmra.mxu1 %v4337_v42  ;;  %v4549_v42 = vld [vmem:[#allocation2 + $0x22] sm:$0xff] }
 0x33d   : > { %2179 = vmatmul.f32.gmra.mxu3 %v4535_v63  ;;  %2303 = vmatmul.f32.vlgmr.msrb.gmra.mxu2 %v4364_v26  ;;  %v1967_v26 = vld [vmem:[%s5020_s3 + $0x2c0] sm:$0xff] }
 0x33e   : > { %2359 = vmatpush.msra.mxu3 %v1967_v26  ;;  %v1986_v26 = vld [vmem:[%s5020_s3 + $0x358] sm:$0xff]  ;;  %2493 = vmatpush.msra.mxu1 %v1995_v24 }
 0x340   : > { %2360 = vmatpush.msra.mxu3 %v1966_v5  ;;  %2494 = vmatpush.msra.mxu1 %v1994_v36 }
 0x342   : > { %2361 = vmatpush.msra.mxu3 %v1965_v43  ;;  %v1984_v43 = vld [vmem:[%s5020_s3 + $0x348] sm:$0xff] }
 0x344   : > { %2241 = vmatmul.f32.gmra.mxu1 %v4378_v1  ;;  %v4563_v1 = vld [vmem:[#allocation2 + $0x32] sm:$0xff]  ;;  %2362 = vmatpush.msra.mxu3 %v1964_v8  ;;  %v1959_v8 = vld [vmem:[%s5020_s3 + $0x280] sm:$0xff] }
 0x345   : > { %2182 = vmatmul.f32.gmra.mxu3 %v4549_v42  ;;  %2306 = vmatmul.f32.gmra.mxu2 %v4406_v22  ;;  %v2016_v22 = vld [vmem:[%s5020_s3 + $0x448] sm:$0xff] }
 0x346   : > { %2553 = vmatpush.msra.mxu2 %v2016_v22  ;;  %2363 = vmatpush.msra.mxu3 %v1963_v51  ;;  %v2010_v22 = vld [vmem:[%s5020_s3 + $0x418] sm:$0xff] }
 0x348   : > { %2554 = vmatpush.msra.mxu2 %v2015_v25  ;;  %v4704_v25 = vld [vmem:[%s5020_s3 + $0x340] sm:$0xff] }
 0x34a   : > { %2555 = vmatpush.msra.mxu2 %v2014_v23  ;;  %v4718_v23 = vld [vmem:[%s5020_s3 + $0x338] sm:$0xff] }
 0x34c   : > { %2244 = vmatmul.f32.gmra.mxu1 %v4420_v56  ;;  %2556 = vmatpush.msra.mxu2 %v2013_v50 }
 0x34d   : > { %2185 = vmatmul.f32.gmra.mxu3 %v4563_v1  ;;  %2309 = vmatmul.f32.gmra.mxu2 %v4448_v58 }
 0x34e   : > { %2557 = vmatpush.msra.mxu2 %v2012_v20  ;;  %v2009_v20 = vld [vmem:[%s5020_s3 + $0x410] sm:$0xff] }
 0x350   : > { %2558 = vmatpush.msra.mxu2 %v2011_v17 }
 0x352   : > { %2559 = vmatpush.msra.mxu2 %v2010_v22  ;;  %v1976_v22 = vld [vmem:[%s5020_s3 + $0x308] sm:$0xff] }
 0x354   : > { %2247 = vmatmul.f32.gmra.mxu1 %v4459_v6  ;;  %2560 = vmatpush.msra.mxu2 %v2009_v20  ;;  %v2007_v20 = vld [vmem:[%s5020_s3 + $0x400] sm:$0xff] }
 0x355   : > { %2188 = vmatmul.f32.gmra.mxu3 %v4577_v14  ;;  %2312 = vmatmul.f32.gmra.mxu2 %v4481_v10 }
 0x35c   : > { %2250 = vmatmul.f32.gmra.mxu1 %v4483_v35 }
 0x35d   : > { %2191 = vmatmul.f32.gmra.mxu3 %v4591_v38  ;;  %2315 = vmatmul.f32.gmra.mxu2 %v4502_v60 }
 0x364   : > { %2253 = vmatmul.f32.gmra.mxu1 %v4504_v21 }
 0x365   : > { %2194 = vmatmul.f32.gmra.mxu3 %v4605_v49  ;;  %2318 = vmatmul.f32.gmra.mxu2 %v4270_v61  ;;  %v1962_v61 = vld [vmem:[%s5020_s3 + $0x298] sm:$0xff] }
 0x366   : > { %2364 = vmatpush.msra.mxu3 %v1962_v61 }
 0x368   : > { %2365 = vmatpush.msra.mxu3 %v1961_v12  ;;  %v1980_v12 = vld [vmem:[%s5020_s3 + $0x328] sm:$0xff] }
 0x36a   : > { %2366 = vmatpush.msra.mxu3 %v1960_v15 }
 0x36c   : > { %2256 = vmatmul.f32.gmra.mxu1 %v4520_v41  ;;  %2367 = vmatpush.msra.mxu3 %v1959_v8  ;;  %v4767_v8 = vld [vmem:[#allocation2 + $0x9a] sm:$0xff] }
 0x36d   : > { %2197 = vmatmul.f32.gmra.mxu3 %v4619_v47  ;;  %2321 = vmatmul.f32.gmra.mxu2 %v4306_v29 }
 0x36e   : > { %2955 = vmatpush.msrb.mxu3 %v1990_v30  ;;  %v1979_v30 = vld [vmem:[%s5020_s3 + $0x320] sm:$0xff] }
 0x371   : > { %v4630_v59 = vpop.f32.mrf.mxu1 }
 0x374   : > { %2259 = vmatmul.f32.gmra.mxu1 %v4268_v3  ;;  %v1989_v3 = vld [vmem:[%s5020_s3 + $0x370] sm:$0xff] }
 0x375   : > { %2200 = vmatmul.f32.gmra.mxu3 %v4635_v53  ;;  %2324 = vmatmul.f32.gmra.mxu2 %v4344_v0 }
 0x376   : > { %2418 = vmatpush.msra.mxu0 %v1989_v3  ;;  %2956 = vmatpush.msrb.mxu3 %v1989_v3  ;;  %v1993_v3 = vld [vmem:[%s5020_s3 + $0x390] sm:$0xff] }
 0x377   : > { %2495 = vmatpush.msra.mxu1 %v1993_v3  ;;  %v4788_v3 = vld [vmem:[#allocation2 + $0xaa] sm:$0xff] }
 0x378   : > { %v2071_v11 = vpop.f32.mrf.mxu3  ;;  %v4657_v34 = vpop.f32.mrf.mxu2  ;;  %2419 = vmatpush.msra.mxu0 %v1988_v62  ;;  %2957 = vmatpush.msrb.mxu3 %v1988_v62 }
 0x379   : > { %v2072_v44 = vadd.f32 %v4640_v18, %v2071_v11  ;;  %v4660_v2 = vpop.f32.mrf.mxu1  ;;  %v1978_v11 = vld [vmem:[%s5020_s3 + $0x318] sm:$0xff] }
 0x37a   : > { %2420 = vmatpush.msra.mxu0 %v1987_v45  ;;  %2958 = vmatpush.msrb.mxu3 %v1987_v45  ;;  %v1975_v45 = vld [vmem:[%s5020_s3 + $0x300] sm:$0xff] }
 0x37c   : > { %2262 = vmatmul.f32.gmra.mxu1 %v4304_v54  ;;  %v1985_v54 = vld [vmem:[%s5020_s3 + $0x350] sm:$0xff]  ;;  %2421 = vmatpush.msra.mxu0 %v1986_v26 }
 0x37d   : > { %2203 = vmatmul.f32.gmra.mxu3 %v4668_v48  ;;  %2327 = vmatmul.f32.gmra.mxu2 %v4386_v4 }
 0x37e   : > { %2422 = vmatpush.msra.mxu0 %v1985_v54  ;;  %2959 = vmatpush.msrb.mxu3 %v1986_v26  ;;  %v1992_v26 = vld [vmem:[%s5020_s3 + $0x388] sm:$0xff] }
 0x37f   : > { %2496 = vmatpush.msra.mxu1 %v1992_v26  ;;  %v4817_v26 = vld [vmem:[#allocation2 + $0xc1] sm:$0xff] }
 0x380   : > { %v2074_v52 = vpop.f32.mrf.mxu3  ;;  %v4688_v40 = vpop.f32.mrf.mxu2  ;;  %2423 = vmatpush.msra.mxu0 %v1984_v43  ;;  %2960 = vmatpush.msrb.mxu3 %v1985_v54 }
 0x381   : > { %v2075_v5 = vadd.f32 %v4640_v18, %v2074_v52  ;;  %v4691_v46 = vpop.f32.mrf.mxu1  ;;  %v2008_v52 = vld [vmem:[%s5020_s3 + $0x408] sm:$0xff] }
 0x382   : > { %2424 = vmatpush.msra.mxu0 %v4704_v25  ;;  %2561 = vmatpush.msra.mxu2 %v2008_v52 }
 0x383   : > { %2961 = vmatpush.msrb.mxu3 %v1984_v43 }
 0x384   : > { %2265 = vmatmul.f32.gmra.mxu1 %v4342_v57  ;;  %v4724_v57 = vld [vmem:[%s5020_s3 + $0x330] sm:$0xff]  ;;  %2425 = vmatpush.msra.mxu0 %v4718_v23 }
 0x385   : > { %2206 = vmatmul.f32.gmra.mxu3 %v4699_v33  ;;  %2330 = vmatmul.f32.gmra.mxu2 %v4428_v19 }
 0x386   : > { %2426 = vmatpush.msra.mxu0 %v4724_v57  ;;  %2962 = vmatpush.msrb.mxu3 %v4704_v25 }
 0x387   : > { %2562 = vmatpush.msra.mxu2 %v2007_v20  ;;  %v4828_v20 = vld [vmem:[#allocation2 + $0xc9] sm:$0xff] }
 0x388   : > { %v2077_v51 = vpop.f32.mrf.mxu3  ;;  %v2136_v13 = vpop.f32.mrf.mxu2  ;;  %2427 = vmatpush.msra.mxu0 %v1980_v12  ;;  %2963 = vmatpush.msrb.mxu3 %v4718_v23  ;;  %v4804_v23 = vld [vmem:[#allocation2 + $0xb2] sm:$0xff] }
 0x389   : > { %v2078_v50 = vadd.f32 %v4640_v18, %v2077_v51  ;;  %v4728_v61 = vadd.f32 %v2136_v13, %v2072_v44  ;;  %v4730_v9 = vpop.f32.mrf.mxu1  ;;  %v1977_v44 = vld [vmem:[%s5020_s3 + $0x310] sm:$0xff] }
 0x38a   : > { %2428 = vmatpush.msra.mxu0 %v1979_v30  ;;  %2964 = vmatpush.msrb.mxu3 %v4724_v57 }
 0x38c   : > { %2268 = vmatmul.f32.gmra.mxu1 %v4384_v31  ;;  %2429 = vmatpush.msra.mxu0 %v1978_v11 }
 0x38d   : > { %2209 = vmatmul.f32.gmra.mxu3 %v4738_v27  ;;  %2333 = vmatmul.f32.gmra.mxu2 %v4467_v32 }
 0x38e   : > { %2430 = vmatpush.msra.mxu0 %v1977_v44  ;;  %2965 = vmatpush.msrb.mxu3 %v1980_v12 }
 0x390   : > { %v2080_v31 = vpop.f32.mrf.mxu3  ;;  %v2139_v17 = vpop.f32.mrf.mxu2  ;;  %2431 = vmatpush.msra.mxu0 %v1976_v22  ;;  %2966 = vmatpush.msrb.mxu3 %v1979_v30  ;;  %v4815_v30 = vld [vmem:[#allocation2 + $0xc0] sm:$0xff] }
 0x391   : > { %v2081_v62 = vadd.f32 %v4640_v18, %v2080_v31  ;;  %v4757_v15 = vadd.f32 %v2139_v17, %v2075_v5  ;;  %v4759_v24 = vpop.f32.mrf.mxu1 }
 0x392   : > { %2432 = vmatpush.msra.mxu0 %v1975_v45  ;;  %2967 = vmatpush.msrb.mxu3 %v1978_v11  ;;  %v2109_v11 = vpop.f32.mrf.mxu0 }
 0x393   : > { %2433 = vmatmul.f32.vlgmr.msra.gmra.mxu0 %v4420_v56  ;;  %v1991_v56 = vld [vmem:[%s5020_s3 + $0x380] sm:$0xff] }
 0x394   : > { %2271 = vmatmul.f32.gmra.mxu1 %v4426_v55  ;;  %2968 = vmatpush.msrb.mxu3 %v1977_v44 }
 0x395   : > { %2212 = vmatmul.f32.gmra.mxu3 %v4767_v8  ;;  %2336 = vmatmul.f32.gmra.mxu2 %v4488_v39 }
 0x396   : > { %2497 = vmatpush.msra.mxu1 %v1991_v56  ;;  %2969 = vmatpush.msrb.mxu3 %v1976_v22 }
 0x398   : > { %v2083_v5 = vpop.f32.mrf.mxu3  ;;  %v2142_v36 = vpop.f32.mrf.mxu2  ;;  %2970 = vmatpush.msrb.mxu3 %v1975_v45 }
 0x399   : > { %v2084_v54 = vadd.f32 %v4640_v18, %v2083_v5  ;;  %v4780_v51 = vadd.f32 %v2142_v36, %v2078_v50  ;;  %v4782_v13 = vpop.f32.mrf.mxu1  ;;  %v4825_v36 = vld [vmem:[#allocation2 + $0xc8] sm:$0xff] }
 0x39a   : > { %v2112_v56 = vpop.f32.mrf.mxu0 }
 0x39b   : > { %2436 = vmatmul.f32.gmra.mxu0 %v4459_v6 }
 0x39c   : > { %2274 = vmatmul.f32.gmra.mxu1 %v4465_v16 }
 0x39d   : > { %2215 = vmatmul.f32.gmra.mxu3 %v4788_v3  ;;  %2339 = vmatmul.f32.gmra.mxu2 %v4507_v28 }
 0x3a0   : > { %v2086_v43 = vpop.f32.mrf.mxu3  ;;  %v2145_v25 = vpop.f32.mrf.mxu2 }
 0x3a1   : > { %v2087_v50 = vadd.f32 %v4640_v18, %v2086_v43  ;;  %v4800_v31 = vadd.f32 %v2145_v25, %v2081_v62  ;;  %v4802_v17 = vpop.f32.mrf.mxu1 }
 0x3a3   : > { %2439 = vmatmul.f32.gmra.mxu0 %v4483_v35 }
 0x3a4   : > { %2277 = vmatmul.f32.gmra.mxu1 %v4486_v37 }
 0x3a5   : > { %2218 = vmatmul.f32.gmra.mxu3 %v4804_v23  ;;  %2342 = vmatmul.f32.gmra.mxu2 %v4522_v7 }
 0x3a8   : > { %v2089_v6 = vpop.f32.mrf.mxu3  ;;  %v2148_v57 = vpop.f32.mrf.mxu2 }
 0x3a9   : > { %v2090_v12 = vadd.f32 %v4640_v18, %v2089_v6  ;;  %v4811_v62 = vadd.f32 %v2148_v57, %v2084_v54  ;;  %v4813_v52 = vpop.f32.mrf.mxu1 }
 0x3ab   : > { %2442 = vmatmul.f32.gmra.mxu0 %v4504_v21  ;;  %v2045_v21 = vadd.f32 %v4640_v18, %v4630_v59  ;;  %v2115_v59 = vpop.f32.mrf.mxu0 }
 0x3ac   : > { %2280 = vmatmul.f32.gmra.mxu1 %v4815_v30 }
 0x3ad   : > { %2345 = vmatmul.f32.gmra.mxu2 %v4817_v26  ;;  %2368 = vmatmul.f32.vlgmr.msra.gmra.mxu3 %v4535_v63  ;;  %v2110_v6 = vadd.f32 %v2109_v11, %v2045_v21 }
 0x3b0   : > { %v2151_v35 = vpop.f32.mrf.mxu2  ;;  %v2174_v44 = vpop.f32.mrf.mxu3 }
 0x3b1   : > { %v4823_v22 = vadd.f32 %v2151_v35, %v2087_v50  ;;  %v2068_v5 = vpop.f32.mrf.mxu1  ;;  %v2175_v57 = vadd.f32 %v2174_v44, %v2110_v6 }
 0x3b2   : > { %v2069_v54 = vadd.f32 %v4640_v18, %v2068_v5 }
 0x3b3   : > { %2445 = vmatmul.f32.gmra.mxu0 %v4520_v41 }
 0x3b4   : > { %2283 = vmatmul.f32.gmra.mxu1 %v4825_v36  ;;  %v4832_v45 = vadd.f32 %v4688_v40, %v2069_v54  ;;  %v1644_v40 = vld [vmem:[#allocation2 + $0x68] sm:$0xff] }
 0x3b5   : > { %2348 = vmatmul.f32.gmra.mxu2 %v4828_v20  ;;  %2371 = vmatmul.f32.gmra.mxu3 %v4549_v42  ;;  %v2048_v42 = vadd.f32 %v4640_v18, %v4660_v2 }
 0x3b7   : > { %v2113_v11 = vadd.f32 %v2112_v56, %v2048_v42 }
 0x3b8   : > { %v2154_v63 = vpop.f32.mrf.mxu2  ;;  %v2177_v43 = vpop.f32.mrf.mxu3 }
 0x3b9   : > { %v4839_v25 = vadd.f32 %v2154_v63, %v2090_v12  ;;  %v2239_v50 = vpop.f32.mrf.mxu1  ;;  %v2178_v44 = vadd.f32 %v2177_v43, %v2113_v11 }
 0x3ba   : > { %v2240_v35 = vadd.f32 %v2239_v50, %v2175_v57  ;;  %v2118_v50 = vpop.f32.mrf.mxu0 }
 0x3bb   : > { %2448 = vmatmul.f32.gmra.mxu0 %v1644_v40 }
 0x3bc   : > { %2498 = vmatmul.f32.vlgmr.msra.gmra.mxu1 %v4448_v58  ;;  %v1645_v58 = vld [vmem:[#allocation2 + $0x78] sm:$0xff] }
 0x3bd   : > { %2374 = vmatmul.f32.gmra.mxu3 %v4563_v1  ;;  %2563 = vmatmul.f32.vlgmr.msra.gmra.mxu2 %v4563_v1  ;;  %v2051_v1 = vadd.f32 %v4640_v18, %v4691_v46 }
 0x3bf   : > { %v2116_v56 = vadd.f32 %v2115_v59, %v2051_v1 }
 0x3c0   : > { %v2180_v41 = vpop.f32.mrf.mxu3  ;;  %v2304_v5 = vpop.f32.mrf.mxu2 }
 0x3c1   : > { %v4846_v12 = vadd.f32 %v2304_v5, %v2240_v35  ;;  %v2242_v54 = vpop.f32.mrf.mxu1  ;;  %v2181_v43 = vadd.f32 %v2180_v41, %v2116_v56 }
 0x3c2   : > { %v2243_v2 = vadd.f32 %v2242_v54, %v2178_v44  ;;  %v1674_v54 = vld [vmem:[#allocation2 + $0x51] sm:$0xff]  ;;  %v2121_v11 = vpop.f32.mrf.mxu0 }
 0x3c3   : > { %2451 = vmatmul.f32.gmra.mxu0 %v1645_v58 }
 0x3c4   : > { %2501 = vmatmul.f32.gmra.mxu1 %v4481_v10  ;;  %v1646_v10 = vld [vmem:[#allocation2 + $0x80] sm:$0xff] }
 0x3c5   : > { %2377 = vmatmul.f32.gmra.mxu3 %v4577_v14  ;;  %2566 = vmatmul.f32.gmra.mxu2 %v4577_v14  ;;  %v2054_v14 = vadd.f32 %v4640_v18, %v4730_v9 }
 0x3c7   : > { %v2119_v59 = vadd.f32 %v2118_v50, %v2054_v14 }
 0x3c8   : > { %v2183_v21 = vpop.f32.mrf.mxu3  ;;  %v2307_v63 = vpop.f32.mrf.mxu2 }
 0x3c9   : > { %v4853_v6 = vadd.f32 %v2307_v63, %v2243_v2  ;;  %v2245_v40 = vpop.f32.mrf.mxu1  ;;  %v2184_v41 = vadd.f32 %v2183_v21, %v2119_v59 }
 0x3ca   : > { %v2246_v46 = vadd.f32 %v2245_v40, %v2181_v43  ;;  %v2124_v50 = vpop.f32.mrf.mxu0 }
 0x3cb   : > { %2454 = vmatmul.f32.gmra.mxu0 %v1646_v10 }
 0x3cc   : > { %2504 = vmatmul.f32.gmra.mxu1 %v4502_v60  ;;  %v1647_v60 = vld [vmem:[#allocation2 + $0x90] sm:$0xff] }
 0x3cd   : > { %2380 = vmatmul.f32.gmra.mxu3 %v4591_v38  ;;  %2569 = vmatmul.f32.gmra.mxu2 %v4591_v38  ;;  %v2057_v38 = vadd.f32 %v4640_v18, %v4759_v24 }
 0x3cf   : > { %v2122_v63 = vadd.f32 %v2121_v11, %v2057_v38 }
 0x3d0   : > { %v2186_v57 = vpop.f32.mrf.mxu3  ;;  %v2310_v42 = vpop.f32.mrf.mxu2 }
 0x3d1   : > { %v4860_v35 = vadd.f32 %v2310_v42, %v2246_v46  ;;  %v2248_v5 = vpop.f32.mrf.mxu1  ;;  %v2187_v40 = vadd.f32 %v2186_v57, %v2122_v63 }
 0x3d2   : > { %v2249_v9 = vadd.f32 %v2248_v5, %v2184_v41 }
 0x3d3   : > { %2457 = vmatmul.f32.gmra.mxu0 %v1647_v60 }
 0x3d4   : > { %2507 = vmatmul.f32.gmra.mxu1 %v1674_v54 }
 0x3d5   : > { %2383 = vmatmul.f32.gmra.mxu3 %v4605_v49  ;;  %2572 = vmatmul.f32.gmra.mxu2 %v4605_v49  ;;  %v2060_v49 = vadd.f32 %v4640_v18, %v4782_v13 }
 0x3d7   : > { %v2125_v14 = vadd.f32 %v2124_v50, %v2060_v49 }
 0x3d8   : > { %v2189_v58 = vpop.f32.mrf.mxu3  ;;  %v2313_v44 = vpop.f32.mrf.mxu2 }
 0x3d9   : > { %v4866_v1 = vadd.f32 %v2313_v44, %v2249_v9  ;;  %v2251_v2 = vpop.f32.mrf.mxu1  ;;  %v2190_v46 = vadd.f32 %v2189_v58, %v2125_v14  ;;  %v1620_v14 = vld [vmem:[#allocation2 + $0xc2] sm:$0xff] }
 0x3da   : > { %v2252_v24 = vadd.f32 %v2251_v2, %v2187_v40 }
 0x3db   : > { %2460 = vmatmul.f32.gmra.mxu0 %v4426_v55  ;;  %v2127_v55 = vpop.f32.mrf.mxu0 }
 0x3dc   : > { %2510 = vmatmul.f32.gmra.mxu1 %v4306_v29  ;;  %v2066_v29 = vadd.f32 %v4640_v18, %v4813_v52 }
 0x3dd   : > { %2386 = vmatmul.f32.gmra.mxu3 %v4619_v47  ;;  %2575 = vmatmul.f32.gmra.mxu2 %v4619_v47  ;;  %v2063_v47 = vadd.f32 %v4640_v18, %v4802_v17 }
 0x3de   : > { %v2131_v57 = vadd.f32 %v4657_v34, %v2066_v29 }
 0x3df   : > { %v2128_v59 = vadd.f32 %v2127_v55, %v2063_v47 }
 0x3e0   : > { %v2192_v21 = vpop.f32.mrf.mxu3  ;;  %v2316_v56 = vpop.f32.mrf.mxu2 }
 0x3e1   : > { %v4874_v10 = vadd.f32 %v2316_v56, %v2252_v24  ;;  %v2254_v43 = vpop.f32.mrf.mxu1  ;;  %v2193_v11 = vadd.f32 %v2192_v21, %v2128_v59 }
 0x3e2   : > { %v2255_v13 = vadd.f32 %v2254_v43, %v2190_v46 }
 0x3e3   : > { %2463 = vmatmul.f32.gmra.mxu0 %v4465_v16 }
 0x3e4   : > { %2513 = vmatmul.f32.gmra.mxu1 %v4344_v0 }
 0x3e5   : > { %2389 = vmatmul.f32.gmra.mxu3 %v4635_v53  ;;  %2578 = vmatmul.f32.gmra.mxu2 %v4635_v53 }
 0x3e8   : > { %v2195_v42 = vpop.f32.mrf.mxu3  ;;  %v2319_v5 = vpop.f32.mrf.mxu2 }
 0x3e9   : > { %v2196_v54 = vadd.f32 %v2195_v42, %v2131_v57  ;;  %v4885_v52 = vadd.f32 %v2319_v5, %v2255_v13  ;;  %v2257_v0 = vpop.f32.mrf.mxu1  ;;  %v1621_v13 = vld [vmem:[#allocation2 + $0xca] sm:$0xff] }
 0x3ea   : > { %v2258_v53 = vadd.f32 %v2257_v0, %v2193_v11  ;;  %v1717_v11 = vld [vmem:[#allocation2 + $0xda] sm:$0xff] }
 0x3eb   : > { %2466 = vmatmul.f32.gmra.mxu0 %v4486_v37 }
 0x3ec   : > { %2516 = vmatmul.f32.gmra.mxu1 %v4386_v4 }
 0x3ed   : > { %2392 = vmatmul.f32.gmra.mxu3 %v4668_v48  ;;  %2581 = vmatmul.f32.gmra.mxu2 %v4668_v48 }
 0x3f0   : > { %v2198_v18 = vpop.f32.mrf.mxu3  ;;  %v2322_v34 = vpop.f32.mrf.mxu2 }
 0x3f1   : > { %v2199_v16 = vadd.f32 %v2198_v18, %v4832_v45  ;;  %v4892_v17 = vadd.f32 %v2322_v34, %v2258_v53  ;;  %v2260_v60 = vpop.f32.mrf.mxu1 }
 0x3f2   : > { %v2261_v4 = vadd.f32 %v2260_v60, %v2196_v54  ;;  %v1685_v54 = vld [vmem:[#allocation2 + $0xd9] sm:$0xff] }
 0x3f3   : > { %2469 = vmatmul.f32.gmra.mxu0 %v4815_v30 }
 0x3f4   : > { %2519 = vmatmul.f32.gmra.mxu1 %v4428_v19 }
 0x3f5   : > { %2395 = vmatmul.f32.gmra.mxu3 %v4699_v33  ;;  %2584 = vmatmul.f32.gmra.mxu2 %v4699_v33 }
 0x3f8   : > { %v2201_v48 = vpop.f32.mrf.mxu3  ;;  %v2325_v41 = vpop.f32.mrf.mxu2 }
 0x3f9   : > { %v2202_v37 = vadd.f32 %v2201_v48, %v4728_v61  ;;  %v4899_v38 = vadd.f32 %v2325_v41, %v2261_v4  ;;  %v2263_v9 = vpop.f32.mrf.mxu1  ;;  %v1654_v4 = vld [vmem:[#allocation2 + $0xe0] sm:$0xff] }
 0x3fa   : > { %v2264_v45 = vadd.f32 %v2263_v9, %v2199_v16  ;;  %v1686_v16 = vld [vmem:[#allocation2 + $0xe1] sm:$0xff] }
 0x3fb   : > { %2472 = vmatmul.f32.gmra.mxu0 %v4825_v36 }
 0x3fc   : > { %2522 = vmatmul.f32.gmra.mxu1 %v4467_v32 }
 0x3fd   : > { %2398 = vmatmul.f32.gmra.mxu3 %v4738_v27  ;;  %2587 = vmatmul.f32.gmra.mxu2 %v4738_v27 }
 0x400   : > { %v2204_v19 = vpop.f32.mrf.mxu3  ;;  %v2328_v33 = vpop.f32.mrf.mxu2 }
 0x401   : > { %v2205_v30 = vadd.f32 %v2204_v19, %v4757_v15  ;;  %v4906_v58 = vadd.f32 %v2328_v33, %v2264_v45  ;;  %v2266_v44 = vpop.f32.mrf.mxu1 }
 0x402   : > { %v2267_v61 = vadd.f32 %v2266_v44, %v2202_v37 }
 0x404   : > { %2525 = vmatmul.f32.gmra.mxu1 %v4488_v39 }
 0x405   : > { %2401 = vmatmul.f32.gmra.mxu3 %v4767_v8  ;;  %2590 = vmatmul.f32.gmra.mxu2 %v4767_v8 }
 0x408   : > { %v2207_v32 = vpop.f32.mrf.mxu3  ;;  %v2331_v2 = vpop.f32.mrf.mxu2 }
 0x409   : > { %v2208_v27 = vadd.f32 %v2207_v32, %v4780_v51  ;;  %v4912_v63 = vadd.f32 %v2331_v2, %v2267_v61  ;;  %v2269_v36 = vpop.f32.mrf.mxu1 }
 0x40a   : > { %v2270_v50 = vadd.f32 %v2269_v36, %v2205_v30 }
 0x40c   : > { %2528 = vmatmul.f32.gmra.mxu1 %v4507_v28 }
 0x40d   : > { %2404 = vmatmul.f32.gmra.mxu3 %v4788_v3  ;;  %2593 = vmatmul.f32.gmra.mxu2 %v4788_v3 }
 0x410   : > { %v2210_v15 = vpop.f32.mrf.mxu3  ;;  %v2334_v39 = vpop.f32.mrf.mxu2 }
 0x411   : > { %v2211_v40 = vadd.f32 %v2210_v15, %v4800_v31  ;;  %v4918_v49 = vadd.f32 %v2334_v39, %v2270_v50  ;;  %v2272_v8 = vpop.f32.mrf.mxu1  ;;  %v2434_v31 = vpop.f32.mrf.mxu0 }
 0x412   : > { %v2273_v24 = vadd.f32 %v2272_v8, %v2208_v27 }
 0x414   : > { %2531 = vmatmul.f32.gmra.mxu1 %v4522_v7 }
 0x415   : > { %2407 = vmatmul.f32.gmra.mxu3 %v4804_v23  ;;  %2596 = vmatmul.f32.gmra.mxu2 %v4804_v23 }
 0x418   : > { %v2213_v51 = vpop.f32.mrf.mxu3  ;;  %v2337_v28 = vpop.f32.mrf.mxu2 }
 0x419   : > { %v2214_v21 = vadd.f32 %v2213_v51, %v4811_v62  ;;  %v4924_v56 = vadd.f32 %v2337_v28, %v2273_v24  ;;  %v2275_v3 = vpop.f32.mrf.mxu1  ;;  %v2437_v0 = vpop.f32.mrf.mxu0 }
 0x41a   : > { %v2276_v43 = vadd.f32 %v2275_v3, %v2211_v40 }
 0x41c   : > { %2534 = vmatmul.f32.gmra.mxu1 %v4817_v26 }
 0x41d   : > { %2410 = vmatmul.f32.gmra.mxu3 %v1620_v14  ;;  %2599 = vmatmul.f32.gmra.mxu2 %v1620_v14 }
 0x420   : > { %v2216_v29 = vpop.f32.mrf.mxu3  ;;  %v2340_v7 = vpop.f32.mrf.mxu2 }
 0x421   : > { %v2217_v46 = vadd.f32 %v2216_v29, %v4823_v22  ;;  %v4928_v47 = vadd.f32 %v2340_v7, %v2276_v43  ;;  %v2278_v23 = vpop.f32.mrf.mxu1  ;;  %v1653_v22 = vld [vmem:[#allocation2 + $0xd8] sm:$0xff]  ;;  %v2440_v48 = vpop.f32.mrf.mxu0 }
 0x422   : > { %v2279_v55 = vadd.f32 %v2278_v23, %v2214_v21 }
 0x424   : > { %2537 = vmatmul.f32.gmra.mxu1 %v4828_v20 }
 0x425   : > { %2413 = vmatmul.f32.gmra.mxu3 %v1621_v13  ;;  %2602 = vmatmul.f32.gmra.mxu2 %v1621_v13 }
 0x428   : > { %v2219_v62 = vpop.f32.mrf.mxu3  ;;  %v2343_v57 = vpop.f32.mrf.mxu2 }
 0x429   : > { %v2220_v26 = vadd.f32 %v2219_v62, %v4839_v25  ;;  %v4932_v42 = vadd.f32 %v2343_v57, %v2279_v55  ;;  %v2281_v5 = vpop.f32.mrf.mxu1  ;;  %v1718_v25 = vld [vmem:[#allocation2 + $0xe2] sm:$0xff]  ;;  %v2443_v30 = vpop.f32.mrf.mxu0 }
 0x42a   : > { %v2282_v59 = vadd.f32 %v2281_v5, %v2217_v46 }
 0x42c   : > { %2540 = vmatmul.f32.gmra.mxu1 %v1685_v54 }
 0x42d   : > { %2475 = vmatmul.f32.vlgmr.msrb.gmra.mxu3 %v1653_v22  ;;  %2605 = vmatmul.f32.gmra.mxu2 %v1717_v11 }
 0x430   : > { %v2346_v53 = vpop.f32.mrf.mxu2  ;;  %v2369_v18 = vpop.f32.mrf.mxu3 }
 0x431   : > { %v4934_v20 = vadd.f32 %v2346_v53, %v2282_v59  ;;  %v2284_v34 = vpop.f32.mrf.mxu1  ;;  %v2370_v9 = vadd.f32 %v2369_v18, %v4846_v12  ;;  %v2446_v40 = vpop.f32.mrf.mxu0 }
 0x432   : > { %v2285_v60 = vadd.f32 %v2284_v34, %v2220_v26 }
 0x433   : > { %v2435_v33 = vadd.f32 %v2434_v31, %v2370_v9 }
 0x434   : > { %2543 = vmatmul.f32.gmra.mxu1 %v1686_v16 }
 0x435   : > { %2478 = vmatmul.f32.gmra.mxu3 %v1654_v4  ;;  %2608 = vmatmul.f32.gmra.mxu2 %v1718_v25 }
 0x438   : > { %v2349_v41 = vpop.f32.mrf.mxu2  ;;  %v2372_v37 = vpop.f32.mrf.mxu3 }
 0x439   : > { %v4937_v45 = vadd.f32 %v2349_v41, %v2285_v60  ;;  %v2499_v19 = vpop.f32.mrf.mxu1  ;;  %v2373_v2 = vadd.f32 %v2372_v37, %v4853_v6  ;;  %v2449_v46 = vpop.f32.mrf.mxu0 }
 0x43a   : > { %v2500_v44 = vadd.f32 %v2499_v19, %v2435_v33 }
 0x43b   : > { %v2438_v15 = vadd.f32 %v2437_v0, %v2373_v2 }
 0x440   : > { %v2375_v61 = vpop.f32.mrf.mxu3  ;;  %v2564_v32 = vpop.f32.mrf.mxu2 }
 0x441   : > { %v2565_v27 = vadd.f32 %v2564_v32, %v2500_v44  ;;  %v2502_v36 = vpop.f32.mrf.mxu1  ;;  %v2376_v24 = vadd.f32 %v2375_v61, %v4860_v35  ;;  %v2452_v0 = vpop.f32.mrf.mxu0 }
 0x442   : > { %v2503_v39 = vadd.f32 %v2502_v36, %v2438_v15 }
 0x443   : > { %v2612_v50 = vmax.f32 %v2565_v27, 0.0  ;;  %v2441_v3 = vadd.f32 %v2440_v48, %v2376_v24 }
 0x445   : > { %2628 = vst [vmem:[%s4168_s12] sm:$0xff] %v2612_v50 }
 0x448   : > { %v2378_v8 = vpop.f32.mrf.mxu3  ;;  %v2567_v12 = vpop.f32.mrf.mxu2 }
 0x449   : > { %v2568_v51 = vadd.f32 %v2567_v12, %v2503_v39  ;;  %v2505_v28 = vpop.f32.mrf.mxu1  ;;  %v2379_v31 = vadd.f32 %v2378_v8, %v4866_v1  ;;  %v2455_v4 = vpop.f32.mrf.mxu0 }
 0x44a   : > { %v2506_v43 = vadd.f32 %v2505_v28, %v2441_v3 }
 0x44b   : > { %v2613_v21 = vmax.f32 %v2568_v51, 0.0  ;;  %v2444_v55 = vadd.f32 %v2443_v30, %v2379_v31 }
 0x44d   : > { %2629 = vst [vmem:[%s4168_s12 + $0x8] sm:$0xff] %v2613_v21 }
 0x450   : > { %v2381_v14 = vpop.f32.mrf.mxu3  ;;  %v2570_v6 = vpop.f32.mrf.mxu2 }
 0x451   : > { %v2571_v29 = vadd.f32 %v2570_v6, %v2506_v43  ;;  %v2508_v7 = vpop.f32.mrf.mxu1  ;;  %v2382_v57 = vadd.f32 %v2381_v14, %v4874_v10  ;;  %v2458_v44 = vpop.f32.mrf.mxu0 }
 0x452   : > { %v2509_v13 = vadd.f32 %v2508_v7, %v2444_v55 }
 0x453   : > { %v2614_v23 = vmax.f32 %v2571_v29, 0.0  ;;  %v2447_v59 = vadd.f32 %v2446_v40, %v2382_v57 }
 0x455   : > { %2630 = vst [vmem:[%s4168_s12 + $0x10] sm:$0xff] %v2614_v23 }
 0x458   : > { %v2384_v62 = vpop.f32.mrf.mxu3  ;;  %v2573_v35 = vpop.f32.mrf.mxu2 }
 0x459   : > { %v2574_v26 = vadd.f32 %v2573_v35, %v2509_v13  ;;  %v2511_v5 = vpop.f32.mrf.mxu1  ;;  %v2385_v53 = vadd.f32 %v2384_v62, %v4885_v52  ;;  %v2461_v12 = vpop.f32.mrf.mxu0 }
 0x45a   : > { %v2512_v1 = vadd.f32 %v2511_v5, %v2447_v59 }
 0x45b   : > { %v2615_v54 = vmax.f32 %v2574_v26, 0.0  ;;  %v2450_v60 = vadd.f32 %v2449_v46, %v2385_v53 }
 0x45d   : > { %2631 = vst [vmem:[%s4168_s12 + $0x18] sm:$0xff] %v2615_v54 }
 0x460   : > { %v2387_v22 = vpop.f32.mrf.mxu3  ;;  %v2576_v11 = vpop.f32.mrf.mxu2 }
 0x461   : > { %v2577_v18 = vadd.f32 %v2576_v11, %v2512_v1  ;;  %v2514_v34 = vpop.f32.mrf.mxu1  ;;  %v2388_v41 = vadd.f32 %v2387_v22, %v4892_v17  ;;  %v2464_v29 = vpop.f32.mrf.mxu0 }
 0x462   : > { %v2515_v25 = vadd.f32 %v2514_v34, %v2450_v60 }
 0x463   : > { %v2616_v16 = vmax.f32 %v2577_v18, 0.0  ;;  %v2453_v33 = vadd.f32 %v2452_v0, %v2388_v41 }
 0x465   : > { %2632 = vst [vmem:[%s4168_s12 + $0x20] sm:$0xff] %v2616_v16 }
 0x468   : > { %v2390_v10 = vpop.f32.mrf.mxu3  ;;  %v2579_v48 = vpop.f32.mrf.mxu2 }
 0x469   : > { %v2580_v37 = vadd.f32 %v2579_v48, %v2515_v25  ;;  %v2517_v9 = vpop.f32.mrf.mxu1  ;;  %v2391_v32 = vadd.f32 %v2390_v10, %v4899_v38  ;;  %v2467_v26 = vpop.f32.mrf.mxu0 }
 0x46a   : > { %v2518_v30 = vadd.f32 %v2517_v9, %v2453_v33 }
 0x46b   : > { %v2617_v19 = vmax.f32 %v2580_v37, 0.0  ;;  %v2456_v50 = vadd.f32 %v2455_v4, %v2391_v32 }
 0x46d   : > { %2633 = vst [vmem:[%s4168_s12 + $0x28] sm:$0xff] %v2617_v19 }
 0x470   : > { %v2393_v52 = vpop.f32.mrf.mxu3  ;;  %v2582_v61 = vpop.f32.mrf.mxu2 }
 0x471   : > { %v2583_v2 = vadd.f32 %v2582_v61, %v2518_v30  ;;  %v2520_v27 = vpop.f32.mrf.mxu1  ;;  %v2394_v40 = vadd.f32 %v2393_v52, %v4906_v58  ;;  %v2470_v53 = vpop.f32.mrf.mxu0 }
 0x472   : > { %v2521_v15 = vadd.f32 %v2520_v27, %v2456_v50 }
 0x473   : > { %v2618_v36 = vmax.f32 %v2583_v2, 0.0  ;;  %v2459_v28 = vadd.f32 %v2458_v44, %v2394_v40 }
 0x475   : > { %2634 = vst [vmem:[%s4168_s12 + $0x30] sm:$0xff] %v2618_v36 }
 0x478   : > { %v2396_v39 = vpop.f32.mrf.mxu3  ;;  %v2585_v17 = vpop.f32.mrf.mxu2 }
 0x479   : > { %v2586_v8 = vadd.f32 %v2585_v17, %v2521_v15  ;;  %v2523_v24 = vpop.f32.mrf.mxu1  ;;  %v2397_v43 = vadd.f32 %v2396_v39, %v4912_v63  ;;  %v2473_v19 = vpop.f32.mrf.mxu0 }
 0x47a   : > { %v2524_v21 = vadd.f32 %v2523_v24, %v2459_v28 }
 0x47b   : > { %v2619_v51 = vmax.f32 %v2586_v8, 0.0  ;;  %v2462_v7 = vadd.f32 %v2461_v12, %v2397_v43 }
 0x47d   : > { %2635 = vst [vmem:[%s4168_s12 + $0x38] sm:$0xff] %v2619_v51 }
 0x480   : > { %v2399_v3 = vpop.f32.mrf.mxu3  ;;  %v2588_v38 = vpop.f32.mrf.mxu2 }
 0x481   : > { %v2589_v14 = vadd.f32 %v2588_v38, %v2524_v21  ;;  %v2526_v6 = vpop.f32.mrf.mxu1  ;;  %v2400_v55 = vadd.f32 %v2399_v3, %v4918_v49 }
 0x482   : > { %v2527_v58 = vadd.f32 %v2526_v6, %v2462_v7 }
 0x483   : > { %v2620_v31 = vmax.f32 %v2589_v14, 0.0  ;;  %v2465_v57 = vadd.f32 %v2464_v29, %v2400_v55 }
 0x485   : > { %2636 = vst [vmem:[%s4168_s12 + $0x40] sm:$0xff] %v2620_v31 }
 0x488   : > { %v2402_v46 = vpop.f32.mrf.mxu3  ;;  %v2591_v23 = vpop.f32.mrf.mxu2 }
 0x489   : > { %v2592_v13 = vadd.f32 %v2591_v23, %v2527_v58  ;;  %v2529_v62 = vpop.f32.mrf.mxu1  ;;  %v2403_v0 = vadd.f32 %v2402_v46, %v4924_v56 }
 0x48a   : > { %v2530_v5 = vadd.f32 %v2529_v62, %v2465_v57 }
 0x48b   : > { %v2621_v35 = vmax.f32 %v2592_v13, 0.0  ;;  %v2468_v11 = vadd.f32 %v2467_v26, %v2403_v0 }
 0x48d   : > { %2637 = vst [vmem:[%s4168_s12 + $0x48] sm:$0xff] %v2621_v35 }
 0x490   : > { %v2405_v63 = vpop.f32.mrf.mxu3  ;;  %v2594_v54 = vpop.f32.mrf.mxu2 }
 0x491   : > { %v2595_v59 = vadd.f32 %v2594_v54, %v2530_v5  ;;  %v2532_v1 = vpop.f32.mrf.mxu1  ;;  %v2406_v16 = vadd.f32 %v2405_v63, %v4928_v47 }
 0x492   : > { %v2533_v18 = vadd.f32 %v2532_v1, %v2468_v11 }
 0x493   : > { %v2622_v22 = vmax.f32 %v2595_v59, 0.0  ;;  %v2471_v10 = vadd.f32 %v2470_v53, %v2406_v16 }
 0x495   : > { %2638 = vst [vmem:[%s4168_s12 + $0x50] sm:$0xff] %v2622_v22 }
 0x498   : > { %v2408_v49 = vpop.f32.mrf.mxu3  ;;  %v2597_v34 = vpop.f32.mrf.mxu2 }
 0x499   : > { %v2598_v60 = vadd.f32 %v2597_v34, %v2533_v18  ;;  %v2535_v4 = vpop.f32.mrf.mxu1  ;;  %v2409_v37 = vadd.f32 %v2408_v49, %v4932_v42 }
 0x49a   : > { %v2536_v48 = vadd.f32 %v2535_v4, %v2471_v10 }
 0x49b   : > { %v2623_v25 = vmax.f32 %v2598_v60, 0.0  ;;  %v2474_v44 = vadd.f32 %v2473_v19, %v2409_v37 }
 0x49d   : > { %2639 = vst [vmem:[%s4168_s12 + $0x58] sm:$0xff] %v2623_v25 }
 0x4a0   : > { %v2411_v56 = vpop.f32.mrf.mxu3  ;;  %v2600_v41 = vpop.f32.mrf.mxu2 }
 0x4a1   : > { %v2601_v9 = vadd.f32 %v2600_v41, %v2536_v48  ;;  %v2538_v30 = vpop.f32.mrf.mxu1  ;;  %v2412_v36 = vadd.f32 %v2411_v56, %v4934_v20 }
 0x4a2   : > { %v2539_v47 = vadd.f32 %v2538_v30, %v2474_v44 }
 0x4a3   : > { %v2624_v33 = vmax.f32 %v2601_v9, 0.0 }
 0x4a5   : > { %2640 = vst [vmem:[%s4168_s12 + $0x60] sm:$0xff] %v2624_v33 }
 0x4a8   : > { %v2414_v52 = vpop.f32.mrf.mxu3  ;;  %v2603_v61 = vpop.f32.mrf.mxu2 }
 0x4a9   : > { %v2604_v32 = vadd.f32 %v2603_v61, %v2539_v47  ;;  %v2541_v27 = vpop.f32.mrf.mxu1  ;;  %v2415_v40 = vadd.f32 %v2414_v52, %v4937_v45 }
 0x4ab   : > { %v2625_v2 = vmax.f32 %v2604_v32, 0.0 }
 0x4ad   : > { %2641 = vst [vmem:[%s4168_s12 + $0x68] sm:$0xff] %v2625_v2 }
 0x4b0   : > { %v2476_v50 = vpop.f32.mrf.mxu3  ;;  %v2606_v42 = vpop.f32.mrf.mxu2 }
 0x4b1   : > { %v2477_v15 = vadd.f32 %v2476_v50, %v2412_v36  ;;  %v2544_v24 = vpop.f32.mrf.mxu1 }
 0x4b3   : > { %v2542_v39 = vadd.f32 %v2541_v27, %v2477_v15 }
 0x4b5   : > { %v2607_v17 = vadd.f32 %v2606_v42, %v2542_v39 }
 0x4b7   : > { %v2626_v8 = vmax.f32 %v2607_v17, 0.0 }
 0x4b8   : > { %v2479_v12 = vpop.f32.mrf.mxu3  ;;  %v2609_v20 = vpop.f32.mrf.mxu2 }
 0x4b9   : > { %2642 = vst [vmem:[%s4168_s12 + $0x70] sm:$0xff] %v2626_v8  ;;  %v2480_v51 = vadd.f32 %v2479_v12, %v2415_v40 }
 0x4bb   : > { %v2545_v28 = vadd.f32 %v2544_v24, %v2480_v51 }
 0x4bd   : > { %v2610_v21 = vadd.f32 %v2609_v20, %v2545_v28 }
 0x4bf   : > { %v2627_v3 = vmax.f32 %v2610_v21, 0.0 }
 0x4c1   : > { %2643 = vst [vmem:[%s4168_s12 + $0x78] sm:$0xff] %v2627_v3 }
 0x4c2   : > { %3127 = shalt.err (!%p3124_p12)
}
 0x4c3   : > { %s3214_s27 = smov 128   ;;  %s5056_s12 = smov 8  }
 0x4c4   : > { %2976 = dma.vmem_to_hbm [thread:$0]  (%p3297_p3), %s2660_s22, 2048, %s2662_s15, %s2645_s13, %s3214_s27, %s3214_s27, %s5056_s12  }
 0x4c5 PF: > { %p2988_p13 = scmp.ge.s32.totalorder %s3198_s25, 2  ;;  %s2676_s11 = sand.u32 1, %s3170_s18  }
 0x4c6   : > { %s2677_s21 = scalar_lea.sflag [#allocation6], %s2676_s11 }
 0x4c7   : > { %p2983_p0 = pnand %p2988_p13, %p3306_p8 }
 0x4c9   : > { %p2984_p1 = pneg %p2983_p0 }
 0x4cb   : > { %3165 = dma.done.wait (%p2984_p1), %s2677_s21, 2048  }
 0x4cc   : > { %3167 = vsyncadd (%p2984_p1), %s2677_s21, 4294965248  ;;  %s19_s25 = sadd.s32 1, %s3198_s25   ;;  %s5057_s18 = smov %s3174_s19 }
 0x4cd   : > { %p16_p2 = scmp.ge.s32.totalorder %s19_s25, 6   ;;  %s5058_s19 = smov %s3178_s20 }
 0x4ce   : > { %s5059_s20 = smov %s3327_s16  ;;  %s5060_s21 = smov %s3190_s23 }
 0x4cf   : > { %s5061_s22 = smov %s3194_s24  ;;  %s5062_s23 = smov %s5065_s28 }
 0x4d0   : > { %s5063_s24 = smov %s5069_s29  ;;  %18 = sbr.rel (!%p16_p2) target bundleno = 6 (0x6), region = 94 }
 0x4d5   :  { %2683 = vsyncpa [#allocation5], 1 }
 0x4d6   :  { %2685 = vsyncpa [#allocation5 + $0x1], 1 }
 0x4d7   :  { %2686 = vsyncpa [#allocation6], 1 }
 0x4d8   :  { %2688 = vsyncpa [#allocation6 + $0x1], 1 }

</bundles_post_ra>
